<compile_context>
chip_gen: v7x
topology: tpu7x:2x2x1
jax: 0.10.0
libtpu: 0.0.40
codegen_flags: <defaults>
</compile_context>

<pallas_src>
import functools

import jax
import jax.numpy as jnp
from jax.experimental import pallas as pl
from jax.experimental.pallas import tpu as pltpu

BN_EPS = 1e-5
LANE = 128          # lane-dense padding unit
HID = 1024          # hidden width of layers 1 and 2
HID3 = 256          # hidden width of layer 3
TN2 = 256           # streamed column-tile width for w2
NT2 = HID // TN2    # number of w2 column tiles (4)


def _round_up(n, m):
    return ((n + m - 1) // m) * m


def _bn_relu(h, g, be):
    """Training-mode BatchNorm1d (batch stats, biased variance) folded into a
    single affine, then ReLU.  Stats in f32; output cast to bf16 for the next
    MXU pass.  Variance clamped >= 0 (one-pass form can round negative)."""
    mu = jnp.mean(h, axis=0, keepdims=True)                        # (1, C)
    var = jnp.maximum(jnp.mean(h * h, axis=0, keepdims=True) - mu * mu, 0.0)
    scale = g * jax.lax.rsqrt(var + BN_EPS)                        # rsqrt -> EUP
    shift = be - mu * scale
    return jnp.maximum(h * scale + shift, 0.0).astype(jnp.bfloat16)


def mlp_kernel(x_ref,
               w1_ref, g1_ref, be1_ref,
               w2_hbm, g2_ref, be2_ref,
               w3_hbm, g3_ref, be3_ref,
               w4_ref, b4_ref,
               o_ref,
               w2_buf, w3_buf, h2_ref, sems):
    # w2_hbm: (NT2, HID, TN2) bf16 in HBM, streamed tile-by-tile.
    # w3_hbm: (HID, HID3) bf16 in HBM, prefetched once.
    def w2_copy(j, slot):
        return pltpu.make_async_copy(w2_hbm.at[j], w2_buf.at[slot], sems.at[slot])

    w3_copy = pltpu.make_async_copy(w3_hbm, w3_buf, sems.at[2])

    # Kick off the streamed / prefetched weight DMAs before any compute so they
    # hide under layer-1 / layer-2 work.
    w2_copy(0, 0).start()
    w3_copy.start()

    # ---- Layer 1: Linear(ch_in_pad -> 1024) + BN + ReLU (overlaps w2 tile 0) ----
    x = x_ref[...].astype(jnp.bfloat16)          # in-kernel cast, hidden under DMA
    h1 = _bn_relu(jnp.dot(x, w1_ref[...], preferred_element_type=jnp.float32),
                  g1_ref[...], be1_ref[...])

    # ---- Layer 2: Linear(1024 -> 1024) + BN + ReLU, w2 streamed in column tiles.
    # Per-column-tile BN is exact: stats are per-feature over the resident batch.
    g2 = g2_ref[...]
    be2 = be2_ref[...]
    for j in range(NT2):                         # static unroll (NT2 = 4)
        slot = j & 1
        w2_copy(j, slot).wait()
        if j + 1 < NT2:
            w2_copy(j + 1, 1 - slot).start()     # prefetch next tile under compute
        cols = slice(j * TN2, (j + 1) * TN2)
        h2j = jnp.dot(h1, w2_buf[slot], preferred_element_type=jnp.float32)
        h2_ref[:, cols] = _bn_relu(h2j, g2[:, cols], be2[:, cols])

    # ---- Layer 3: Linear(1024 -> 256) + BN + ReLU (w3 prefetch finishes here) ----
    w3_copy.wait()
    h3 = _bn_relu(jnp.dot(h2_ref[...], w3_buf[...],
                          preferred_element_type=jnp.float32),
                  g3_ref[...], be3_ref[...])

    # ---- Layer 4: Linear(256 -> out_pad), lane-dense padded output ----
    o_ref[...] = (jnp.dot(h3, w4_ref[...], preferred_element_type=jnp.float32)
                  + b4_ref[...]).astype(o_ref.dtype)


def _vmem_limit_bytes(batch):
    """Footprint-derived VMEM budget (v5e/v6e 128 MiB, v7x 64 MiB aware)."""
    # Fixed: resident weights/params (~0.4 MiB) + w2 double buffer (1 MiB) +
    # w3 buffer (0.5 MiB).  Per row: h2 bf16 scratch (2 KiB) + worst-case live
    # f32 h and h*h at the 1024-wide BN (8 KiB) + h1 bf16 (2 KiB) + x/out (~1 KiB).
    fixed = 3 << 20
    per_row = 14 * 1024
    need = fixed + per_row * batch
    try:
        cap = int(pltpu.get_tpu_info().vmem_capacity_bytes)
    except Exception:
        cap = 64 << 20          # v7x per-TC VMEM — smallest of the generations
    return int(max(16 << 20, min(2 * need, (cap * 3) // 4)))


@functools.partial(jax.jit, static_argnames=("ch_out",))
def mlp_forward(x, kparams, ch_out):
    """kparams: (w1p,g1,be1, w2_tiles,g2,be2, w3,g3,be3, w4_pad,b4_pad)."""
    B, ch_in = x.shape
    in_pad = kparams[0].shape[0]            # padded K of layer 1
    out_pad = kparams[-2].shape[1]          # padded (lane-dense) output width
    xp = jnp.pad(x, ((0, 0), (0, in_pad - ch_in)))   # f32; bf16 cast is in-kernel

    vmem = pl.BlockSpec(memory_space=pltpu.MemorySpace.VMEM)
    hbm = pl.BlockSpec(memory_space=pl.ANY)
    in_specs = [vmem,                      # x
                vmem, vmem, vmem,          # w1, g1, be1
                hbm, vmem, vmem,           # w2 tiles (streamed), g2, be2
                hbm, vmem, vmem,           # w3 (prefetched), g3, be3
                vmem, vmem]                # w4, b4

    out = pl.pallas_call(
        mlp_kernel,
        out_shape=jax.ShapeDtypeStruct((B, out_pad), jnp.float32),
        in_specs=in_specs,
        out_specs=vmem,
        scratch_shapes=[
            pltpu.VMEM((2, HID, TN2), jnp.bfloat16),   # w2 double buffer
            pltpu.VMEM((HID, HID3), jnp.bfloat16),     # w3 prefetch buffer
            pltpu.VMEM((B, HID), jnp.bfloat16),        # h2 (post BN+ReLU)
            pltpu.SemaphoreType.DMA((3,)),             # 2 for w2 slots, 1 for w3
        ],
        compiler_params=pltpu.CompilerParams(
            vmem_limit_bytes=_vmem_limit_bytes(B)),
    )(xp, *kparams)
    return out[:, :ch_out]


def init_params(key, ch_in, ch_out):
    """f32 parameters mirroring PyTorch defaults (U(-1/sqrt(fan_in), +)), module layout."""
    dims = [(ch_in, HID), (HID, HID), (HID, HID3), (HID3, ch_out)]
    params = []
    for i, (cin, cout) in enumerate(dims):
        key, kw, kb = jax.random.split(key, 3)
        bound = 1.0 / jnp.sqrt(jnp.float32(cin))
        w = jax.random.uniform(kw, (cin, cout), jnp.float32, -bound, bound)
        b = jax.random.uniform(kb, (1, cout), jnp.float32, -bound, bound)
        params += [w, b]
        if i < 3:  # BatchNorm1d after the first three Linear layers
            params += [jnp.ones((1, cout), jnp.float32),
                       jnp.zeros((1, cout), jnp.float32)]
    return tuple(params)


def pack_kernel_params(params, ch_in, ch_out):
    """bf16 weights; drop BN-cancelled biases b1..b3; pad ch_in/ch_out to lane
    width; reshape w2 into contiguous (NT2, HID, TN2) column tiles for the
    streaming DMA."""
    (w1, b1, g1, be1, w2, b2, g2, be2, w3, b3, g3, be3, w4, b4) = params
    del b1, b2, b3  # exactly cancelled by the batch-mean subtraction (training BN)
    bf = lambda a: a.astype(jnp.bfloat16)
    in_pad = _round_up(ch_in, LANE)
    out_pad = _round_up(ch_out, LANE)
    w1p = bf(jnp.pad(w1, ((0, in_pad - ch_in), (0, 0))))
    w2t = bf(w2).reshape(HID, NT2, TN2).transpose(1, 0, 2)   # tile j = w2[:, jT:(j+1)T]
    w4p = bf(jnp.pad(w4, ((0, 0), (0, out_pad - ch_out))))
    b4p = jnp.pad(b4, ((0, 0), (0, out_pad - ch_out)))       # f32, post-accum add
    return (w1p, g1, be1, w2t, g2, be2, bf(w3), g3, be3, w4p, b4p)


def mlp_reference_bf16(x, params):
    """Pure-JAX reference on the *same* bf16 weight/activation path (tight check)."""
    (w1, b1, g1, be1, w2, b2, g2, be2, w3, b3, g3, be3, w4, b4) = params
    bf = lambda a: a.astype(jnp.bfloat16)

    def lin(h, w, b):
        return jnp.dot(bf(h), bf(w), preferred_element_type=jnp.float32) + b

    def bn_relu(h, g, be):
        mu = h.mean(0, keepdims=True)
        var = jnp.maximum((h * h).mean(0, keepdims=True) - mu * mu, 0.0)
        return jnp.maximum((h - mu) * jax.lax.rsqrt(var + BN_EPS) * g + be, 0.0)

    h = bn_relu(lin(x, w1, b1), g1, be1)
    h = bn_relu(lin(h, w2, b2), g2, be2)
    h = bn_relu(lin(h, w3, b3), g3, be3)
    return lin(h, w4, b4)


def mlp_reference_f32(x, params):
    """Pure-JAX f32 reference with the original module semantics (loose check)."""
    (w1, b1, g1, be1, w2, b2, g2, be2, w3, b3, g3, be3, w4, b4) = params

    def bn_relu(h, g, be):
        mu = h.mean(0, keepdims=True)
        var = ((h - mu) ** 2).mean(0, keepdims=True)
        return jnp.maximum((h - mu) / jnp.sqrt(var + BN_EPS) * g + be, 0.0)

    h = bn_relu(x @ w1 + b1, g1, be1)
    h = bn_relu(h @ w2 + b2, g2, be2)
    h = bn_relu(h @ w3 + b3, g3, be3)
    return h @ w4 + b4


if __name__ == "__main__":
    key = jax.random.PRNGKey(0)
    k_x, k_p = jax.random.split(key)

    B, CH_IN, CH_OUT = 8, 32, 16
    x = jax.random.normal(k_x, (B, CH_IN), jnp.float32)
    params = init_params(k_p, CH_IN, CH_OUT)
    kparams = pack_kernel_params(params, CH_IN, CH_OUT)

    out = mlp_forward(x, kparams, CH_OUT)
    out = jax.block_until_ready(out)
    assert out.shape == (B, CH_OUT)

    # Tight check: same bf16 numerics path.
    ref_bf16 = mlp_reference_bf16(x, params)
    assert jnp.allclose(out, ref_bf16, atol=1e-2, rtol=1e-2), "mismatch vs bf16 reference"

    # Loose check: original f32 module semantics (bf16 quantization noise only).
    ref_f32 = mlp_reference_f32(x, params)
    assert jnp.allclose(out, ref_f32, atol=1e-1, rtol=1e-1), "mismatch vs f32 reference"

    print("KERNEL_OK")
</pallas_src>

<mosaic_0001>
module attributes {stable_mosaic.version = 11 : i64} {
  func.func @mlp_kernel(%arg0: memref<8x128xf32, #tpu.memory_space<vmem>>, %arg1: memref<128x1024xbf16, #tpu.memory_space<vmem>>, %arg2: memref<1x1024xf32, #tpu.memory_space<vmem>>, %arg3: memref<1x1024xf32, #tpu.memory_space<vmem>>, %arg4: memref<4x1024x256xbf16, #tpu.memory_space<any>>, %arg5: memref<1x1024xf32, #tpu.memory_space<vmem>>, %arg6: memref<1x1024xf32, #tpu.memory_space<vmem>>, %arg7: memref<1024x256xbf16, #tpu.memory_space<any>>, %arg8: memref<1x256xf32, #tpu.memory_space<vmem>>, %arg9: memref<1x256xf32, #tpu.memory_space<vmem>>, %arg10: memref<256x128xbf16, #tpu.memory_space<vmem>>, %arg11: memref<1x128xf32, #tpu.memory_space<vmem>>, %arg12: memref<8x128xf32, #tpu.memory_space<vmem>>, %arg13: memref<2x1024x256xbf16, #tpu.memory_space<vmem>>, %arg14: memref<1024x256xbf16, #tpu.memory_space<vmem>>, %arg15: memref<8x1024xbf16, #tpu.memory_space<vmem>>, %arg16: memref<3x!tpu.dma_semaphore, #tpu.memory_space<semaphore_mem>>) attributes {dimension_semantics = [], scalar_prefetch = 0 : i64, scratch_operands = 4 : i64, tpu.core_type = #tpu.core_type<tc>} {
    %c0_i32 = arith.constant 0 : i32
    %c0_i32_0 = arith.constant 0 : i32
    %c0_i32_1 = arith.constant 0 : i32
    %c0_i32_2 = arith.constant 0 : i32
    %c0_i32_3 = arith.constant 0 : i32
    %0 = tpu.memref_slice %arg4[%c0_i32, %c0_i32_2, %c0_i32_3] : memref<4x1024x256xbf16, #tpu.memory_space<any>> -> memref<1x1024x256xbf16, #tpu.memory_space<any>>
    %1 = tpu.memref_squeeze %0 : memref<1x1024x256xbf16, #tpu.memory_space<any>> -> memref<1024x256xbf16, #tpu.memory_space<any>>
    %c0_i32_4 = arith.constant 0 : i32
    %c0_i32_5 = arith.constant 0 : i32
    %2 = tpu.memref_slice %arg13[%c0_i32_0, %c0_i32_4, %c0_i32_5] : memref<2x1024x256xbf16, #tpu.memory_space<vmem>> -> memref<1x1024x256xbf16, #tpu.memory_space<vmem>>
    %3 = tpu.memref_squeeze %2 : memref<1x1024x256xbf16, #tpu.memory_space<vmem>> -> memref<1024x256xbf16, #tpu.memory_space<vmem>>
    %4 = tpu.memref_slice %arg16[%c0_i32_1] : memref<3x!tpu.dma_semaphore, #tpu.memory_space<semaphore_mem>> -> memref<1x!tpu.dma_semaphore, #tpu.memory_space<semaphore_mem>>
    %5 = tpu.memref_squeeze %4 : memref<1x!tpu.dma_semaphore, #tpu.memory_space<semaphore_mem>> -> memref<!tpu.dma_semaphore, #tpu.memory_space<semaphore_mem>>
    tpu.enqueue_dma source(%1 : memref<1024x256xbf16, #tpu.memory_space<any>>) target(%3 : memref<1024x256xbf16, #tpu.memory_space<vmem>>) target_semaphore(%5 : memref<!tpu.dma_semaphore, #tpu.memory_space<semaphore_mem>>)
    %c2_i32 = arith.constant 2 : i32
    %6 = tpu.memref_slice %arg16[%c2_i32] : memref<3x!tpu.dma_semaphore, #tpu.memory_space<semaphore_mem>> -> memref<1x!tpu.dma_semaphore, #tpu.memory_space<semaphore_mem>>
    %7 = tpu.memref_squeeze %6 : memref<1x!tpu.dma_semaphore, #tpu.memory_space<semaphore_mem>> -> memref<!tpu.dma_semaphore, #tpu.memory_space<semaphore_mem>>
    tpu.enqueue_dma source(%arg7 : memref<1024x256xbf16, #tpu.memory_space<any>>) target(%arg14 : memref<1024x256xbf16, #tpu.memory_space<vmem>>) target_semaphore(%7 : memref<!tpu.dma_semaphore, #tpu.memory_space<semaphore_mem>>)
    %c0 = arith.constant 0 : index
    %c0_6 = arith.constant 0 : index
    %8 = vector.load %arg0[%c0, %c0_6] : memref<8x128xf32, #tpu.memory_space<vmem>>, vector<8x128xf32>
    %9 = arith.truncf %8 : vector<8x128xf32> to vector<8x128xbf16>
    %c0_7 = arith.constant 0 : index
    %c0_8 = arith.constant 0 : index
    %10 = vector.load %arg1[%c0_7, %c0_8] : memref<128x1024xbf16, #tpu.memory_space<vmem>>, vector<128x1024xbf16>
    %cst = arith.constant dense<0.000000e+00> : vector<8x1024xf32>
    %11 = tpu.matmul %9, %10, %cst {dimension_numbers = #tpu.dot_dimension_numbers<[1], [0], [0], [1], [0, 0, 1, 1], [], []>} : vector<8x128xbf16>, vector<128x1024xbf16>, vector<8x1024xf32> -> vector<8x1024xf32>
    %c0_9 = arith.constant 0 : index
    %c0_10 = arith.constant 0 : index
    %12 = vector.load %arg2[%c0_9, %c0_10] : memref<1x1024xf32, #tpu.memory_space<vmem>>, vector<1x1024xf32>
    %c0_11 = arith.constant 0 : index
    %c0_12 = arith.constant 0 : index
    %13 = vector.load %arg3[%c0_11, %c0_12] : memref<1x1024xf32, #tpu.memory_space<vmem>>, vector<1x1024xf32>
    %cst_13 = arith.constant dense<0.000000e+00> : vector<1024xf32>
    %14 = vector.multi_reduction <add>, %11, %cst_13 [0] : vector<8x1024xf32> to vector<1024xf32>
    %15 = vector.shape_cast %14 : vector<1024xf32> to vector<1x1024xf32>
    %cst_14 = arith.constant 8.000000e+00 : f32
    %16 = vector.broadcast %cst_14 : f32 to vector<1x1024xf32>
    %17 = arith.divf %15, %16 : vector<1x1024xf32>
    %18 = arith.mulf %11, %11 : vector<8x1024xf32>
    %cst_15 = arith.constant dense<0.000000e+00> : vector<1024xf32>
    %19 = vector.multi_reduction <add>, %18, %cst_15 [0] : vector<8x1024xf32> to vector<1024xf32>
    %20 = vector.shape_cast %19 : vector<1024xf32> to vector<1x1024xf32>
    %cst_16 = arith.constant 8.000000e+00 : f32
    %21 = vector.broadcast %cst_16 : f32 to vector<1x1024xf32>
    %22 = arith.divf %20, %21 : vector<1x1024xf32>
    %23 = arith.mulf %17, %17 : vector<1x1024xf32>
    %24 = arith.subf %22, %23 : vector<1x1024xf32>
    %cst_17 = arith.constant 0.000000e+00 : f32
    %25 = vector.broadcast %cst_17 : f32 to vector<1x1024xf32>
    %26 = arith.maximumf %24, %25 : vector<1x1024xf32>
    %cst_18 = arith.constant 9.99999974E-6 : f32
    %27 = vector.broadcast %cst_18 : f32 to vector<1x1024xf32>
    %28 = arith.addf %26, %27 : vector<1x1024xf32>
    %29 = math.rsqrt %28 : vector<1x1024xf32>
    %30 = arith.mulf %12, %29 : vector<1x1024xf32>
    %31 = arith.mulf %17, %30 : vector<1x1024xf32>
    %32 = arith.subf %13, %31 : vector<1x1024xf32>
    %33 = vector.broadcast %30 : vector<1x1024xf32> to vector<8x1024xf32>
    %34 = arith.mulf %11, %33 : vector<8x1024xf32>
    %35 = vector.broadcast %32 : vector<1x1024xf32> to vector<8x1024xf32>
    %36 = arith.addf %34, %35 : vector<8x1024xf32>
    %cst_19 = arith.constant 0.000000e+00 : f32
    %37 = vector.broadcast %cst_19 : f32 to vector<8x1024xf32>
    %38 = arith.maximumf %36, %37 : vector<8x1024xf32>
    %39 = arith.truncf %38 : vector<8x1024xf32> to vector<8x1024xbf16>
    %c0_20 = arith.constant 0 : index
    %c0_21 = arith.constant 0 : index
    %40 = vector.load %arg5[%c0_20, %c0_21] : memref<1x1024xf32, #tpu.memory_space<vmem>>, vector<1x1024xf32>
    %c0_22 = arith.constant 0 : index
    %c0_23 = arith.constant 0 : index
    %41 = vector.load %arg6[%c0_22, %c0_23] : memref<1x1024xf32, #tpu.memory_space<vmem>>, vector<1x1024xf32>
    %c0_i32_24 = arith.constant 0 : i32
    %c0_i32_25 = arith.constant 0 : i32
    %c0_i32_26 = arith.constant 0 : i32
    %c0_i32_27 = arith.constant 0 : i32
    %c0_i32_28 = arith.constant 0 : i32
    %42 = tpu.memref_slice %arg4[%c0_i32_24, %c0_i32_27, %c0_i32_28] : memref<4x1024x256xbf16, #tpu.memory_space<any>> -> memref<1x1024x256xbf16, #tpu.memory_space<any>>
    %43 = tpu.memref_squeeze %42 : memref<1x1024x256xbf16, #tpu.memory_space<any>> -> memref<1024x256xbf16, #tpu.memory_space<any>>
    %c0_i32_29 = arith.constant 0 : i32
    %c0_i32_30 = arith.constant 0 : i32
    %44 = tpu.memref_slice %arg13[%c0_i32_25, %c0_i32_29, %c0_i32_30] : memref<2x1024x256xbf16, #tpu.memory_space<vmem>> -> memref<1x1024x256xbf16, #tpu.memory_space<vmem>>
    %45 = tpu.memref_squeeze %44 : memref<1x1024x256xbf16, #tpu.memory_space<vmem>> -> memref<1024x256xbf16, #tpu.memory_space<vmem>>
    %46 = tpu.memref_slice %arg16[%c0_i32_26] : memref<3x!tpu.dma_semaphore, #tpu.memory_space<semaphore_mem>> -> memref<1x!tpu.dma_semaphore, #tpu.memory_space<semaphore_mem>>
    %47 = tpu.memref_squeeze %46 : memref<1x!tpu.dma_semaphore, #tpu.memory_space<semaphore_mem>> -> memref<!tpu.dma_semaphore, #tpu.memory_space<semaphore_mem>>
    tpu.wait_dma2 semaphore(%47 : memref<!tpu.dma_semaphore, #tpu.memory_space<semaphore_mem>>) src(%43 : memref<1024x256xbf16, #tpu.memory_space<any>>) dst(%45 : memref<1024x256xbf16, #tpu.memory_space<vmem>>)
    %c1_i32 = arith.constant 1 : i32
    %c1_i32_31 = arith.constant 1 : i32
    %c1_i32_32 = arith.constant 1 : i32
    %c0_i32_33 = arith.constant 0 : i32
    %c0_i32_34 = arith.constant 0 : i32
    %48 = tpu.memref_slice %arg4[%c1_i32, %c0_i32_33, %c0_i32_34] : memref<4x1024x256xbf16, #tpu.memory_space<any>> -> memref<1x1024x256xbf16, #tpu.memory_space<any>>
    %49 = tpu.memref_squeeze %48 : memref<1x1024x256xbf16, #tpu.memory_space<any>> -> memref<1024x256xbf16, #tpu.memory_space<any>>
    %c0_i32_35 = arith.constant 0 : i32
    %c0_i32_36 = arith.constant 0 : i32
    %50 = tpu.memref_slice %arg13[%c1_i32_31, %c0_i32_35, %c0_i32_36] : memref<2x1024x256xbf16, #tpu.memory_space<vmem>> -> memref<1x1024x256xbf16, #tpu.memory_space<vmem>>
    %51 = tpu.memref_squeeze %50 : memref<1x1024x256xbf16, #tpu.memory_space<vmem>> -> memref<1024x256xbf16, #tpu.memory_space<vmem>>
    %52 = tpu.memref_slice %arg16[%c1_i32_32] : memref<3x!tpu.dma_semaphore, #tpu.memory_space<semaphore_mem>> -> memref<1x!tpu.dma_semaphore, #tpu.memory_space<semaphore_mem>>
    %53 = tpu.memref_squeeze %52 : memref<1x!tpu.dma_semaphore, #tpu.memory_space<semaphore_mem>> -> memref<!tpu.dma_semaphore, #tpu.memory_space<semaphore_mem>>
    tpu.enqueue_dma source(%49 : memref<1024x256xbf16, #tpu.memory_space<any>>) target(%51 : memref<1024x256xbf16, #tpu.memory_space<vmem>>) target_semaphore(%53 : memref<!tpu.dma_semaphore, #tpu.memory_space<semaphore_mem>>)
    %c0_37 = arith.constant 0 : index
    %c0_38 = arith.constant 0 : index
    %c0_39 = arith.constant 0 : index
    %54 = vector.load %arg13[%c0_37, %c0_38, %c0_39] : memref<2x1024x256xbf16, #tpu.memory_space<vmem>>, vector<1x1024x256xbf16>
    %55 = vector.shape_cast %54 : vector<1x1024x256xbf16> to vector<1024x256xbf16>
    %cst_40 = arith.constant dense<0.000000e+00> : vector<8x256xf32>
    %56 = tpu.matmul %39, %55, %cst_40 {dimension_numbers = #tpu.dot_dimension_numbers<[1], [0], [0], [1], [0, 0, 1, 1], [], []>} : vector<8x1024xbf16>, vector<1024x256xbf16>, vector<8x256xf32> -> vector<8x256xf32>
    %57 = vector.extract_strided_slice %40 {offsets = [0, 0], sizes = [1, 256], strides = [1, 1]} : vector<1x1024xf32> to vector<1x256xf32>
    %58 = vector.extract_strided_slice %41 {offsets = [0, 0], sizes = [1, 256], strides = [1, 1]} : vector<1x1024xf32> to vector<1x256xf32>
    %cst_41 = arith.constant dense<0.000000e+00> : vector<256xf32>
    %59 = vector.multi_reduction <add>, %56, %cst_41 [0] : vector<8x256xf32> to vector<256xf32>
    %60 = vector.shape_cast %59 : vector<256xf32> to vector<1x256xf32>
    %cst_42 = arith.constant 8.000000e+00 : f32
    %61 = vector.broadcast %cst_42 : f32 to vector<1x256xf32>
    %62 = arith.divf %60, %61 : vector<1x256xf32>
    %63 = arith.mulf %56, %56 : vector<8x256xf32>
    %cst_43 = arith.constant dense<0.000000e+00> : vector<256xf32>
    %64 = vector.multi_reduction <add>, %63, %cst_43 [0] : vector<8x256xf32> to vector<256xf32>
    %65 = vector.shape_cast %64 : vector<256xf32> to vector<1x256xf32>
    %cst_44 = arith.constant 8.000000e+00 : f32
    %66 = vector.broadcast %cst_44 : f32 to vector<1x256xf32>
    %67 = arith.divf %65, %66 : vector<1x256xf32>
    %68 = arith.mulf %62, %62 : vector<1x256xf32>
    %69 = arith.subf %67, %68 : vector<1x256xf32>
    %cst_45 = arith.constant 0.000000e+00 : f32
    %70 = vector.broadcast %cst_45 : f32 to vector<1x256xf32>
    %71 = arith.maximumf %69, %70 : vector<1x256xf32>
    %cst_46 = arith.constant 9.99999974E-6 : f32
    %72 = vector.broadcast %cst_46 : f32 to vector<1x256xf32>
    %73 = arith.addf %71, %72 : vector<1x256xf32>
    %74 = math.rsqrt %73 : vector<1x256xf32>
    %75 = arith.mulf %57, %74 : vector<1x256xf32>
    %76 = arith.mulf %62, %75 : vector<1x256xf32>
    %77 = arith.subf %58, %76 : vector<1x256xf32>
    %78 = vector.broadcast %75 : vector<1x256xf32> to vector<8x256xf32>
    %79 = arith.mulf %56, %78 : vector<8x256xf32>
    %80 = vector.broadcast %77 : vector<1x256xf32> to vector<8x256xf32>
    %81 = arith.addf %79, %80 : vector<8x256xf32>
    %cst_47 = arith.constant 0.000000e+00 : f32
    %82 = vector.broadcast %cst_47 : f32 to vector<8x256xf32>
    %83 = arith.maximumf %81, %82 : vector<8x256xf32>
    %84 = arith.truncf %83 : vector<8x256xf32> to vector<8x256xbf16>
    %c0_48 = arith.constant 0 : index
    %c0_49 = arith.constant 0 : index
    %85 = vector.load %arg15[%c0_48, %c0_49] : memref<8x1024xbf16, #tpu.memory_space<vmem>>, vector<8x256xbf16>
    tpu.vector_store %arg15[%c0_48, %c0_49], %84 {strides = array<i32>} : memref<8x1024xbf16, #tpu.memory_space<vmem>>, vector<8x256xbf16>,
    %c1_i32_50 = arith.constant 1 : i32
    %c1_i32_51 = arith.constant 1 : i32
    %c1_i32_52 = arith.constant 1 : i32
    %c0_i32_53 = arith.constant 0 : i32
    %c0_i32_54 = arith.constant 0 : i32
    %86 = tpu.memref_slice %arg4[%c1_i32_50, %c0_i32_53, %c0_i32_54] : memref<4x1024x256xbf16, #tpu.memory_space<any>> -> memref<1x1024x256xbf16, #tpu.memory_space<any>>
    %87 = tpu.memref_squeeze %86 : memref<1x1024x256xbf16, #tpu.memory_space<any>> -> memref<1024x256xbf16, #tpu.memory_space<any>>
    %c0_i32_55 = arith.constant 0 : i32
    %c0_i32_56 = arith.constant 0 : i32
    %88 = tpu.memref_slice %arg13[%c1_i32_51, %c0_i32_55, %c0_i32_56] : memref<2x1024x256xbf16, #tpu.memory_space<vmem>> -> memref<1x1024x256xbf16, #tpu.memory_space<vmem>>
    %89 = tpu.memref_squeeze %88 : memref<1x1024x256xbf16, #tpu.memory_space<vmem>> -> memref<1024x256xbf16, #tpu.memory_space<vmem>>
    %90 = tpu.memref_slice %arg16[%c1_i32_52] : memref<3x!tpu.dma_semaphore, #tpu.memory_space<semaphore_mem>> -> memref<1x!tpu.dma_semaphore, #tpu.memory_space<semaphore_mem>>
    %91 = tpu.memref_squeeze %90 : memref<1x!tpu.dma_semaphore, #tpu.memory_space<semaphore_mem>> -> memref<!tpu.dma_semaphore, #tpu.memory_space<semaphore_mem>>
    tpu.wait_dma2 semaphore(%91 : memref<!tpu.dma_semaphore, #tpu.memory_space<semaphore_mem>>) src(%87 : memref<1024x256xbf16, #tpu.memory_space<any>>) dst(%89 : memref<1024x256xbf16, #tpu.memory_space<vmem>>)
    %c2_i32_57 = arith.constant 2 : i32
    %c0_i32_58 = arith.constant 0 : i32
    %c0_i32_59 = arith.constant 0 : i32
    %c0_i32_60 = arith.constant 0 : i32
    %c0_i32_61 = arith.constant 0 : i32
    %92 = tpu.memref_slice %arg4[%c2_i32_57, %c0_i32_60, %c0_i32_61] : memref<4x1024x256xbf16, #tpu.memory_space<any>> -> memref<1x1024x256xbf16, #tpu.memory_space<any>>
    %93 = tpu.memref_squeeze %92 : memref<1x1024x256xbf16, #tpu.memory_space<any>> -> memref<1024x256xbf16, #tpu.memory_space<any>>
    %c0_i32_62 = arith.constant 0 : i32
    %c0_i32_63 = arith.constant 0 : i32
    %94 = tpu.memref_slice %arg13[%c0_i32_58, %c0_i32_62, %c0_i32_63] : memref<2x1024x256xbf16, #tpu.memory_space<vmem>> -> memref<1x1024x256xbf16, #tpu.memory_space<vmem>>
    %95 = tpu.memref_squeeze %94 : memref<1x1024x256xbf16, #tpu.memory_space<vmem>> -> memref<1024x256xbf16, #tpu.memory_space<vmem>>
    %96 = tpu.memref_slice %arg16[%c0_i32_59] : memref<3x!tpu.dma_semaphore, #tpu.memory_space<semaphore_mem>> -> memref<1x!tpu.dma_semaphore, #tpu.memory_space<semaphore_mem>>
    %97 = tpu.memref_squeeze %96 : memref<1x!tpu.dma_semaphore, #tpu.memory_space<semaphore_mem>> -> memref<!tpu.dma_semaphore, #tpu.memory_space<semaphore_mem>>
    tpu.enqueue_dma source(%93 : memref<1024x256xbf16, #tpu.memory_space<any>>) target(%95 : memref<1024x256xbf16, #tpu.memory_space<vmem>>) target_semaphore(%97 : memref<!tpu.dma_semaphore, #tpu.memory_space<semaphore_mem>>)
    %c1 = arith.constant 1 : index
    %c0_64 = arith.constant 0 : index
    %c0_65 = arith.constant 0 : index
    %98 = vector.load %arg13[%c1, %c0_64, %c0_65] : memref<2x1024x256xbf16, #tpu.memory_space<vmem>>, vector<1x1024x256xbf16>
    %99 = vector.shape_cast %98 : vector<1x1024x256xbf16> to vector<1024x256xbf16>
    %cst_66 = arith.constant dense<0.000000e+00> : vector<8x256xf32>
    %100 = tpu.matmul %39, %99, %cst_66 {dimension_numbers = #tpu.dot_dimension_numbers<[1], [0], [0], [1], [0, 0, 1, 1], [], []>} : vector<8x1024xbf16>, vector<1024x256xbf16>, vector<8x256xf32> -> vector<8x256xf32>
    %101 = vector.extract_strided_slice %40 {offsets = [0, 256], sizes = [1, 256], strides = [1, 1]} : vector<1x1024xf32> to vector<1x256xf32>
    %102 = vector.extract_strided_slice %41 {offsets = [0, 256], sizes = [1, 256], strides = [1, 1]} : vector<1x1024xf32> to vector<1x256xf32>
    %cst_67 = arith.constant dense<0.000000e+00> : vector<256xf32>
    %103 = vector.multi_reduction <add>, %100, %cst_67 [0] : vector<8x256xf32> to vector<256xf32>
    %104 = vector.shape_cast %103 : vector<256xf32> to vector<1x256xf32>
    %cst_68 = arith.constant 8.000000e+00 : f32
    %105 = vector.broadcast %cst_68 : f32 to vector<1x256xf32>
    %106 = arith.divf %104, %105 : vector<1x256xf32>
    %107 = arith.mulf %100, %100 : vector<8x256xf32>
    %cst_69 = arith.constant dense<0.000000e+00> : vector<256xf32>
    %108 = vector.multi_reduction <add>, %107, %cst_69 [0] : vector<8x256xf32> to vector<256xf32>
    %109 = vector.shape_cast %108 : vector<256xf32> to vector<1x256xf32>
    %cst_70 = arith.constant 8.000000e+00 : f32
    %110 = vector.broadcast %cst_70 : f32 to vector<1x256xf32>
    %111 = arith.divf %109, %110 : vector<1x256xf32>
    %112 = arith.mulf %106, %106 : vector<1x256xf32>
    %113 = arith.subf %111, %112 : vector<1x256xf32>
    %cst_71 = arith.constant 0.000000e+00 : f32
    %114 = vector.broadcast %cst_71 : f32 to vector<1x256xf32>
    %115 = arith.maximumf %113, %114 : vector<1x256xf32>
    %cst_72 = arith.constant 9.99999974E-6 : f32
    %116 = vector.broadcast %cst_72 : f32 to vector<1x256xf32>
    %117 = arith.addf %115, %116 : vector<1x256xf32>
    %118 = math.rsqrt %117 : vector<1x256xf32>
    %119 = arith.mulf %101, %118 : vector<1x256xf32>
    %120 = arith.mulf %106, %119 : vector<1x256xf32>
    %121 = arith.subf %102, %120 : vector<1x256xf32>
    %122 = vector.broadcast %119 : vector<1x256xf32> to vector<8x256xf32>
    %123 = arith.mulf %100, %122 : vector<8x256xf32>
    %124 = vector.broadcast %121 : vector<1x256xf32> to vector<8x256xf32>
    %125 = arith.addf %123, %124 : vector<8x256xf32>
    %cst_73 = arith.constant 0.000000e+00 : f32
    %126 = vector.broadcast %cst_73 : f32 to vector<8x256xf32>
    %127 = arith.maximumf %125, %126 : vector<8x256xf32>
    %128 = arith.truncf %127 : vector<8x256xf32> to vector<8x256xbf16>
    %c0_74 = arith.constant 0 : index
    %c256 = arith.constant 256 : index
    %129 = vector.load %arg15[%c0_74, %c256] : memref<8x1024xbf16, #tpu.memory_space<vmem>>, vector<8x256xbf16>
    tpu.vector_store %arg15[%c0_74, %c256], %128 {strides = array<i32>} : memref<8x1024xbf16, #tpu.memory_space<vmem>>, vector<8x256xbf16>,
    %c2_i32_75 = arith.constant 2 : i32
    %c0_i32_76 = arith.constant 0 : i32
    %c0_i32_77 = arith.constant 0 : i32
    %c0_i32_78 = arith.constant 0 : i32
    %c0_i32_79 = arith.constant 0 : i32
    %130 = tpu.memref_slice %arg4[%c2_i32_75, %c0_i32_78, %c0_i32_79] : memref<4x1024x256xbf16, #tpu.memory_space<any>> -> memref<1x1024x256xbf16, #tpu.memory_space<any>>
    %131 = tpu.memref_squeeze %130 : memref<1x1024x256xbf16, #tpu.memory_space<any>> -> memref<1024x256xbf16, #tpu.memory_space<any>>
    %c0_i32_80 = arith.constant 0 : i32
    %c0_i32_81 = arith.constant 0 : i32
    %132 = tpu.memref_slice %arg13[%c0_i32_76, %c0_i32_80, %c0_i32_81] : memref<2x1024x256xbf16, #tpu.memory_space<vmem>> -> memref<1x1024x256xbf16, #tpu.memory_space<vmem>>
    %133 = tpu.memref_squeeze %132 : memref<1x1024x256xbf16, #tpu.memory_space<vmem>> -> memref<1024x256xbf16, #tpu.memory_space<vmem>>
    %134 = tpu.memref_slice %arg16[%c0_i32_77] : memref<3x!tpu.dma_semaphore, #tpu.memory_space<semaphore_mem>> -> memref<1x!tpu.dma_semaphore, #tpu.memory_space<semaphore_mem>>
    %135 = tpu.memref_squeeze %134 : memref<1x!tpu.dma_semaphore, #tpu.memory_space<semaphore_mem>> -> memref<!tpu.dma_semaphore, #tpu.memory_space<semaphore_mem>>
    tpu.wait_dma2 semaphore(%135 : memref<!tpu.dma_semaphore, #tpu.memory_space<semaphore_mem>>) src(%131 : memref<1024x256xbf16, #tpu.memory_space<any>>) dst(%133 : memref<1024x256xbf16, #tpu.memory_space<vmem>>)
    %c3_i32 = arith.constant 3 : i32
    %c1_i32_82 = arith.constant 1 : i32
    %c1_i32_83 = arith.constant 1 : i32
    %c0_i32_84 = arith.constant 0 : i32
    %c0_i32_85 = arith.constant 0 : i32
    %136 = tpu.memref_slice %arg4[%c3_i32, %c0_i32_84, %c0_i32_85] : memref<4x1024x256xbf16, #tpu.memory_space<any>> -> memref<1x1024x256xbf16, #tpu.memory_space<any>>
    %137 = tpu.memref_squeeze %136 : memref<1x1024x256xbf16, #tpu.memory_space<any>> -> memref<1024x256xbf16, #tpu.memory_space<any>>
    %c0_i32_86 = arith.constant 0 : i32
    %c0_i32_87 = arith.constant 0 : i32
    %138 = tpu.memref_slice %arg13[%c1_i32_82, %c0_i32_86, %c0_i32_87] : memref<2x1024x256xbf16, #tpu.memory_space<vmem>> -> memref<1x1024x256xbf16, #tpu.memory_space<vmem>>
    %139 = tpu.memref_squeeze %138 : memref<1x1024x256xbf16, #tpu.memory_space<vmem>> -> memref<1024x256xbf16, #tpu.memory_space<vmem>>
    %140 = tpu.memref_slice %arg16[%c1_i32_83] : memref<3x!tpu.dma_semaphore, #tpu.memory_space<semaphore_mem>> -> memref<1x!tpu.dma_semaphore, #tpu.memory_space<semaphore_mem>>
    %141 = tpu.memref_squeeze %140 : memref<1x!tpu.dma_semaphore, #tpu.memory_space<semaphore_mem>> -> memref<!tpu.dma_semaphore, #tpu.memory_space<semaphore_mem>>
    tpu.enqueue_dma source(%137 : memref<1024x256xbf16, #tpu.memory_space<any>>) target(%139 : memref<1024x256xbf16, #tpu.memory_space<vmem>>) target_semaphore(%141 : memref<!tpu.dma_semaphore, #tpu.memory_space<semaphore_mem>>)
    %c0_88 = arith.constant 0 : index
    %c0_89 = arith.constant 0 : index
    %c0_90 = arith.constant 0 : index
    %142 = vector.load %arg13[%c0_88, %c0_89, %c0_90] : memref<2x1024x256xbf16, #tpu.memory_space<vmem>>, vector<1x1024x256xbf16>
    %143 = vector.shape_cast %142 : vector<1x1024x256xbf16> to vector<1024x256xbf16>
    %cst_91 = arith.constant dense<0.000000e+00> : vector<8x256xf32>
    %144 = tpu.matmul %39, %143, %cst_91 {dimension_numbers = #tpu.dot_dimension_numbers<[1], [0], [0], [1], [0, 0, 1, 1], [], []>} : vector<8x1024xbf16>, vector<1024x256xbf16>, vector<8x256xf32> -> vector<8x256xf32>
    %145 = vector.extract_strided_slice %40 {offsets = [0, 512], sizes = [1, 256], strides = [1, 1]} : vector<1x1024xf32> to vector<1x256xf32>
    %146 = vector.extract_strided_slice %41 {offsets = [0, 512], sizes = [1, 256], strides = [1, 1]} : vector<1x1024xf32> to vector<1x256xf32>
    %cst_92 = arith.constant dense<0.000000e+00> : vector<256xf32>
    %147 = vector.multi_reduction <add>, %144, %cst_92 [0] : vector<8x256xf32> to vector<256xf32>
    %148 = vector.shape_cast %147 : vector<256xf32> to vector<1x256xf32>
    %cst_93 = arith.constant 8.000000e+00 : f32
    %149 = vector.broadcast %cst_93 : f32 to vector<1x256xf32>
    %150 = arith.divf %148, %149 : vector<1x256xf32>
    %151 = arith.mulf %144, %144 : vector<8x256xf32>
    %cst_94 = arith.constant dense<0.000000e+00> : vector<256xf32>
    %152 = vector.multi_reduction <add>, %151, %cst_94 [0] : vector<8x256xf32> to vector<256xf32>
    %153 = vector.shape_cast %152 : vector<256xf32> to vector<1x256xf32>
    %cst_95 = arith.constant 8.000000e+00 : f32
    %154 = vector.broadcast %cst_95 : f32 to vector<1x256xf32>
    %155 = arith.divf %153, %154 : vector<1x256xf32>
    %156 = arith.mulf %150, %150 : vector<1x256xf32>
    %157 = arith.subf %155, %156 : vector<1x256xf32>
    %cst_96 = arith.constant 0.000000e+00 : f32
    %158 = vector.broadcast %cst_96 : f32 to vector<1x256xf32>
    %159 = arith.maximumf %157, %158 : vector<1x256xf32>
    %cst_97 = arith.constant 9.99999974E-6 : f32
    %160 = vector.broadcast %cst_97 : f32 to vector<1x256xf32>
    %161 = arith.addf %159, %160 : vector<1x256xf32>
    %162 = math.rsqrt %161 : vector<1x256xf32>
    %163 = arith.mulf %145, %162 : vector<1x256xf32>
    %164 = arith.mulf %150, %163 : vector<1x256xf32>
    %165 = arith.subf %146, %164 : vector<1x256xf32>
    %166 = vector.broadcast %163 : vector<1x256xf32> to vector<8x256xf32>
    %167 = arith.mulf %144, %166 : vector<8x256xf32>
    %168 = vector.broadcast %165 : vector<1x256xf32> to vector<8x256xf32>
    %169 = arith.addf %167, %168 : vector<8x256xf32>
    %cst_98 = arith.constant 0.000000e+00 : f32
    %170 = vector.broadcast %cst_98 : f32 to vector<8x256xf32>
    %171 = arith.maximumf %169, %170 : vector<8x256xf32>
    %172 = arith.truncf %171 : vector<8x256xf32> to vector<8x256xbf16>
    %c0_99 = arith.constant 0 : index
    %c512 = arith.constant 512 : index
    %173 = vector.load %arg15[%c0_99, %c512] : memref<8x1024xbf16, #tpu.memory_space<vmem>>, vector<8x256xbf16>
    tpu.vector_store %arg15[%c0_99, %c512], %172 {strides = array<i32>} : memref<8x1024xbf16, #tpu.memory_space<vmem>>, vector<8x256xbf16>,
    %c3_i32_100 = arith.constant 3 : i32
    %c1_i32_101 = arith.constant 1 : i32
    %c1_i32_102 = arith.constant 1 : i32
    %c0_i32_103 = arith.constant 0 : i32
    %c0_i32_104 = arith.constant 0 : i32
    %174 = tpu.memref_slice %arg4[%c3_i32_100, %c0_i32_103, %c0_i32_104] : memref<4x1024x256xbf16, #tpu.memory_space<any>> -> memref<1x1024x256xbf16, #tpu.memory_space<any>>
    %175 = tpu.memref_squeeze %174 : memref<1x1024x256xbf16, #tpu.memory_space<any>> -> memref<1024x256xbf16, #tpu.memory_space<any>>
    %c0_i32_105 = arith.constant 0 : i32
    %c0_i32_106 = arith.constant 0 : i32
    %176 = tpu.memref_slice %arg13[%c1_i32_101, %c0_i32_105, %c0_i32_106] : memref<2x1024x256xbf16, #tpu.memory_space<vmem>> -> memref<1x1024x256xbf16, #tpu.memory_space<vmem>>
    %177 = tpu.memref_squeeze %176 : memref<1x1024x256xbf16, #tpu.memory_space<vmem>> -> memref<1024x256xbf16, #tpu.memory_space<vmem>>
    %178 = tpu.memref_slice %arg16[%c1_i32_102] : memref<3x!tpu.dma_semaphore, #tpu.memory_space<semaphore_mem>> -> memref<1x!tpu.dma_semaphore, #tpu.memory_space<semaphore_mem>>
    %179 = tpu.memref_squeeze %178 : memref<1x!tpu.dma_semaphore, #tpu.memory_space<semaphore_mem>> -> memref<!tpu.dma_semaphore, #tpu.memory_space<semaphore_mem>>
    tpu.wait_dma2 semaphore(%179 : memref<!tpu.dma_semaphore, #tpu.memory_space<semaphore_mem>>) src(%175 : memref<1024x256xbf16, #tpu.memory_space<any>>) dst(%177 : memref<1024x256xbf16, #tpu.memory_space<vmem>>)
    %c1_107 = arith.constant 1 : index
    %c0_108 = arith.constant 0 : index
    %c0_109 = arith.constant 0 : index
    %180 = vector.load %arg13[%c1_107, %c0_108, %c0_109] : memref<2x1024x256xbf16, #tpu.memory_space<vmem>>, vector<1x1024x256xbf16>
    %181 = vector.shape_cast %180 : vector<1x1024x256xbf16> to vector<1024x256xbf16>
    %cst_110 = arith.constant dense<0.000000e+00> : vector<8x256xf32>
    %182 = tpu.matmul %39, %181, %cst_110 {dimension_numbers = #tpu.dot_dimension_numbers<[1], [0], [0], [1], [0, 0, 1, 1], [], []>} : vector<8x1024xbf16>, vector<1024x256xbf16>, vector<8x256xf32> -> vector<8x256xf32>
    %183 = vector.extract_strided_slice %40 {offsets = [0, 768], sizes = [1, 256], strides = [1, 1]} : vector<1x1024xf32> to vector<1x256xf32>
    %184 = vector.extract_strided_slice %41 {offsets = [0, 768], sizes = [1, 256], strides = [1, 1]} : vector<1x1024xf32> to vector<1x256xf32>
    %cst_111 = arith.constant dense<0.000000e+00> : vector<256xf32>
    %185 = vector.multi_reduction <add>, %182, %cst_111 [0] : vector<8x256xf32> to vector<256xf32>
    %186 = vector.shape_cast %185 : vector<256xf32> to vector<1x256xf32>
    %cst_112 = arith.constant 8.000000e+00 : f32
    %187 = vector.broadcast %cst_112 : f32 to vector<1x256xf32>
    %188 = arith.divf %186, %187 : vector<1x256xf32>
    %189 = arith.mulf %182, %182 : vector<8x256xf32>
    %cst_113 = arith.constant dense<0.000000e+00> : vector<256xf32>
    %190 = vector.multi_reduction <add>, %189, %cst_113 [0] : vector<8x256xf32> to vector<256xf32>
    %191 = vector.shape_cast %190 : vector<256xf32> to vector<1x256xf32>
    %cst_114 = arith.constant 8.000000e+00 : f32
    %192 = vector.broadcast %cst_114 : f32 to vector<1x256xf32>
    %193 = arith.divf %191, %192 : vector<1x256xf32>
    %194 = arith.mulf %188, %188 : vector<1x256xf32>
    %195 = arith.subf %193, %194 : vector<1x256xf32>
    %cst_115 = arith.constant 0.000000e+00 : f32
    %196 = vector.broadcast %cst_115 : f32 to vector<1x256xf32>
    %197 = arith.maximumf %195, %196 : vector<1x256xf32>
    %cst_116 = arith.constant 9.99999974E-6 : f32
    %198 = vector.broadcast %cst_116 : f32 to vector<1x256xf32>
    %199 = arith.addf %197, %198 : vector<1x256xf32>
    %200 = math.rsqrt %199 : vector<1x256xf32>
    %201 = arith.mulf %183, %200 : vector<1x256xf32>
    %202 = arith.mulf %188, %201 : vector<1x256xf32>
    %203 = arith.subf %184, %202 : vector<1x256xf32>
    %204 = vector.broadcast %201 : vector<1x256xf32> to vector<8x256xf32>
    %205 = arith.mulf %182, %204 : vector<8x256xf32>
    %206 = vector.broadcast %203 : vector<1x256xf32> to vector<8x256xf32>
    %207 = arith.addf %205, %206 : vector<8x256xf32>
    %cst_117 = arith.constant 0.000000e+00 : f32
    %208 = vector.broadcast %cst_117 : f32 to vector<8x256xf32>
    %209 = arith.maximumf %207, %208 : vector<8x256xf32>
    %210 = arith.truncf %209 : vector<8x256xf32> to vector<8x256xbf16>
    %c0_118 = arith.constant 0 : index
    %c768 = arith.constant 768 : index
    %211 = vector.load %arg15[%c0_118, %c768] : memref<8x1024xbf16, #tpu.memory_space<vmem>>, vector<8x256xbf16>
    tpu.vector_store %arg15[%c0_118, %c768], %210 {strides = array<i32>} : memref<8x1024xbf16, #tpu.memory_space<vmem>>, vector<8x256xbf16>,
    %c2_i32_119 = arith.constant 2 : i32
    %212 = tpu.memref_slice %arg16[%c2_i32_119] : memref<3x!tpu.dma_semaphore, #tpu.memory_space<semaphore_mem>> -> memref<1x!tpu.dma_semaphore, #tpu.memory_space<semaphore_mem>>
    %213 = tpu.memref_squeeze %212 : memref<1x!tpu.dma_semaphore, #tpu.memory_space<semaphore_mem>> -> memref<!tpu.dma_semaphore, #tpu.memory_space<semaphore_mem>>
    tpu.wait_dma2 semaphore(%213 : memref<!tpu.dma_semaphore, #tpu.memory_space<semaphore_mem>>) src(%arg7 : memref<1024x256xbf16, #tpu.memory_space<any>>) dst(%arg14 : memref<1024x256xbf16, #tpu.memory_space<vmem>>)
    %c0_120 = arith.constant 0 : index
    %c0_121 = arith.constant 0 : index
    %214 = vector.load %arg15[%c0_120, %c0_121] : memref<8x1024xbf16, #tpu.memory_space<vmem>>, vector<8x1024xbf16>
    %c0_122 = arith.constant 0 : index
    %c0_123 = arith.constant 0 : index
    %215 = vector.load %arg14[%c0_122, %c0_123] : memref<1024x256xbf16, #tpu.memory_space<vmem>>, vector<1024x256xbf16>
    %cst_124 = arith.constant dense<0.000000e+00> : vector<8x256xf32>
    %216 = tpu.matmul %214, %215, %cst_124 {dimension_numbers = #tpu.dot_dimension_numbers<[1], [0], [0], [1], [0, 0, 1, 1], [], []>} : vector<8x1024xbf16>, vector<1024x256xbf16>, vector<8x256xf32> -> vector<8x256xf32>
    %c0_125 = arith.constant 0 : index
    %c0_126 = arith.constant 0 : index
    %217 = vector.load %arg8[%c0_125, %c0_126] : memref<1x256xf32, #tpu.memory_space<vmem>>, vector<1x256xf32>
    %c0_127 = arith.constant 0 : index
    %c0_128 = arith.constant 0 : index
    %218 = vector.load %arg9[%c0_127, %c0_128] : memref<1x256xf32, #tpu.memory_space<vmem>>, vector<1x256xf32>
    %cst_129 = arith.constant dense<0.000000e+00> : vector<256xf32>
    %219 = vector.multi_reduction <add>, %216, %cst_129 [0] : vector<8x256xf32> to vector<256xf32>
    %220 = vector.shape_cast %219 : vector<256xf32> to vector<1x256xf32>
    %cst_130 = arith.constant 8.000000e+00 : f32
    %221 = vector.broadcast %cst_130 : f32 to vector<1x256xf32>
    %222 = arith.divf %220, %221 : vector<1x256xf32>
    %223 = arith.mulf %216, %216 : vector<8x256xf32>
    %cst_131 = arith.constant dense<0.000000e+00> : vector<256xf32>
    %224 = vector.multi_reduction <add>, %223, %cst_131 [0] : vector<8x256xf32> to vector<256xf32>
    %225 = vector.shape_cast %224 : vector<256xf32> to vector<1x256xf32>
    %cst_132 = arith.constant 8.000000e+00 : f32
    %226 = vector.broadcast %cst_132 : f32 to vector<1x256xf32>
    %227 = arith.divf %225, %226 : vector<1x256xf32>
    %228 = arith.mulf %222, %222 : vector<1x256xf32>
    %229 = arith.subf %227, %228 : vector<1x256xf32>
    %cst_133 = arith.constant 0.000000e+00 : f32
    %230 = vector.broadcast %cst_133 : f32 to vector<1x256xf32>
    %231 = arith.maximumf %229, %230 : vector<1x256xf32>
    %cst_134 = arith.constant 9.99999974E-6 : f32
    %232 = vector.broadcast %cst_134 : f32 to vector<1x256xf32>
    %233 = arith.addf %231, %232 : vector<1x256xf32>
    %234 = math.rsqrt %233 : vector<1x256xf32>
    %235 = arith.mulf %217, %234 : vector<1x256xf32>
    %236 = arith.mulf %222, %235 : vector<1x256xf32>
    %237 = arith.subf %218, %236 : vector<1x256xf32>
    %238 = vector.broadcast %235 : vector<1x256xf32> to vector<8x256xf32>
    %239 = arith.mulf %216, %238 : vector<8x256xf32>
    %240 = vector.broadcast %237 : vector<1x256xf32> to vector<8x256xf32>
    %241 = arith.addf %239, %240 : vector<8x256xf32>
    %cst_135 = arith.constant 0.000000e+00 : f32
    %242 = vector.broadcast %cst_135 : f32 to vector<8x256xf32>
    %243 = arith.maximumf %241, %242 : vector<8x256xf32>
    %244 = arith.truncf %243 : vector<8x256xf32> to vector<8x256xbf16>
    %c0_136 = arith.constant 0 : index
    %c0_137 = arith.constant 0 : index
    %245 = vector.load %arg10[%c0_136, %c0_137] : memref<256x128xbf16, #tpu.memory_space<vmem>>, vector<256x128xbf16>
    %cst_138 = arith.constant dense<0.000000e+00> : vector<8x128xf32>
    %246 = tpu.matmul %244, %245, %cst_138 {dimension_numbers = #tpu.dot_dimension_numbers<[1], [0], [0], [1], [0, 0, 1, 1], [], []>} : vector<8x256xbf16>, vector<256x128xbf16>, vector<8x128xf32> -> vector<8x128xf32>
    %c0_139 = arith.constant 0 : index
    %c0_140 = arith.constant 0 : index
    %247 = vector.load %arg11[%c0_139, %c0_140] : memref<1x128xf32, #tpu.memory_space<vmem>>, vector<1x128xf32>
    %248 = vector.broadcast %247 : vector<1x128xf32> to vector<8x128xf32>
    %249 = arith.addf %246, %248 : vector<8x128xf32>
    %c0_141 = arith.constant 0 : index
    %c0_142 = arith.constant 0 : index
    %250 = vector.load %arg12[%c0_141, %c0_142] : memref<8x128xf32, #tpu.memory_space<vmem>>, vector<8x128xf32>
    tpu.vector_store %arg12[%c0_141, %c0_142], %249 {strides = array<i32>} : memref<8x128xf32, #tpu.memory_space<vmem>>, vector<8x128xf32>,
    return
  }
}

</mosaic_0001>

<bundles_post_ra>
// kernel: mlp_forward.1
= control target key start
LH: loop header
LB: loop body
LE: loop exit
PB: predicated region body
PF: predicated region fallthrough
CT: control target
= control target key end

     0   :  { %17 = vsyncpa [#allocation7], 0  ;;  %s4719_s0 = inlined_call_operand.vmem [shape: f32[8,128], index: 0, kind: input, shape index: {}]   ;;  %s4720_s1 = inlined_call_operand.hbm [shape: bf16[128,1024], index: 1, kind: input, shape index: {}]   ;;  %s4721_s2 = inlined_call_operand.hbm [shape: f32[1,1024], index: 2, kind: input, shape index: {}]   ;;  %s4722_s3 = inlined_call_operand.hbm [shape: f32[1,1024], index: 3, kind: input, shape index: {}]   ;;  %s4723_s4 = inlined_call_operand.hbm [shape: bf16[4,1024,256], index: 4, kind: input, shape index: {}]   ;;  %s4724_s5 = inlined_call_operand.hbm [shape: f32[1,1024], index: 5, kind: input, shape index: {}]   ;;  %s4725_s6 = inlined_call_operand.hbm [shape: f32[1,1024], index: 6, kind: input, shape index: {}]   ;;  %s4726_s7 = inlined_call_operand.hbm [shape: bf16[1024,256], index: 7, kind: input, shape index: {}]   ;;  %s4727_s8 = inlined_call_operand.hbm [shape: f32[1,256], index: 8, kind: input, shape index: {}]   ;;  %s4728_s9 = inlined_call_operand.hbm [shape: f32[1,256], index: 9, kind: input, shape index: {}]   ;;  %s4729_s10 = inlined_call_operand.hbm [shape: bf16[256,128], index: 10, kind: input, shape index: {}]   ;;  %s4730_s11 = inlined_call_operand.hbm [shape: f32[1,128], index: 11, kind: input, shape index: {}]   ;;  %s4731_s12 = inlined_call_operand.hbm [shape: f32[8,128], index: 12, kind: output, shape index: {}]  }
   0x1   :  { %18 = vsyncpa [#allocation10], 0 }
   0x2   :  { %19 = vsyncpa [#allocation13], 0 }
   0x3   :  { %20 = vsyncpa [#allocation16], 0 }
   0x4   :  { %21 = vsyncpa [#allocation19], 0 }
   0x5   :  { %22 = vsyncpa [#allocation8], 0  ;;  %s4114_s21 = smov [#allocation9]   ;;  %s4115_s23 = smov [#allocation12]  }
   0x6   :  { %s43_s22 = sshll.u32 %s4114_s21, 4  ;;  %s63_s24 = sshll.u32 %s4115_s23, 4  ;;  %s44_s22 = int_to_ptr.vmem [resolvable:$true] %s43_s22  ;;  %s64_s24 = int_to_ptr.vmem [resolvable:$true] %s63_s24 }
   0x7   :  { %s3872_s27 = scalar_lea.hbm %s4721_s2, 128 }
   0x8   :  { %p3873_p0 = scmp.ne.s32.totalorder %s4721_s2, %s3872_s27  ;;  %p3876_p1 = scmp.lt.u32.totalorder %s3872_s27, %s4721_s2 }
   0xa   :  { %p3878_p2 = pnand %p3876_p1, %p3873_p0 }
   0xc   :  { %3881 = shalt.err (!%p3878_p2)
}
   0xd   :  { %s3882_s14 = scalar_lea.vmem %s44_s22, 128  ;;  %p3887_p4 = scmp.lt.s32.totalorder %s44_s22, %s44_s22 }
   0xe   :  { %p3883_p3 = scmp.ne.s32.totalorder %s44_s22, %s3882_s14  ;;  %p3888_p5 = scmp.lt.s32.totalorder %s3882_s14, %s3882_s14 }
  0x10   :  { %p3889_p6 = por %p3888_p5, %p3887_p4 }
  0x12   :  { %p3890_p7 = pnand %p3889_p6, %p3883_p3 }
  0x14   :  { %3893 = shalt.err (!%p3890_p7)
}
  0x15   :  { %46 = dma.hbm_to_vmem [thread:$0]  %s4721_s2, 128, %s44_s22, [#allocation10]  }
  0x16   :  { %s3894_s19 = scalar_lea.hbm %s4724_s5, 128 }
  0x17   :  { %p3895_p8 = scmp.ne.s32.totalorder %s4724_s5, %s3894_s19  ;;  %p3898_p9 = scmp.lt.u32.totalorder %s3894_s19, %s4724_s5 }
  0x19   :  { %p3900_p10 = pnand %p3898_p9, %p3895_p8 }
  0x1b   :  { %3903 = shalt.err (!%p3900_p10)
}
  0x1c   :  { %s3904_s26 = scalar_lea.vmem %s64_s24, 128  ;;  %p3909_p12 = scmp.lt.s32.totalorder %s64_s24, %s64_s24 }
  0x1d   :  { %p3905_p11 = scmp.ne.s32.totalorder %s64_s24, %s3904_s26  ;;  %p3910_p13 = scmp.lt.s32.totalorder %s3904_s26, %s3904_s26 }
  0x1f   :  { %p3911_p0 = por %p3910_p13, %p3909_p12 }
  0x21   :  { %p3912_p1 = pnand %p3911_p0, %p3905_p11 }
  0x23   :  { %3915 = shalt.err (!%p3912_p1)
}
  0x24   :  { %66 = dma.hbm_to_vmem [thread:$0]  %s4724_s5, 128, %s64_s24, [#allocation13]  }
  0x25   :  { %s4116_s27 = smov [#allocation15]   ;;  %s4117_s29 = smov [#allocation18]  }
  0x26   :  { %s83_s28 = sshll.u32 %s4116_s27, 4  ;;  %s102_s30 = sshll.u32 %s4117_s29, 4  ;;  %s84_s28 = int_to_ptr.vmem [resolvable:$true] %s83_s28  ;;  %s4233_s30 = int_to_ptr.vmem [resolvable:$true] %s102_s30 }
  0x27   :  { %s3916_s15 = scalar_lea.hbm %s4727_s8, 32 }
  0x28   :  { %p3917_p2 = scmp.ne.s32.totalorder %s4727_s8, %s3916_s15  ;;  %p3920_p3 = scmp.lt.u32.totalorder %s3916_s15, %s4727_s8 }
  0x2a   :  { %p3922_p4 = pnand %p3920_p3, %p3917_p2 }
  0x2c   :  { %3925 = shalt.err (!%p3922_p4)
}
  0x2d   :  { %s3926_s5 = scalar_lea.vmem %s84_s28, 32  ;;  %p3931_p6 = scmp.lt.s32.totalorder %s84_s28, %s84_s28 }
  0x2e   :  { %p3927_p5 = scmp.ne.s32.totalorder %s84_s28, %s3926_s5  ;;  %p3932_p7 = scmp.lt.s32.totalorder %s3926_s5, %s3926_s5 }
  0x30   :  { %p3933_p8 = por %p3932_p7, %p3931_p6 }
  0x32   :  { %p3934_p9 = pnand %p3933_p8, %p3927_p5 }
  0x34   :  { %3937 = shalt.err (!%p3934_p9)
}
  0x35   :  { %86 = dma.hbm_to_vmem [thread:$0]  %s4727_s8, 32, %s84_s28, [#allocation16]  }
  0x36   :  { %s3938_s25 = scalar_lea.hbm %s4729_s10, 2048 }
  0x37   :  { %p3939_p10 = scmp.ne.s32.totalorder %s4729_s10, %s3938_s25  ;;  %p3942_p11 = scmp.lt.u32.totalorder %s3938_s25, %s4729_s10 }
  0x39   :  { %p3944_p12 = pnand %p3942_p11, %p3939_p10 }
  0x3b   :  { %3947 = shalt.err (!%p3944_p12)
}
  0x3c   :  { %s3948_s29 = scalar_lea.vmem %s4233_s30, 2048  ;;  %p3953_p0 = scmp.lt.s32.totalorder %s4233_s30, %s4233_s30 }
  0x3d   :  { %p3949_p13 = scmp.ne.s32.totalorder %s4233_s30, %s3948_s29  ;;  %p3954_p1 = scmp.lt.s32.totalorder %s3948_s29, %s3948_s29 }
  0x3f   :  { %p3955_p2 = por %p3954_p1, %p3953_p0 }
  0x41   :  { %p3956_p3 = pnand %p3955_p2, %p3949_p13 }
  0x43   :  { %3959 = shalt.err (!%p3956_p3)
}
  0x44   :  { %s4118_s8 = smov 64   ;;  %s4119_s28 = smov 4  }
  0x45   :  { %108 = dma.hbm_to_vmem [thread:$0]  %s4729_s10, 2048, %s4233_s30, [#allocation19], %s4118_s8, %s4118_s8, %s4119_s28  }
  0x46   :  { %s4120_s15 = smov [#allocation6]   ;;  %s3960_s19 = scalar_lea.hbm %s4720_s1, 8192 }
  0x47   :  { %s30_s16 = sshll.u32 %s4120_s15, 4  ;;  %p3961_p4 = scmp.ne.s32.totalorder %s4720_s1, %s3960_s19  ;;  %s31_s16 = int_to_ptr.vmem [resolvable:$true] %s30_s16 }
  0x48   :  { %p3964_p5 = scmp.lt.u32.totalorder %s3960_s19, %s4720_s1 }
  0x4a   :  { %p3966_p6 = pnand %p3964_p5, %p3961_p4 }
  0x4c   :  { %3969 = shalt.err (!%p3966_p6)
}
  0x4d   :  { %s3970_s23 = scalar_lea.vmem %s31_s16, 8192  ;;  %p3975_p8 = scmp.lt.s32.totalorder %s31_s16, %s31_s16 }
  0x4e   :  { %p3971_p7 = scmp.ne.s32.totalorder %s31_s16, %s3970_s23  ;;  %p3976_p9 = scmp.lt.s32.totalorder %s3970_s23, %s3970_s23 }
  0x50   :  { %p3977_p10 = por %p3976_p9, %p3975_p8 }
  0x52   :  { %p3978_p11 = pnand %p3977_p10, %p3971_p7 }
  0x54   :  { %3981 = shalt.err (!%p3978_p11)
}
  0x55   :  { %s4121_s10 = smov 512   ;;  %s4122_s30 = smov 32  }
  0x56   :  { %36 = dma.hbm_to_vmem [thread:$0]  %s4720_s1, 8192, %s31_s16, [#allocation7], %s4121_s10, %s4121_s10, %s4122_s30  }
  0x57   :  { %s4123_s2 = smov [#allocation11]   ;;  %s4124_s27 = smov [#allocation14]  }
  0x58   :  { %s53_s22 = sshll.u32 %s4123_s2, 4  ;;  %s73_s29 = sshll.u32 %s4124_s27, 4  ;;  %s54_s22 = int_to_ptr.vmem [resolvable:$true] %s53_s22  ;;  %s74_s29 = int_to_ptr.vmem [resolvable:$true] %s73_s29 }
  0x59   :  { %s3982_s15 = scalar_lea.hbm %s4722_s3, 128 }
  0x5a   :  { %p3983_p12 = scmp.ne.s32.totalorder %s4722_s3, %s3982_s15  ;;  %p3986_p13 = scmp.lt.u32.totalorder %s3982_s15, %s4722_s3 }
  0x5c   :  { %p3988_p0 = pnand %p3986_p13, %p3983_p12 }
  0x5e   :  { %3991 = shalt.err (!%p3988_p0)
}
  0x5f   :  { %s3992_s1 = scalar_lea.vmem %s54_s22, 128  ;;  %p3997_p2 = scmp.lt.s32.totalorder %s54_s22, %s54_s22 }
  0x60   :  { %p3993_p1 = scmp.ne.s32.totalorder %s54_s22, %s3992_s1  ;;  %p3998_p3 = scmp.lt.s32.totalorder %s3992_s1, %s3992_s1 }
  0x62   :  { %p3999_p4 = por %p3998_p3, %p3997_p2 }
  0x64   :  { %p4000_p5 = pnand %p3999_p4, %p3993_p1 }
  0x66   :  { %4003 = shalt.err (!%p4000_p5)
}
  0x67   :  { %56 = dma.hbm_to_vmem [thread:$0]  %s4722_s3, 128, %s54_s22, [#allocation10]  }
  0x68   :  { %s4004_s23 = scalar_lea.hbm %s4725_s6, 128 }
  0x69   :  { %p4005_p6 = scmp.ne.s32.totalorder %s4725_s6, %s4004_s23  ;;  %p4008_p7 = scmp.lt.u32.totalorder %s4004_s23, %s4725_s6 }
  0x6b   :  { %p4010_p8 = pnand %p4008_p7, %p4005_p6 }
  0x6d   :  { %4013 = shalt.err (!%p4010_p8)
}
  0x6e   :  { %s4014_s2 = scalar_lea.vmem %s74_s29, 128  ;;  %p4019_p10 = scmp.lt.s32.totalorder %s74_s29, %s74_s29 }
  0x6f   :  { %p4015_p9 = scmp.ne.s32.totalorder %s74_s29, %s4014_s2  ;;  %p4020_p11 = scmp.lt.s32.totalorder %s4014_s2, %s4014_s2 }
  0x71   :  { %p4021_p12 = por %p4020_p11, %p4019_p10 }
  0x73   :  { %p4022_p13 = pnand %p4021_p12, %p4015_p9 }
  0x75   :  { %4025 = shalt.err (!%p4022_p13)
}
  0x76   :  { %76 = dma.hbm_to_vmem [thread:$0]  %s4725_s6, 128, %s74_s29, [#allocation13]  }
  0x77   :  { %s4125_s27 = smov [#allocation17]   ;;  %s4126_s14 = smov [#allocation20]  }
  0x78   :  { %s93_s13 = sshll.u32 %s4125_s27, 4  ;;  %s115_s15 = sshll.u32 %s4126_s14, 4  ;;  %s94_s13 = int_to_ptr.vmem [resolvable:$true] %s93_s13  ;;  %s116_s15 = int_to_ptr.vmem [resolvable:$true] %s115_s15 }
  0x79   :  { %s4026_s19 = scalar_lea.hbm %s4728_s9, 32 }
  0x7a   :  { %p4027_p0 = scmp.ne.s32.totalorder %s4728_s9, %s4026_s19  ;;  %p4030_p1 = scmp.lt.u32.totalorder %s4026_s19, %s4728_s9 }
  0x7c   :  { %p4032_p2 = pnand %p4030_p1, %p4027_p0 }
  0x7e   :  { %4035 = shalt.err (!%p4032_p2)
}
  0x7f   :  { %s4036_s6 = scalar_lea.vmem %s94_s13, 32  ;;  %p4041_p4 = scmp.lt.s32.totalorder %s94_s13, %s94_s13 }
  0x80   :  { %p4037_p3 = scmp.ne.s32.totalorder %s94_s13, %s4036_s6  ;;  %p4042_p5 = scmp.lt.s32.totalorder %s4036_s6, %s4036_s6 }
  0x82   :  { %p4043_p6 = por %p4042_p5, %p4041_p4 }
  0x84   :  { %p4044_p7 = pnand %p4043_p6, %p4037_p3 }
  0x86   :  { %4047 = shalt.err (!%p4044_p7)
}
  0x87   :  { %96 = dma.hbm_to_vmem [thread:$0]  %s4728_s9, 32, %s94_s13, [#allocation16]  }
  0x88   :  { %s4048_s10 = scalar_lea.hbm %s4730_s11, 16 }
  0x89   :  { %p4049_p8 = scmp.ne.s32.totalorder %s4730_s11, %s4048_s10  ;;  %p4052_p9 = scmp.lt.u32.totalorder %s4048_s10, %s4730_s11 }
  0x8b   :  { %p4054_p10 = pnand %p4052_p9, %p4049_p8 }
  0x8d   :  { %4057 = shalt.err (!%p4054_p10)
}
  0x8e   :  { %s4058_s3 = scalar_lea.vmem %s116_s15, 16  ;;  %s4062_s22 = scalar_lea.vmem %s116_s15, 32 }
  0x8f   :  { %p4059_p11 = scmp.ne.s32.totalorder %s116_s15, %s4058_s3  ;;  %p4063_p12 = scmp.lt.s32.totalorder %s116_s15, %s116_s15 }
  0x90   :  { %p4064_p13 = scmp.lt.s32.totalorder %s4062_s22, %s4058_s3 }
  0x92   :  { %p4065_p0 = por %p4064_p13, %p4063_p12 }
  0x94   :  { %p4066_p1 = pnand %p4065_p0, %p4059_p11 }
  0x96   :  { %4069 = shalt.err (!%p4066_p1)
}
  0x97   :  { %118 = dma.hbm_to_vmem [thread:$0]  %s4730_s11, 16, %s116_s15, [#allocation19]  }
  0x98   :  { %4092 = dma.done.wait [#allocation7], 8192  }
  0x99   :  { %4093 = vsyncadd [#allocation7], 4294959104 }
  0x9a   :  { %4094 = dma.done.wait [#allocation10], 256  }
  0x9b   :  { %4095 = vsyncadd [#allocation10], 4294967040 }
  0x9c   :  { %4096 = dma.done.wait [#allocation13], 256  }
  0x9d   :  { %4097 = vsyncadd [#allocation13], 4294967040 }
  0x9e   :  { %4098 = dma.done.wait [#allocation16], 64  }
  0x9f   :  { %4099 = vsyncadd [#allocation16], 4294967232 }
  0xa0   :  { %4100 = dma.done.wait [#allocation19], 2064  }
  0xa1   :  { %4101 = vsyncadd [#allocation19], 4294965232  ;;  %s151_s13 = sld [smem:[#allocation0]]   ;;  %169 = sst [smem:[#allocation23 + $0x3]] %s4118_s8  ;;  %v4127_v0 = vmov 0  }
  0xa2   :  { %635 = vmatprep.mubr.bf16.mxu1 %v4127_v0  ;;  %717 = vmatprep.mubr.bf16.mxu0 %v4127_v0  ;;  %177 = sst [smem:[#allocation23 + $0x7]] %s4118_s8  ;;  %s4128_s11 = smov [#allocation2]  }
  0xa3   :  { %s4331_s14 = sshll.u32 %s4128_s11, 4  ;;  %179 = sst [smem:[#allocation23 + $0x8]] %s4119_s28  ;;  %s160_s14 = int_to_ptr.vmem [resolvable:$true] %s4331_s14 }
  0xa4   :  { %s4129_s15 = smov 256   ;;  %s4130_s17 = smov 2  }
  0xa5   :  { %163 = sst [smem:[#allocation23]] %s4129_s15  ;;  %s4131_s19 = smov 128  }
  0xa6   :  { %165 = sst [smem:[#allocation23 + $0x1]] %s4129_s15  ;;  %s4132_s1 = smov [#allocation5]  }
  0xa7   :  { %167 = sst [smem:[#allocation23 + $0x2]] %s4130_s17  ;;  %s3592_s18 = sshll.u32 %s151_s13, 26 }
  0xa8   :  { %171 = sst [smem:[#allocation23 + $0x4]] %s4131_s19  ;;  %s4339_s5 = sadd.s32 134217728, %s3592_s18 }
  0xa9   :  { %173 = sst [smem:[#allocation23 + $0x5]] %s4130_s17  ;;  %s4133_s16 = smov [#allocation22]  }
  0xaa   :  { %175 = sst [smem:[#allocation23 + $0x6]] %s4131_s19  ;;  %s4134_s29 = smov [#allocation3]  }
  0xab   :  { %181 = dma.general %s4723_s4, 16384, %s160_s14, %s4132_s1, %s4133_s16, [#allocation23], %s4339_s5, 0  }
  0xac   :  { %198 = sst [smem:[#allocation25]] %s4129_s15  ;;  %s194_s20 = sshll.u32 %s4134_s29, 4  ;;  %s195_s20 = int_to_ptr.vmem [resolvable:$true] %s194_s20 }
  0xad   :  { %200 = sst [smem:[#allocation25 + $0x1]] %s4129_s15  ;;  %s4135_s21 = smov [#allocation5 + $0x2]  }
  0xae   :  { %202 = sst [smem:[#allocation25 + $0x2]] %s4130_s17  ;;  %s4136_s23 = smov [#allocation24]  }
  0xaf   :  { %204 = sst [smem:[#allocation25 + $0x3]] %s4118_s8 }
  0xb0   :  { %206 = sst [smem:[#allocation25 + $0x4]] %s4131_s19 }
  0xb1   :  { %208 = sst [smem:[#allocation25 + $0x5]] %s4130_s17 }
  0xb2   :  { %210 = sst [smem:[#allocation25 + $0x6]] %s4131_s19 }
  0xb3   :  { %212 = sst [smem:[#allocation25 + $0x7]] %s4118_s8 }
  0xb4   :  { %214 = sst [smem:[#allocation25 + $0x8]] %s4119_s28 }
  0xb5   :  { %216 = dma.general %s4726_s7, 16384, %s195_s20, %s4135_s21, %s4136_s23, [#allocation25], %s4339_s5, 0  }
  0xb6   :  { %v4363_v1 = vld [vmem:[#allocation12] sm:$0xff]  ;;  %v4365_v2 = vld [vmem:[#allocation14] sm:$0xff]  ;;  %v219_v3 = vld [vmem:[#allocation6] sm:$0xff] }
  0xb7   :  { %v223_v4 = vld [vmem:[#allocation6 + $0x20] sm:$0xff]  ;;  %v221_v20 = vld [vmem:[#allocation6 + $0x10] sm:$0xff]  ;;  %v220_v55 = vld [vmem:[#allocation6 + $0x8] sm:$0xff] }
  0xb8   :  { %v227_v5 = vld [vmem:[#allocation6 + $0x40] sm:$0xff]  ;;  %v3597_v7 = vcombine.high %v219_v3, %v223_v4  ;;  %v3596_v8 = vcombine.low %v219_v3, %v223_v4  ;;  %v225_v21 = vld [vmem:[#allocation6 + $0x30] sm:$0xff]  ;;  %v224_v56 = vld [vmem:[#allocation6 + $0x28] sm:$0xff] }
  0xb9   :  { %v231_v6 = vld [vmem:[#allocation6 + $0x60] sm:$0xff]  ;;  %v3601_v22 = vcombine.high %v221_v20, %v225_v21  ;;  %v3600_v23 = vcombine.low %v221_v20, %v225_v21  ;;  %v229_v24 = vld [vmem:[#allocation6 + $0x50] sm:$0xff]  ;;  %v217_v60 = vld [vmem:[%s4719_s0] sm:$0xff]  ;;  %v3599_v63 = vcombine.high %v220_v55, %v224_v56 }
  0xba   :  { %v3605_v9 = vcombine.high %v227_v5, %v231_v6  ;;  %v235_v10 = vld [vmem:[#allocation6 + $0x80] sm:$0xff]  ;;  %603 = vmatprep.subr.bf16.mxu1 %v3597_v7  ;;  %v3604_v12 = vcombine.low %v227_v5, %v231_v6  ;;  %v233_v25 = vld [vmem:[#allocation6 + $0x70] sm:$0xff]  ;;  %v228_v3 = vld [vmem:[#allocation6 + $0x48] sm:$0xff]  ;;  %v4370_v6 = vpack.c.bf16 %v217_v60, %v217_v60 }
  0xbb   :  { %v239_v11 = vld [vmem:[#allocation6 + $0xa0] sm:$0xff]  ;;  %604 = vmatpush1.bf16.msra.mxu1 %v3596_v8  ;;  %v3609_v27 = vcombine.high %v229_v24, %v233_v25  ;;  %v237_v28 = vld [vmem:[#allocation6 + $0x90] sm:$0xff]  ;;  %685 = vmatprep.subr.bf16.mxu0 %v3601_v22  ;;  %v3608_v33 = vcombine.low %v229_v24, %v233_v25  ;;  %v232_v4 = vld [vmem:[#allocation6 + $0x68] sm:$0xff]  ;;  %v3598_v8 = vcombine.low %v220_v55, %v224_v56 }
  0xbc   :  { %605 = vmatprep.subr.bf16.mxu1 %v3605_v9  ;;  %v3613_v13 = vcombine.high %v235_v10, %v239_v11  ;;  %v243_v14 = vld [vmem:[#allocation6 + $0xc0] sm:$0xff]  ;;  %v3612_v16 = vcombine.low %v235_v10, %v239_v11  ;;  %v241_v30 = vld [vmem:[#allocation6 + $0xb0] sm:$0xff]  ;;  %686 = vmatpush1.bf16.msra.mxu0 %v3600_v23  ;;  %v3607_v11 = vcombine.high %v228_v3, %v232_v4  ;;  %v252_v23 = vld [vmem:[#allocation6 + $0x108] sm:$0xff] }
  0xbd   :  { %v247_v15 = vld [vmem:[#allocation6 + $0xe0] sm:$0xff]  ;;  %687 = vmatprep.subr.bf16.mxu0 %v3609_v27  ;;  %v3617_v34 = vcombine.high %v237_v28, %v241_v30  ;;  %v245_v36 = vld [vmem:[#allocation6 + $0xd0] sm:$0xff]  ;;  %v3616_v41 = vcombine.low %v237_v28, %v241_v30  ;;  %v256_v24 = vld [vmem:[#allocation6 + $0x128] sm:$0xff] }
  0xbe   :  { %v3621_v17 = vcombine.high %v243_v14, %v247_v15  ;;  %v251_v18 = vld [vmem:[#allocation6 + $0x100] sm:$0xff]  ;;  %v3620_v26 = vcombine.low %v243_v14, %v247_v15  ;;  %v249_v37 = vld [vmem:[#allocation6 + $0xf0] sm:$0xff]  ;;  %v260_v27 = vld [vmem:[#allocation6 + $0x148] sm:$0xff] }
  0xbf   :  { %606 = vmatpush1.bf16.msra.mxu1 %v3604_v12  ;;  %v255_v19 = vld [vmem:[#allocation6 + $0x120] sm:$0xff]  ;;  %v3625_v42 = vcombine.high %v245_v36, %v249_v37  ;;  %v253_v44 = vld [vmem:[#allocation6 + $0x110] sm:$0xff]  ;;  %v3624_v49 = vcombine.low %v245_v36, %v249_v37  ;;  %v236_v12 = vld [vmem:[#allocation6 + $0x88] sm:$0xff] }
  0xc0   :  { %607 = vmatprep.subr.bf16.mxu1 %v3613_v13  ;;  %v3629_v29 = vcombine.high %v251_v18, %v255_v19  ;;  %v259_v31 = vld [vmem:[#allocation6 + $0x140] sm:$0xff]  ;;  %v3628_v35 = vcombine.low %v251_v18, %v255_v19  ;;  %688 = vmatpush1.bf16.msra.mxu0 %v3608_v33  ;;  %v257_v45 = vld [vmem:[#allocation6 + $0x130] sm:$0xff]  ;;  %v240_v13 = vld [vmem:[#allocation6 + $0xa8] sm:$0xff] }
  0xc1   :  { %v263_v32 = vld [vmem:[#allocation6 + $0x160] sm:$0xff]  ;;  %689 = vmatprep.subr.bf16.mxu0 %v3617_v34  ;;  %v3633_v50 = vcombine.high %v253_v44, %v257_v45  ;;  %v261_v52 = vld [vmem:[#allocation6 + $0x150] sm:$0xff]  ;;  %v3632_v57 = vcombine.low %v253_v44, %v257_v45  ;;  %v244_v18 = vld [vmem:[#allocation6 + $0xc8] sm:$0xff]  ;;  %v3614_v21 = vcombine.low %v236_v12, %v240_v13 }
  0xc2   :  { %v3637_v38 = vcombine.high %v259_v31, %v263_v32  ;;  %v267_v39 = vld [vmem:[#allocation6 + $0x180] sm:$0xff]  ;;  %v3636_v43 = vcombine.low %v259_v31, %v263_v32  ;;  %v265_v53 = vld [vmem:[#allocation6 + $0x170] sm:$0xff]  ;;  %v248_v19 = vld [vmem:[#allocation6 + $0xe8] sm:$0xff] }
  0xc3   :  { %608 = vmatpush1.bf16.msra.mxu1 %v3612_v16  ;;  %v271_v40 = vld [vmem:[#allocation6 + $0x1a0] sm:$0xff]  ;;  %v3641_v58 = vcombine.high %v261_v52, %v265_v53  ;;  %v269_v61 = vld [vmem:[#allocation6 + $0x190] sm:$0xff]  ;;  %v3640_v5 = vcombine.low %v261_v52, %v265_v53  ;;  %v3606_v16 = vcombine.low %v228_v3, %v232_v4  ;;  %v3623_v22 = vcombine.high %v244_v18, %v248_v19  ;;  %v264_v28 = vld [vmem:[#allocation6 + $0x168] sm:$0xff] }
  0xc4   :  { %609 = vmatprep.subr.bf16.mxu1 %v3621_v17  ;;  %v3645_v46 = vcombine.high %v267_v39, %v271_v40  ;;  %v275_v47 = vld [vmem:[#allocation6 + $0x1c0] sm:$0xff]  ;;  %690 = vmatpush1.bf16.msra.mxu0 %v3616_v41  ;;  %v3644_v51 = vcombine.low %v267_v39, %v271_v40  ;;  %v273_v62 = vld [vmem:[#allocation6 + $0x1b0] sm:$0xff]  ;;  %v3615_v17 = vcombine.high %v236_v12, %v240_v13  ;;  %v268_v31 = vld [vmem:[#allocation6 + $0x188] sm:$0xff] }
  0xc5   :  { %v279_v48 = vld [vmem:[#allocation6 + $0x1e0] sm:$0xff]  ;;  %691 = vmatprep.subr.bf16.mxu0 %v3625_v42  ;;  %v3649_v7 = vcombine.high %v269_v61, %v273_v62  ;;  %v277_v9 = vld [vmem:[#allocation6 + $0x1d0] sm:$0xff]  ;;  %v3648_v14 = vcombine.low %v269_v61, %v273_v62  ;;  %v3622_v25 = vcombine.low %v244_v18, %v248_v19  ;;  %v3639_v30 = vcombine.high %v260_v27, %v264_v28  ;;  %v272_v32 = vld [vmem:[#allocation6 + $0x1a8] sm:$0xff] }
  0xc6   :  { %v3653_v54 = vcombine.high %v275_v47, %v279_v48  ;;  %v3652_v59 = vcombine.low %v275_v47, %v279_v48  ;;  %v281_v10 = vld [vmem:[#allocation6 + $0x1f0] sm:$0xff]  ;;  %v3638_v33 = vcombine.low %v260_v27, %v264_v28  ;;  %v3647_v34 = vcombine.high %v268_v31, %v272_v32  ;;  %v280_v36 = vld [vmem:[#allocation6 + $0x1e8] sm:$0xff]  ;;  %v222_v39 = vld [vmem:[#allocation6 + $0x18] sm:$0xff] }
  0xc7   :  { %610 = vmatpush1.bf16.msra.mxu1 %v3620_v26  ;;  %v3657_v15 = vcombine.high %v277_v9, %v281_v10  ;;  %v3656_v20 = vcombine.low %v277_v9, %v281_v10  ;;  %v3631_v26 = vcombine.high %v252_v23, %v256_v24  ;;  %v3646_v37 = vcombine.low %v268_v31, %v272_v32  ;;  %v226_v40 = vld [vmem:[#allocation6 + $0x38] sm:$0xff] }
  0xc8   :  { %611 = vmatprep.subr.bf16.mxu1 %v3629_v29  ;;  %692 = vmatpush1.bf16.msra.mxu0 %v3624_v49  ;;  %v3630_v29 = vcombine.low %v252_v23, %v256_v24  ;;  %v3603_v42 = vcombine.high %v222_v39, %v226_v40  ;;  %v234_v44 = vld [vmem:[#allocation6 + $0x78] sm:$0xff]  ;;  %v3602_v45 = vcombine.low %v222_v39, %v226_v40 }
  0xc9   :  { %693 = vmatprep.subr.bf16.mxu0 %v3633_v50  ;;  %v238_v47 = vld [vmem:[#allocation6 + $0x98] sm:$0xff] }
  0xca   :  { %v242_v48 = vld [vmem:[#allocation6 + $0xb8] sm:$0xff] }
  0xcb   :  { %612 = vmatpush1.bf16.msra.mxu1 %v3628_v35  ;;  %v276_v35 = vld [vmem:[#allocation6 + $0x1c8] sm:$0xff]  ;;  %v3619_v50 = vcombine.high %v238_v47, %v242_v48  ;;  %v250_v52 = vld [vmem:[#allocation6 + $0xf8] sm:$0xff]  ;;  %v3618_v53 = vcombine.low %v238_v47, %v242_v48 }
  0xcc   :  { %613 = vmatprep.subr.bf16.mxu1 %v3637_v38  ;;  %694 = vmatpush1.bf16.msra.mxu0 %v3632_v57  ;;  %v3655_v38 = vcombine.high %v276_v35, %v280_v36  ;;  %v3654_v41 = vcombine.low %v276_v35, %v280_v36  ;;  %v254_v55 = vld [vmem:[#allocation6 + $0x118] sm:$0xff] }
  0xcd   :  { %695 = vmatprep.subr.bf16.mxu0 %v3641_v58  ;;  %v258_v56 = vld [vmem:[#allocation6 + $0x138] sm:$0xff] }
  0xce   :  { %v3635_v58 = vcombine.high %v254_v55, %v258_v56  ;;  %v266_v60 = vld [vmem:[#allocation6 + $0x178] sm:$0xff]  ;;  %v3634_v61 = vcombine.low %v254_v55, %v258_v56 }
  0xcf   :  { %614 = vmatpush1.bf16.msra.mxu1 %v3636_v43  ;;  %v230_v43 = vld [vmem:[#allocation6 + $0x58] sm:$0xff] }
  0xd0   :  { %615 = vmatprep.subr.bf16.mxu1 %v3645_v46  ;;  %696 = vmatpush1.bf16.msra.mxu0 %v3640_v5  ;;  %v3611_v46 = vcombine.high %v230_v43, %v234_v44  ;;  %v3610_v49 = vcombine.low %v230_v43, %v234_v44  ;;  %v270_v62 = vld [vmem:[#allocation6 + $0x198] sm:$0xff] }
  0xd1   :  { %697 = vmatprep.subr.bf16.mxu0 %v3649_v7  ;;  %v278_v5 = vld [vmem:[#allocation6 + $0x1d8] sm:$0xff] }
  0xd2   :  { %v282_v7 = vld [vmem:[#allocation6 + $0x1f8] sm:$0xff] }
  0xd3   :  { %616 = vmatpush1.bf16.msra.mxu1 %v3644_v51  ;;  %v246_v51 = vld [vmem:[#allocation6 + $0xd8] sm:$0xff]  ;;  %v3659_v9 = vcombine.high %v278_v5, %v282_v7  ;;  %v3658_v10 = vcombine.low %v278_v5, %v282_v7 }
  0xd4   :  { %617 = vmatprep.subr.bf16.mxu1 %v3653_v54  ;;  %698 = vmatpush1.bf16.msra.mxu0 %v3648_v14  ;;  %v3627_v54 = vcombine.high %v246_v51, %v250_v52  ;;  %v3626_v57 = vcombine.low %v246_v51, %v250_v52 }
  0xd5   :  { %699 = vmatprep.subr.bf16.mxu0 %v3657_v15 }
  0xd7   :  { %618 = vmatpush1.bf16.msra.mxu1 %v3652_v59  ;;  %v262_v59 = vld [vmem:[#allocation6 + $0x158] sm:$0xff] }
  0xd8   :  { %644 = vmatprep.subr.bf16.mxu1 %v3599_v63  ;;  %700 = vmatpush1.bf16.msra.mxu0 %v3656_v20  ;;  %v274_v63 = vld [vmem:[#allocation6 + $0x1b8] sm:$0xff]  ;;  %v3642_v3 = vcombine.low %v262_v59, %v266_v60 }
  0xd9   :  { %v3651_v4 = vcombine.high %v270_v62, %v274_v63 }
  0xda   :  { %636 = vmatmul.mubr.bf16.vlgmr.msra.gmra.mrb[0].mxu1 %v4370_v6 }
  0xdb   :  { %645 = vmatpush1.bf16.msra.mxu1 %v3598_v8  ;;  %676 = vmatprep.mubr.bf16.mxu1 %v4127_v0  ;;  %v3650_v8 = vcombine.low %v270_v62, %v274_v63 }
  0xdc   :  { %646 = vmatprep.subr.bf16.mxu1 %v3607_v11  ;;  %718 = vmatmul.mubr.bf16.vlgmr.msra.gmra.mrb[0].mxu0 %v4370_v6 }
  0xdf   :  { %647 = vmatpush1.bf16.msra.mxu1 %v3606_v16 }
  0xe0   :  { %648 = vmatprep.subr.bf16.mxu1 %v3615_v17 }
  0xe3   :  { %649 = vmatpush1.bf16.msra.mxu1 %v3614_v21 }
  0xe4   :  { %650 = vmatprep.subr.bf16.mxu1 %v3623_v22 }
  0xe7   :  { %651 = vmatpush1.bf16.msra.mxu1 %v3622_v25 }
  0xe8   :  { %652 = vmatprep.subr.bf16.mxu1 %v3631_v26 }
  0xeb   :  { %653 = vmatpush1.bf16.msra.mxu1 %v3630_v29 }
  0xec   :  { %654 = vmatprep.subr.bf16.mxu1 %v3639_v30 }
  0xef   :  { %655 = vmatpush1.bf16.msra.mxu1 %v3638_v33 }
  0xf0   :  { %656 = vmatprep.subr.bf16.mxu1 %v3647_v34 }
  0xf3   :  { %657 = vmatpush1.bf16.msra.mxu1 %v3646_v37 }
  0xf4   :  { %658 = vmatprep.subr.bf16.mxu1 %v3655_v38 }
  0xf7   :  { %659 = vmatpush1.bf16.msra.mxu1 %v3654_v41 }
  0xf8   :  { %726 = vmatprep.subr.bf16.mxu1 %v3603_v42 }
  0xfa   :  { %677 = vmatmul.mubr.bf16.vlgmr.msra.gmra.mrb[4].mxu1 %v4370_v6 }
  0xfb   :  { %727 = vmatpush1.bf16.msra.mxu1 %v3602_v45  ;;  %758 = vmatprep.mubr.bf16.mxu1 %v4127_v0  ;;  %v3643_v0 = vcombine.high %v262_v59, %v266_v60 }
  0xfc   :  { %728 = vmatprep.subr.bf16.mxu1 %v3611_v46 }
  0xff   :  { %729 = vmatpush1.bf16.msra.mxu1 %v3610_v49 }
 0x100   :  { %730 = vmatprep.subr.bf16.mxu1 %v3619_v50 }
 0x103   :  { %731 = vmatpush1.bf16.msra.mxu1 %v3618_v53 }
 0x104   :  { %732 = vmatprep.subr.bf16.mxu1 %v3627_v54 }
 0x107   :  { %733 = vmatpush1.bf16.msra.mxu1 %v3626_v57 }
 0x108   :  { %734 = vmatprep.subr.bf16.mxu1 %v3635_v58 }
 0x10b   :  { %735 = vmatpush1.bf16.msra.mxu1 %v3634_v61 }
 0x10c   :  { %736 = vmatprep.subr.bf16.mxu1 %v3643_v0 }
 0x10f   :  { %737 = vmatpush1.bf16.msra.mxu1 %v3642_v3 }
 0x110   :  { %738 = vmatprep.subr.bf16.mxu1 %v3651_v4 }
 0x113   :  { %739 = vmatpush1.bf16.msra.mxu1 %v3650_v8 }
 0x114   :  { %740 = vmatprep.subr.bf16.mxu1 %v3659_v9 }
 0x117   :  { %741 = vmatpush1.bf16.msra.mxu1 %v3658_v10 }
 0x11a   :  { %759 = vmatmul.mubr.bf16.vlgmr.msra.gmra.mrb[8].mxu1 %v4370_v6 }
 0x1ad   :  { %v4378_v11 = vpop.f32.mrb[0].mxu1 }
 0x1ae   :  { %v769_v12 = vrot.slane %v4378_v11, 4  ;;  %v826_v13 = vmul.f32 %v4378_v11, %v4378_v11  ;;  %v4383_v14 = vpop.f32.mrb[1].mxu1 }
 0x1af   :  { %v775_v15 = vrot.slane %v4383_v14, 4  ;;  %v827_v16 = vmul.f32 %v4383_v14, %v4383_v14  ;;  %v641_v17 = vpop.f32.mrb[2].mxu1  ;;  %v4390_v34 = vpop.f32.mrb[0].mxu0 }
 0x1b0   :  { %v770_v18 = vadd.f32 %v769_v12, %v4378_v11  ;;  %v834_v19 = vrot.slane %v826_v13, 4  ;;  %v642_v20 = vpop.f32.mrb[3].mxu1  ;;  %v793_v37 = vrot.slane %v4390_v34, 4  ;;  %v830_v38 = vmul.f32 %v4390_v34, %v4390_v34  ;;  %v4395_v39 = vpop.f32.mrb[1].mxu0 }
 0x1b1   :  { %v776_v6 = vadd.f32 %v775_v15, %v4383_v14  ;;  %v840_v21 = vrot.slane %v827_v16, 4  ;;  %v799_v42 = vrot.slane %v4395_v39, 4  ;;  %v831_v43 = vmul.f32 %v4395_v39, %v4395_v39  ;;  %v723_v44 = vpop.f32.mrb[2].mxu0 }
 0x1b2   :  { %v771_v22 = vrot.slane %v770_v18, 2  ;;  %v835_v23 = vadd.f32 %v834_v19, %v826_v13  ;;  %v794_v47 = vadd.f32 %v793_v37, %v4390_v34  ;;  %v858_v48 = vrot.slane %v830_v38, 4  ;;  %v724_v49 = vpop.f32.mrb[3].mxu0 }
 0x1b3   :  { %v777_v24 = vrot.slane %v776_v6, 2  ;;  %v841_v25 = vadd.f32 %v840_v21, %v827_v16  ;;  %v800_v52 = vadd.f32 %v799_v42, %v4395_v39  ;;  %v864_v53 = vrot.slane %v831_v43, 4 }
 0x1b4   :  { %v772_v26 = vadd.f32 %v771_v22, %v770_v18  ;;  %v836_v27 = vrot.slane %v835_v23, 2  ;;  %v795_v56 = vrot.slane %v794_v47, 2  ;;  %v859_v57 = vadd.f32 %v858_v48, %v830_v38 }
 0x1b5   :  { %v778_v28 = vadd.f32 %v777_v24, %v776_v6  ;;  %v842_v29 = vrot.slane %v841_v25, 2  ;;  %v801_v60 = vrot.slane %v800_v52, 2  ;;  %v865_v61 = vadd.f32 %v864_v53, %v831_v43 }
 0x1b6   :  { %v773_v30 = vrot.slane %v772_v26, 1  ;;  %v837_v31 = vadd.f32 %v836_v27, %v835_v23  ;;  %v796_v62 = vadd.f32 %v795_v56, %v794_v47  ;;  %v860_v63 = vrot.slane %v859_v57, 2 }
 0x1b7   :  { %v779_v32 = vrot.slane %v778_v28, 1  ;;  %v843_v33 = vadd.f32 %v842_v29, %v841_v25  ;;  %v802_v4 = vadd.f32 %v801_v60, %v800_v52  ;;  %v866_v5 = vrot.slane %v865_v61, 2 }
 0x1b8   :  { %v774_v35 = vadd.f32 %v773_v30, %v772_v26  ;;  %v838_v36 = vrot.slane %v837_v31, 1  ;;  %v797_v8 = vrot.slane %v796_v62, 1  ;;  %v861_v9 = vadd.f32 %v860_v63, %v859_v57 }
 0x1b9   :  { %v780_v40 = vadd.f32 %v779_v32, %v778_v28  ;;  %v844_v41 = vrot.slane %v843_v33, 1  ;;  %v803_v12 = vrot.slane %v802_v4, 1  ;;  %v867_v13 = vadd.f32 %v866_v5, %v865_v61 }
 0x1ba   :  { %v4400_v45 = vmul.f32 0.125, %v774_v35  ;;  %v839_v46 = vadd.f32 %v838_v36, %v837_v31  ;;  %v798_v16 = vadd.f32 %v797_v8, %v796_v62  ;;  %v862_v17 = vrot.slane %v861_v9, 1 }
 0x1bb   :  { %v4403_v50 = vmul.f32 0.125, %v780_v40  ;;  %v845_v51 = vadd.f32 %v844_v41, %v843_v33  ;;  %v804_v19 = vadd.f32 %v803_v12, %v802_v4  ;;  %v868_v20 = vrot.slane %v867_v13, 1 }
 0x1bc   :  { %v882_v54 = vmul.f32 0.125, %v839_v46  ;;  %v890_v55 = vmul.f32 %v4400_v45, %v4400_v45  ;;  %v4410_v6 = vmul.f32 0.125, %v798_v16  ;;  %v863_v21 = vadd.f32 %v862_v17, %v861_v9 }
 0x1bd   :  { %v883_v58 = vmul.f32 0.125, %v845_v51  ;;  %v891_v59 = vmul.f32 %v4403_v50, %v4403_v50  ;;  %v4412_v22 = vmul.f32 0.125, %v804_v19  ;;  %v869_v23 = vadd.f32 %v868_v20, %v867_v13 }
 0x1be   :  { %v898_v0 = vsub.f32 %v882_v54, %v890_v55  ;;  %v886_v24 = vmul.f32 0.125, %v863_v21  ;;  %v894_v25 = vmul.f32 %v4410_v6, %v4410_v6 }
 0x1bf   :  { %v899_v3 = vsub.f32 %v883_v58, %v891_v59  ;;  %v887_v26 = vmul.f32 0.125, %v869_v23  ;;  %v895_v27 = vmul.f32 %v4412_v22, %v4412_v22 }
 0x1c0   :  { %v906_v7 = vmax.f32 %v898_v0, 0.0  ;;  %v902_v28 = vsub.f32 %v886_v24, %v894_v25 }
 0x1c1   :  { %v907_v10 = vmax.f32 %v899_v3, 0.0  ;;  %v903_v29 = vsub.f32 %v887_v26, %v895_v27 }
 0x1c2   :  { %v914_v15 = vadd.f32 1e-05, %v906_v7  ;;  %v910_v30 = vmax.f32 %v902_v28, 0.0  ;;  %v4137_v28 = vmov 1966171168  }
 0x1c3   :  { %v915_v18 = vadd.f32 1e-05, %v907_v10  ;;  %v911_v31 = vmax.f32 %v903_v29, 0.0  ;;  %v943_v29 = vunpack.c.l.s4 %v4137_v28 }
 0x1c4   :  { %3820 = vrsqrt.f32 %v914_v15  ;;  %v918_v32 = vadd.f32 1e-05, %v910_v30  ;;  %v945_v30 = vlaneseq }
 0x1c5   :  { %3822 = vrsqrt.f32 %v915_v18  ;;  %v919_v35 = vadd.f32 1e-05, %v911_v31  ;;  %v944_v31 = vunpack.c.0.s8 %v943_v29 }
 0x1c6   :  { %3824 = vrsqrt.f32 %v918_v32  ;;  %v4450_v32 = vshrl.u32 %v945_v30, 7 }
 0x1c7   :  { %3826 = vrsqrt.f32 %v919_v35 }
 0x1cd   :  { %v4418_v33 = vpop.f32.mrb[4].mxu1 }
 0x1ce   :  { %v4420_v36 = vpop.eup %3820  ;;  %v781_v37 = vrot.slane %v4418_v33, 4  ;;  %v828_v38 = vmul.f32 %v4418_v33, %v4418_v33  ;;  %v4425_v40 = vpop.f32.mrb[5].mxu1 }
 0x1cf   :  { %v4427_v41 = vpop.eup %3822  ;;  %v787_v42 = vrot.slane %v4425_v40, 4  ;;  %v829_v43 = vmul.f32 %v4425_v40, %v4425_v40  ;;  %v682_v44 = vpop.f32.mrb[6].mxu1 }
 0x1d0   :  { %v938_v46 = vcombine.low %v4420_v36, %v4427_v41  ;;  %v782_v47 = vadd.f32 %v781_v37, %v4418_v33  ;;  %v846_v48 = vrot.slane %v828_v38, 4  ;;  %v683_v49 = vpop.f32.mrb[7].mxu1  ;;  %v4436_v3 = vpop.eup %3824  ;;  %v4455_v37 = vsub.s32 %v944_v31, %v4450_v32 }
 0x1d1   :  { %v788_v51 = vadd.f32 %v787_v42, %v4425_v40  ;;  %v852_v52 = vrot.slane %v829_v43, 4  ;;  %v4438_v7 = vpop.eup %3826 }
 0x1d2   :  { %v783_v53 = vrot.slane %v782_v47, 2  ;;  %v847_v54 = vadd.f32 %v846_v48, %v828_v38  ;;  %v940_v13 = vcombine.low %v4436_v3, %v4438_v7  ;;  %v1004_v3 = vsub.s32 3, %v4450_v32 }
 0x1d3   :  { %v789_v55 = vrot.slane %v788_v51, 2  ;;  %v853_v56 = vadd.f32 %v852_v52, %v829_v43  ;;  %v1008_v7 = vsub.s32 4, %v4450_v32 }
 0x1d4   :  { %v784_v57 = vadd.f32 %v783_v53, %v782_v47  ;;  %v848_v58 = vrot.slane %v847_v54, 2 }
 0x1d5   :  { %v790_v59 = vadd.f32 %v789_v55, %v788_v51  ;;  %v854_v60 = vrot.slane %v853_v56, 2 }
 0x1d6   :  { %v785_v61 = vrot.slane %v784_v57, 1  ;;  %v849_v0 = vadd.f32 %v848_v58, %v847_v54 }
 0x1d7   :  { %v791_v62 = vrot.slane %v790_v59, 1  ;;  %v855_v63 = vadd.f32 %v854_v60, %v853_v56  ;;  %v948_v56 = vrot.slane %v938_v46, %v4455_v37 }
 0x1d8   :  { %v786_v4 = vadd.f32 %v785_v61, %v784_v57  ;;  %v850_v5 = vrot.slane %v849_v0, 1 }
 0x1d9   :  { %v792_v8 = vadd.f32 %v791_v62, %v790_v59  ;;  %v856_v9 = vrot.slane %v855_v63, 1 }
 0x1da   :  { %v4440_v10 = vmul.f32 0.125, %v786_v4  ;;  %v851_v12 = vadd.f32 %v850_v5, %v849_v0 }
 0x1db   :  { %v4444_v15 = vmul.f32 0.125, %v792_v8  ;;  %v857_v16 = vadd.f32 %v856_v9, %v855_v63 }
 0x1dc   :  { %v884_v17 = vmul.f32 0.125, %v851_v12  ;;  %v892_v18 = vmul.f32 %v4440_v10, %v4440_v10 }
 0x1dd   :  { %v885_v19 = vmul.f32 0.125, %v857_v16  ;;  %v893_v20 = vmul.f32 %v4444_v15, %v4444_v15 }
 0x1de   :  { %v900_v21 = vsub.f32 %v884_v17, %v892_v18 }
 0x1df   :  { %v901_v23 = vsub.f32 %v885_v19, %v893_v20 }
 0x1e0   :  { %v908_v24 = vmax.f32 %v900_v21, 0.0 }
 0x1e1   :  { %v909_v25 = vmax.f32 %v901_v23, 0.0 }
 0x1e2   :  { %v916_v26 = vadd.f32 1e-05, %v908_v24 }
 0x1e3   :  { %v917_v27 = vadd.f32 1e-05, %v909_v25 }
 0x1e4   :  { %3828 = vrsqrt.f32 %v916_v26 }
 0x1e5   :  { %3830 = vrsqrt.f32 %v917_v27 }
 0x1ed   :  { %v4452_v35 = vpop.f32.mrb[8].mxu1 }
 0x1ee   :  { %v3829_v36 = vpop.eup %3828  ;;  %v805_v38 = vrot.slane %v4452_v35, 4  ;;  %v832_v41 = vmul.f32 %v4452_v35, %v4452_v35  ;;  %v4460_v42 = vpop.f32.mrb[9].mxu1 }
 0x1ef   :  { %v3831_v43 = vpop.eup %3830  ;;  %v811_v44 = vrot.slane %v4460_v42, 4  ;;  %v833_v47 = vmul.f32 %v4460_v42, %v4460_v42  ;;  %v764_v48 = vpop.f32.mrb[10].mxu1 }
 0x1f0   :  { %v939_v49 = vcombine.low %v3829_v36, %v3831_v43  ;;  %v806_v51 = vadd.f32 %v805_v38, %v4452_v35  ;;  %v870_v52 = vrot.slane %v832_v41, 4  ;;  %v765_v53 = vpop.f32.mrb[11].mxu1  ;;  %v962_v48 = vrot.slane %v940_v13, %v4455_v37 }
 0x1f1   :  { %v812_v54 = vadd.f32 %v811_v44, %v4460_v42  ;;  %v876_v55 = vrot.slane %v833_v47, 4  ;;  %v1012_v13 = vsub.s32 5, %v4450_v32 }
 0x1f2   :  { %v955_v57 = vrot.slane %v939_v49, %v4455_v37  ;;  %v807_v58 = vrot.slane %v806_v51, 2  ;;  %v871_v59 = vadd.f32 %v870_v52, %v832_v41 }
 0x1f3   :  { %v813_v60 = vrot.slane %v812_v54, 2  ;;  %v877_v61 = vadd.f32 %v876_v55, %v833_v47  ;;  %v4477_v55 = vsub.s32 0, %v4450_v32 }
 0x1f4   :  { %v970_v0 = vcombine.low %v948_v56, %v955_v57  ;;  %v808_v62 = vadd.f32 %v807_v58, %v806_v51  ;;  %v872_v63 = vrot.slane %v871_v59, 2  ;;  %v4480_v57 = vsub.s32 1, %v4450_v32 }
 0x1f5   :  { %v814_v4 = vadd.f32 %v813_v60, %v812_v54  ;;  %v878_v5 = vrot.slane %v877_v61, 2  ;;  %v767_v54 = vld [vmem:[#allocation9] sm:$0xff]  ;;  %v1000_v58 = vsub.s32 2, %v4450_v32  ;;  %v1020_v60 = vsub.s32 7, %v4450_v32 }
 0x1f6   :  { %v809_v8 = vrot.slane %v808_v62, 1  ;;  %v873_v9 = vadd.f32 %v872_v63, %v871_v59  ;;  %v978_v52 = vrot.slane %v970_v0, %v4455_v37  ;;  %v1016_v59 = vsub.s32 6, %v4450_v32 }
 0x1f7   :  { %v815_v12 = vrot.slane %v814_v4, 1  ;;  %v879_v16 = vadd.f32 %v878_v5, %v877_v61 }
 0x1f8   :  { %v810_v17 = vadd.f32 %v809_v8, %v808_v62  ;;  %v874_v18 = vrot.slane %v873_v9, 1 }
 0x1f9   :  { %v816_v19 = vadd.f32 %v815_v12, %v814_v4  ;;  %v880_v20 = vrot.slane %v879_v16, 1 }
 0x1fa   :  { %v824_v46 = vmul.f32 0.125, %v810_v17  ;;  %v875_v21 = vadd.f32 %v874_v18, %v873_v9 }
 0x1fb   :  { %v825_v23 = vmul.f32 0.125, %v816_v19  ;;  %v881_v24 = vadd.f32 %v880_v20, %v879_v16 }
 0x1fc   :  { %v888_v25 = vmul.f32 0.125, %v875_v21  ;;  %v896_v26 = vmul.f32 %v824_v46, %v824_v46 }
 0x1fd   :  { %v889_v27 = vmul.f32 0.125, %v881_v24  ;;  %v897_v28 = vmul.f32 %v825_v23, %v825_v23 }
 0x1fe   :  { %v904_v29 = vsub.f32 %v888_v25, %v896_v26 }
 0x1ff   :  { %v905_v30 = vsub.f32 %v889_v27, %v897_v28 }
 0x200   :  { %v912_v31 = vmax.f32 %v904_v29, 0.0 }
 0x201   :  { %v913_v36 = vmax.f32 %v905_v30, 0.0 }
 0x202   :  { %v920_v38 = vadd.f32 1e-05, %v912_v31 }
 0x203   :  { %v921_v41 = vadd.f32 1e-05, %v913_v36 }
 0x204   :  { %3832 = vrsqrt.f32 %v920_v38  ;;  %v768_v38 = vld [vmem:[#allocation11] sm:$0xff] }
 0x205   :  { %3834 = vrsqrt.f32 %v921_v41 }
 0x20e   :  { %v3833_v43 = vpop.eup %3832 }
 0x20f   :  { %v3835_v44 = vpop.eup %3834 }
 0x210   :  { %v941_v47 = vcombine.low %v3833_v43, %v3835_v44 }
 0x212   :  { %v969_v49 = vrot.slane %v941_v47, %v4455_v37 }
 0x214   :  { %v971_v51 = vcombine.low %v962_v48, %v969_v49 }
 0x216   :  { %v985_v53 = vrot.slane %v971_v51, %v4455_v37 }
 0x218   :  { %v986_v56 = vcombine.low %v978_v52, %v985_v53 }
 0x21a   :  { %v988_v61 = vmul.f32 %v986_v56, %v767_v54 }
 0x21c   :  { %v993_v0 = vrot.slane %v988_v61, %v4477_v55  ;;  %v997_v62 = vrot.slane %v988_v61, %v4480_v57  ;;  %v1001_v63 = vrot.slane %v988_v61, %v1000_v58  ;;  %v1005_v4 = vrot.slane %v988_v61, %v1004_v3 }
 0x21d   :  { %v1009_v5 = vrot.slane %v988_v61, %v1008_v7  ;;  %v1013_v8 = vrot.slane %v988_v61, %v1012_v13  ;;  %v1017_v9 = vrot.slane %v988_v61, %v1016_v59  ;;  %v1021_v12 = vrot.slane %v988_v61, %v1020_v60 }
 0x21e   :  { %v1030_v16 = vmul.f32 %v993_v0, %v4400_v45  ;;  %v1031_v17 = vmul.f32 %v997_v62, %v4403_v50  ;;  %v1032_v18 = vmul.f32 %v1001_v63, %v4440_v10  ;;  %v1033_v19 = vmul.f32 %v1005_v4, %v4444_v15 }
 0x21f   :  { %v1034_v32 = vmul.f32 %v1009_v5, %v4410_v6  ;;  %v1035_v20 = vmul.f32 %v1013_v8, %v4412_v22  ;;  %v1036_v21 = vmul.f32 %v1017_v9, %v824_v46  ;;  %v1037_v24 = vmul.f32 %v1021_v12, %v825_v23 }
 0x220   :  { %v1046_v25 = vcombine.low %v1030_v16, %v1031_v17  ;;  %v1047_v26 = vcombine.low %v1032_v18, %v1033_v19  ;;  %v1097_v27 = vmul.f32 %v993_v0, %v4378_v11  ;;  %v1098_v28 = vmul.f32 %v997_v62, %v4383_v14 }
 0x221   :  { %v1048_v29 = vcombine.low %v1034_v32, %v1035_v20  ;;  %v1049_v45 = vcombine.low %v1036_v21, %v1037_v24  ;;  %v1099_v50 = vmul.f32 %v1001_v63, %v4418_v33  ;;  %v1100_v10 = vmul.f32 %v1005_v4, %v4425_v40 }
 0x222   :  { %v1056_v15 = vrot.slane %v1046_v25, %v4455_v37  ;;  %v1063_v6 = vrot.slane %v1047_v26, %v4455_v37  ;;  %v1101_v22 = vmul.f32 %v1009_v5, %v4390_v34  ;;  %v1102_v46 = vmul.f32 %v1013_v8, %v4395_v39 }
 0x223   :  { %v1070_v23 = vrot.slane %v1048_v29, %v4455_v37  ;;  %v1077_v11 = vrot.slane %v1049_v45, %v4455_v37  ;;  %v1103_v14 = vmul.f32 %v1017_v9, %v4452_v35  ;;  %v1104_v30 = vmul.f32 %v1021_v12, %v4460_v42 }
 0x224   :  { %v1078_v31 = vcombine.low %v1056_v15, %v1063_v6 }
 0x225   :  { %v1079_v33 = vcombine.low %v1070_v23, %v1077_v11 }
 0x226   :  { %v1086_v40 = vrot.slane %v1078_v31, %v4455_v37 }
 0x227   :  { %v1093_v36 = vrot.slane %v1079_v33, %v4455_v37 }
 0x229   :  { %v1094_v41 = vcombine.low %v1086_v40, %v1093_v36 }
 0x22b   :  { %v1096_v43 = vsub.f32 %v768_v38, %v1094_v41 }
 0x22d   :  { %v1109_v34 = vrot.slane %v1096_v43, %v4477_v55  ;;  %v1113_v39 = vrot.slane %v1096_v43, %v4480_v57  ;;  %v1117_v44 = vrot.slane %v1096_v43, %v1000_v58  ;;  %v1121_v47 = vrot.slane %v1096_v43, %v1004_v3 }
 0x22e   :  { %v1125_v48 = vrot.slane %v1096_v43, %v1008_v7  ;;  %v1129_v49 = vrot.slane %v1096_v43, %v1012_v13  ;;  %v1133_v35 = vrot.slane %v1096_v43, %v1016_v59  ;;  %v1137_v51 = vrot.slane %v1096_v43, %v1020_v60 }
 0x22f   :  { %v1146_v42 = vadd.f32 %v1109_v34, %v1097_v27  ;;  %v1147_v52 = vadd.f32 %v1113_v39, %v1098_v28  ;;  %v1148_v53 = vadd.f32 %v1117_v44, %v1099_v50  ;;  %v1149_v54 = vadd.f32 %v1121_v47, %v1100_v10 }
 0x230   :  { %v1150_v56 = vadd.f32 %v1125_v48, %v1101_v22  ;;  %v1151_v61 = vadd.f32 %v1129_v49, %v1102_v46  ;;  %v1152_v0 = vadd.f32 %v1133_v35, %v1103_v14  ;;  %v1153_v62 = vadd.f32 %v1137_v51, %v1104_v30 }
 0x231   :  { %v1154_v63 = vmax.f32 %v1146_v42, 0.0  ;;  %v1155_v4 = vmax.f32 %v1147_v52, 0.0  ;;  %v1156_v5 = vmax.f32 %v1148_v53, 0.0  ;;  %v1157_v8 = vmax.f32 %v1149_v54, 0.0 }
 0x232   :  { %v1158_v9 = vmax.f32 %v1150_v56, 0.0  ;;  %v1159_v12 = vmax.f32 %v1151_v61, 0.0  ;;  %v1160_v58 = vmax.f32 %v1152_v0, 0.0  ;;  %v1161_v3 = vmax.f32 %v1153_v62, 0.0 }
 0x233   :  { %v4512_v7 = vpack.c.bf16 %v1154_v63, %v1154_v63  ;;  %v4514_v13 = vpack.c.bf16 %v1155_v4, %v1155_v4  ;;  %v4516_v59 = vpack.c.bf16 %v1156_v5, %v1156_v5  ;;  %v4518_v60 = vpack.c.bf16 %v1157_v8, %v1157_v8 }
 0x234   :  { %v4520_v16 = vpack.c.bf16 %v1158_v9, %v1158_v9  ;;  %v4522_v17 = vpack.c.bf16 %v1159_v12, %v1159_v12  ;;  %v4524_v18 = vpack.c.bf16 %v1160_v58, %v1160_v58  ;;  %v4526_v19 = vpack.c.bf16 %v1161_v3, %v1161_v3 }
 0x235   :  { %4102 = dma.done.wait [#allocation5], 16384 }
 0x236   :  { %4103 = vsyncadd [#allocation5], 4294950912  ;;  %1414 = vmatprep.mubr.bf16.mxu0 %v4518_v60  ;;  %1373 = vmatprep.mubr.bf16.mxu1 %v4514_v13  ;;  %1194 = sst [smem:[#allocation27]] %s4129_s15  ;;  %s4138_s0 = smov [#allocation2 + $0x400]  }
 0x237   :  { %1196 = sst [smem:[#allocation27 + $0x1]] %s4129_s15  ;;  %s4532_s26 = sshll.u32 %s4138_s0, 4  ;;  %s1191_s26 = int_to_ptr.vmem [resolvable:$true] %s4532_s26 }
 0x238   :  { %1198 = sst [smem:[#allocation27 + $0x2]] %s4130_s17  ;;  %s1176_s22 = scalar_lea.hbm %s4723_s4, 16384 }
 0x239   :  { %1200 = sst [smem:[#allocation27 + $0x3]] %s4118_s8  ;;  %s4139_s9 = smov [#allocation5 + $0x1]  }
 0x23a   :  { %1202 = sst [smem:[#allocation27 + $0x4]] %s4131_s19  ;;  %s4140_s27 = smov [#allocation26]  }
 0x23b   :  { %1204 = sst [smem:[#allocation27 + $0x5]] %s4130_s17 }
 0x23c   :  { %1206 = sst [smem:[#allocation27 + $0x6]] %s4131_s19 }
 0x23d   :  { %1208 = sst [smem:[#allocation27 + $0x7]] %s4118_s8 }
 0x23e   :  { %1210 = sst [smem:[#allocation27 + $0x8]] %s4119_s28 }
 0x23f   :  { %1212 = dma.general %s1176_s22, 16384, %s1191_s26, %s4139_s9, %s4140_s27, [#allocation27], %s4339_s5, 0  }
 0x240   :  { %v1246_v32 = vld [vmem:[#allocation2 + $0x108] sm:$0xff]  ;;  %v1245_v20 = vld [vmem:[#allocation2 + $0x100] sm:$0xff]  ;;  %v1248_v21 = vld [vmem:[#allocation2 + $0x118] sm:$0xff] }
 0x241   :  { %1382 = vmatprep.subr.bf16.mxu0 %v1246_v32  ;;  %v1247_v24 = vld [vmem:[#allocation2 + $0x110] sm:$0xff]  ;;  %v1250_v25 = vld [vmem:[#allocation2 + $0x128] sm:$0xff]  ;;  %v1249_v26 = vld [vmem:[#allocation2 + $0x120] sm:$0xff] }
 0x242   :  { %1383 = vmatpush1.bf16.msra.mxu0 %v1245_v20  ;;  %v1252_v27 = vld [vmem:[#allocation2 + $0x138] sm:$0xff]  ;;  %v1251_v28 = vld [vmem:[#allocation2 + $0x130] sm:$0xff]  ;;  %v1254_v29 = vld [vmem:[#allocation2 + $0x148] sm:$0xff] }
 0x243   :  { %1384 = vmatprep.subr.bf16.mxu0 %v1248_v21  ;;  %v1253_v45 = vld [vmem:[#allocation2 + $0x140] sm:$0xff]  ;;  %v1256_v50 = vld [vmem:[#allocation2 + $0x158] sm:$0xff]  ;;  %v1255_v10 = vld [vmem:[#allocation2 + $0x150] sm:$0xff] }
 0x244   :  { %v1258_v15 = vld [vmem:[#allocation2 + $0x168] sm:$0xff]  ;;  %v1213_v22 = vld [vmem:[#allocation2] sm:$0xff]  ;;  %v1216_v46 = vld [vmem:[#allocation2 + $0x18] sm:$0xff] }
 0x245   :  { %v1214_v6 = vld [vmem:[#allocation2 + $0x8] sm:$0xff]  ;;  %v1257_v23 = vld [vmem:[#allocation2 + $0x160] sm:$0xff]  ;;  %v1260_v11 = vld [vmem:[#allocation2 + $0x178] sm:$0xff] }
 0x246   :  { %1385 = vmatpush1.bf16.msra.mxu0 %v1247_v24  ;;  %1341 = vmatprep.subr.bf16.mxu1 %v1214_v6  ;;  %v1215_v14 = vld [vmem:[#allocation2 + $0x10] sm:$0xff]  ;;  %v1218_v30 = vld [vmem:[#allocation2 + $0x28] sm:$0xff]  ;;  %v1217_v40 = vld [vmem:[#allocation2 + $0x20] sm:$0xff] }
 0x247   :  { %1386 = vmatprep.subr.bf16.mxu0 %v1250_v25  ;;  %1342 = vmatpush1.bf16.msra.mxu1 %v1213_v22  ;;  %v1259_v31 = vld [vmem:[#allocation2 + $0x170] sm:$0xff]  ;;  %v1262_v33 = vld [vmem:[#allocation2 + $0x188] sm:$0xff]  ;;  %v1220_v36 = vld [vmem:[#allocation2 + $0x38] sm:$0xff] }
 0x248   :  { %1343 = vmatprep.subr.bf16.mxu1 %v1216_v46  ;;  %v1261_v38 = vld [vmem:[#allocation2 + $0x180] sm:$0xff]  ;;  %v1264_v41 = vld [vmem:[#allocation2 + $0x198] sm:$0xff]  ;;  %v1219_v43 = vld [vmem:[#allocation2 + $0x30] sm:$0xff] }
 0x249   :  { %v1222_v34 = vld [vmem:[#allocation2 + $0x48] sm:$0xff]  ;;  %v1263_v39 = vld [vmem:[#allocation2 + $0x190] sm:$0xff]  ;;  %v1221_v47 = vld [vmem:[#allocation2 + $0x40] sm:$0xff] }
 0x24a   :  { %1387 = vmatpush1.bf16.msra.mxu0 %v1249_v26  ;;  %v1266_v44 = vld [vmem:[#allocation2 + $0x1a8] sm:$0xff]  ;;  %v1224_v48 = vld [vmem:[#allocation2 + $0x58] sm:$0xff]  ;;  %v1265_v49 = vld [vmem:[#allocation2 + $0x1a0] sm:$0xff] }
 0x24b   :  { %1388 = vmatprep.subr.bf16.mxu0 %v1252_v27  ;;  %1344 = vmatpush1.bf16.msra.mxu1 %v1215_v14  ;;  %v1268_v35 = vld [vmem:[#allocation2 + $0x1b8] sm:$0xff]  ;;  %v1223_v51 = vld [vmem:[#allocation2 + $0x50] sm:$0xff]  ;;  %v1226_v42 = vld [vmem:[#allocation2 + $0x68] sm:$0xff] }
 0x24c   :  { %1345 = vmatprep.subr.bf16.mxu1 %v1218_v30  ;;  %v1267_v52 = vld [vmem:[#allocation2 + $0x1b0] sm:$0xff]  ;;  %v1270_v53 = vld [vmem:[#allocation2 + $0x1c8] sm:$0xff]  ;;  %v1225_v54 = vld [vmem:[#allocation2 + $0x60] sm:$0xff] }
 0x24d   :  { %v1228_v56 = vld [vmem:[#allocation2 + $0x78] sm:$0xff]  ;;  %v1269_v61 = vld [vmem:[#allocation2 + $0x1c0] sm:$0xff]  ;;  %v1227_v62 = vld [vmem:[#allocation2 + $0x70] sm:$0xff] }
 0x24e   :  { %1389 = vmatpush1.bf16.msra.mxu0 %v1251_v28  ;;  %v1272_v0 = vld [vmem:[#allocation2 + $0x1d8] sm:$0xff]  ;;  %v1230_v63 = vld [vmem:[#allocation2 + $0x88] sm:$0xff]  ;;  %v1271_v4 = vld [vmem:[#allocation2 + $0x1d0] sm:$0xff] }
 0x24f   :  { %1390 = vmatprep.subr.bf16.mxu0 %v1254_v29  ;;  %1346 = vmatpush1.bf16.msra.mxu1 %v1217_v40  ;;  %v1274_v5 = vld [vmem:[#allocation2 + $0x1e8] sm:$0xff]  ;;  %v1229_v8 = vld [vmem:[#allocation2 + $0x80] sm:$0xff]  ;;  %v1232_v9 = vld [vmem:[#allocation2 + $0x98] sm:$0xff] }
 0x250   :  { %1347 = vmatprep.subr.bf16.mxu1 %v1220_v36  ;;  %v1273_v12 = vld [vmem:[#allocation2 + $0x1e0] sm:$0xff]  ;;  %v1276_v58 = vld [vmem:[#allocation2 + $0x1f8] sm:$0xff]  ;;  %v1231_v3 = vld [vmem:[#allocation2 + $0x90] sm:$0xff] }
 0x251   :  { %v1234_v32 = vld [vmem:[#allocation2 + $0xa8] sm:$0xff]  ;;  %v1275_v20 = vld [vmem:[#allocation2 + $0x1f0] sm:$0xff]  ;;  %v1233_v24 = vld [vmem:[#allocation2 + $0xa0] sm:$0xff] }
 0x252   :  { %1391 = vmatpush1.bf16.msra.mxu0 %v1253_v45  ;;  %v1278_v21 = vld [vmem:[#allocation2 + $0x208] sm:$0xff]  ;;  %v1236_v25 = vld [vmem:[#allocation2 + $0xb8] sm:$0xff]  ;;  %v1277_v26 = vld [vmem:[#allocation2 + $0x200] sm:$0xff] }
 0x253   :  { %1392 = vmatprep.subr.bf16.mxu0 %v1256_v50  ;;  %1348 = vmatpush1.bf16.msra.mxu1 %v1219_v43  ;;  %v1280_v27 = vld [vmem:[#allocation2 + $0x218] sm:$0xff]  ;;  %v1235_v28 = vld [vmem:[#allocation2 + $0xb0] sm:$0xff]  ;;  %v1238_v29 = vld [vmem:[#allocation2 + $0xc8] sm:$0xff] }
 0x254   :  { %1349 = vmatprep.subr.bf16.mxu1 %v1222_v34  ;;  %v1279_v45 = vld [vmem:[#allocation2 + $0x210] sm:$0xff]  ;;  %v1282_v50 = vld [vmem:[#allocation2 + $0x228] sm:$0xff]  ;;  %v1281_v6 = vld [vmem:[#allocation2 + $0x220] sm:$0xff] }
 0x255   :  { %v1284_v22 = vld [vmem:[#allocation2 + $0x238] sm:$0xff]  ;;  %v1239_v46 = vld [vmem:[#allocation2 + $0xd0] sm:$0xff]  ;;  %v1286_v14 = vld [vmem:[#allocation2 + $0x248] sm:$0xff] }
 0x256   :  { %1393 = vmatpush1.bf16.msra.mxu0 %v1255_v10  ;;  %v1237_v10 = vld [vmem:[#allocation2 + $0xc0] sm:$0xff]  ;;  %v1288_v40 = vld [vmem:[#allocation2 + $0x258] sm:$0xff]  ;;  %v1243_v36 = vld [vmem:[#allocation2 + $0xf0] sm:$0xff] }
 0x257   :  { %1394 = vmatprep.subr.bf16.mxu0 %v1258_v15  ;;  %1350 = vmatpush1.bf16.msra.mxu1 %v1221_v47  ;;  %v1240_v15 = vld [vmem:[#allocation2 + $0xd8] sm:$0xff]  ;;  %v1241_v30 = vld [vmem:[#allocation2 + $0xe0] sm:$0xff] }
 0x258   :  { %1351 = vmatprep.subr.bf16.mxu1 %v1224_v48  ;;  %v1289_v43 = vld [vmem:[#allocation2 + $0x260] sm:$0xff]  ;;  %v1292_v34 = vld [vmem:[#allocation2 + $0x278] sm:$0xff] }
 0x259   :  { %v1293_v47 = vld [vmem:[#allocation2 + $0x280] sm:$0xff]  ;;  %v1296_v48 = vld [vmem:[#allocation2 + $0x298] sm:$0xff] }
 0x25a   :  { %1395 = vmatpush1.bf16.msra.mxu0 %v1257_v23  ;;  %v1242_v23 = vld [vmem:[#allocation2 + $0xe8] sm:$0xff] }
 0x25b   :  { %1396 = vmatprep.subr.bf16.mxu0 %v1260_v11  ;;  %1352 = vmatpush1.bf16.msra.mxu1 %v1223_v51  ;;  %v1283_v11 = vld [vmem:[#allocation2 + $0x230] sm:$0xff]  ;;  %v1297_v51 = vld [vmem:[#allocation2 + $0x2a0] sm:$0xff] }
 0x25c   :  { %1353 = vmatprep.subr.bf16.mxu1 %v1226_v42  ;;  %v1300_v42 = vld [vmem:[#allocation2 + $0x2b8] sm:$0xff] }
 0x25e   :  { %1397 = vmatpush1.bf16.msra.mxu0 %v1259_v31  ;;  %v1244_v31 = vld [vmem:[#allocation2 + $0xf8] sm:$0xff] }
 0x25f   :  { %1398 = vmatprep.subr.bf16.mxu0 %v1262_v33  ;;  %1354 = vmatpush1.bf16.msra.mxu1 %v1225_v54  ;;  %v1285_v33 = vld [vmem:[#allocation2 + $0x240] sm:$0xff] }
 0x260   :  { %1355 = vmatprep.subr.bf16.mxu1 %v1228_v56  ;;  %v1301_v54 = vld [vmem:[#allocation2 + $0x2c0] sm:$0xff]  ;;  %v1304_v56 = vld [vmem:[#allocation2 + $0x2d8] sm:$0xff] }
 0x262   :  { %1399 = vmatpush1.bf16.msra.mxu0 %v1261_v38  ;;  %v1287_v38 = vld [vmem:[#allocation2 + $0x250] sm:$0xff] }
 0x263   :  { %1400 = vmatprep.subr.bf16.mxu0 %v1264_v41  ;;  %1356 = vmatpush1.bf16.msra.mxu1 %v1227_v62  ;;  %v1290_v41 = vld [vmem:[#allocation2 + $0x268] sm:$0xff]  ;;  %v1305_v62 = vld [vmem:[#allocation2 + $0x2e0] sm:$0xff] }
 0x264   :  { %1357 = vmatprep.subr.bf16.mxu1 %v1230_v63  ;;  %v1308_v63 = vld [vmem:[#allocation2 + $0x2f8] sm:$0xff] }
 0x266   :  { %1401 = vmatpush1.bf16.msra.mxu0 %v1263_v39  ;;  %v1291_v39 = vld [vmem:[#allocation2 + $0x270] sm:$0xff] }
 0x267   :  { %1402 = vmatprep.subr.bf16.mxu0 %v1266_v44  ;;  %1358 = vmatpush1.bf16.msra.mxu1 %v1229_v8  ;;  %v1294_v44 = vld [vmem:[#allocation2 + $0x288] sm:$0xff]  ;;  %v1309_v8 = vld [vmem:[#allocation2 + $0x300] sm:$0xff] }
 0x268   :  { %1359 = vmatprep.subr.bf16.mxu1 %v1232_v9  ;;  %v1312_v9 = vld [vmem:[#allocation2 + $0x318] sm:$0xff] }
 0x26a   :  { %1403 = vmatpush1.bf16.msra.mxu0 %v1265_v49  ;;  %v1295_v49 = vld [vmem:[#allocation2 + $0x290] sm:$0xff] }
 0x26b   :  { %1404 = vmatprep.subr.bf16.mxu0 %v1268_v35  ;;  %1360 = vmatpush1.bf16.msra.mxu1 %v1231_v3  ;;  %v1298_v35 = vld [vmem:[#allocation2 + $0x2a8] sm:$0xff]  ;;  %v1313_v3 = vld [vmem:[#allocation2 + $0x320] sm:$0xff] }
 0x26c   :  { %1361 = vmatprep.subr.bf16.mxu1 %v1234_v32  ;;  %v1316_v32 = vld [vmem:[#allocation2 + $0x338] sm:$0xff] }
 0x26e   :  { %1405 = vmatpush1.bf16.msra.mxu0 %v1267_v52  ;;  %v1299_v52 = vld [vmem:[#allocation2 + $0x2b0] sm:$0xff] }
 0x26f   :  { %1406 = vmatprep.subr.bf16.mxu0 %v1270_v53  ;;  %1362 = vmatpush1.bf16.msra.mxu1 %v1233_v24  ;;  %v1302_v53 = vld [vmem:[#allocation2 + $0x2c8] sm:$0xff]  ;;  %v1317_v24 = vld [vmem:[#allocation2 + $0x340] sm:$0xff] }
 0x270   :  { %1363 = vmatprep.subr.bf16.mxu1 %v1236_v25  ;;  %v1320_v25 = vld [vmem:[#allocation2 + $0x358] sm:$0xff] }
 0x272   :  { %1407 = vmatpush1.bf16.msra.mxu0 %v1269_v61  ;;  %v1303_v61 = vld [vmem:[#allocation2 + $0x2d0] sm:$0xff] }
 0x273   :  { %1408 = vmatprep.subr.bf16.mxu0 %v1272_v0  ;;  %1364 = vmatpush1.bf16.msra.mxu1 %v1235_v28  ;;  %v1306_v0 = vld [vmem:[#allocation2 + $0x2e8] sm:$0xff]  ;;  %v1321_v28 = vld [vmem:[#allocation2 + $0x360] sm:$0xff] }
 0x274   :  { %1365 = vmatprep.subr.bf16.mxu1 %v1238_v29  ;;  %v1324_v29 = vld [vmem:[#allocation2 + $0x378] sm:$0xff] }
 0x276   :  { %1409 = vmatpush1.bf16.msra.mxu0 %v1271_v4  ;;  %v1307_v4 = vld [vmem:[#allocation2 + $0x2f0] sm:$0xff] }
 0x277   :  { %1410 = vmatprep.subr.bf16.mxu0 %v1274_v5  ;;  %1366 = vmatpush1.bf16.msra.mxu1 %v1237_v10  ;;  %v1310_v5 = vld [vmem:[#allocation2 + $0x308] sm:$0xff]  ;;  %v1325_v10 = vld [vmem:[#allocation2 + $0x380] sm:$0xff] }
 0x278   :  { %1367 = vmatprep.subr.bf16.mxu1 %v1240_v15  ;;  %v1328_v15 = vld [vmem:[#allocation2 + $0x398] sm:$0xff] }
 0x27a   :  { %1411 = vmatpush1.bf16.msra.mxu0 %v1273_v12  ;;  %v1311_v12 = vld [vmem:[#allocation2 + $0x310] sm:$0xff] }
 0x27b   :  { %1412 = vmatprep.subr.bf16.mxu0 %v1276_v58  ;;  %1368 = vmatpush1.bf16.msra.mxu1 %v1239_v46  ;;  %v1314_v58 = vld [vmem:[#allocation2 + $0x328] sm:$0xff]  ;;  %v1329_v46 = vld [vmem:[#allocation2 + $0x3a0] sm:$0xff] }
 0x27c   :  { %1369 = vmatprep.subr.bf16.mxu1 %v1242_v23  ;;  %v1332_v23 = vld [vmem:[#allocation2 + $0x3b8] sm:$0xff] }
 0x27e   :  { %1413 = vmatpush1.bf16.msra.mxu0 %v1275_v20  ;;  %v1315_v20 = vld [vmem:[#allocation2 + $0x330] sm:$0xff] }
 0x27f   :  { %1423 = vmatprep.subr.bf16.mxu0 %v1278_v21  ;;  %1370 = vmatpush1.bf16.msra.mxu1 %v1241_v30  ;;  %v1318_v21 = vld [vmem:[#allocation2 + $0x348] sm:$0xff]  ;;  %v1333_v30 = vld [vmem:[#allocation2 + $0x3c0] sm:$0xff] }
 0x280   :  { %1371 = vmatprep.subr.bf16.mxu1 %v1244_v31  ;;  %v1336_v31 = vld [vmem:[#allocation2 + $0x3d8] sm:$0xff] }
 0x281   :  { %1415 = vmatmul.mubr.bf16.vlgmr.msra.gmra.mrb[4].mxu0 %v4516_v59 }
 0x282   :  { %1424 = vmatpush1.bf16.msra.mxu0 %v1277_v26  ;;  %1455 = vmatprep.mubr.bf16.mxu0 %v4522_v17  ;;  %v1319_v26 = vld [vmem:[#allocation2 + $0x350] sm:$0xff] }
 0x283   :  { %1425 = vmatprep.subr.bf16.mxu0 %v1280_v27  ;;  %1372 = vmatpush1.bf16.msra.mxu1 %v1243_v36  ;;  %v1322_v27 = vld [vmem:[#allocation2 + $0x368] sm:$0xff]  ;;  %v1337_v36 = vld [vmem:[#allocation2 + $0x3e0] sm:$0xff] }
 0x286   :  { %1426 = vmatpush1.bf16.msra.mxu0 %v1279_v45  ;;  %1374 = vmatmul.mubr.bf16.vlgmr.msra.gmra.mrb[12].mxu1 %v4512_v7  ;;  %v1323_v45 = vld [vmem:[#allocation2 + $0x370] sm:$0xff] }
 0x287   :  { %1427 = vmatprep.subr.bf16.mxu0 %v1282_v50  ;;  %v1326_v50 = vld [vmem:[#allocation2 + $0x388] sm:$0xff] }
 0x28a   :  { %1428 = vmatpush1.bf16.msra.mxu0 %v1281_v6  ;;  %v1327_v6 = vld [vmem:[#allocation2 + $0x390] sm:$0xff] }
 0x28b   :  { %1429 = vmatprep.subr.bf16.mxu0 %v1284_v22  ;;  %v1330_v22 = vld [vmem:[#allocation2 + $0x3a8] sm:$0xff] }
 0x28e   :  { %1430 = vmatpush1.bf16.msra.mxu0 %v1283_v11  ;;  %v1331_v11 = vld [vmem:[#allocation2 + $0x3b0] sm:$0xff] }
 0x28f   :  { %1431 = vmatprep.subr.bf16.mxu0 %v1286_v14  ;;  %v1334_v14 = vld [vmem:[#allocation2 + $0x3c8] sm:$0xff] }
 0x292   :  { %1432 = vmatpush1.bf16.msra.mxu0 %v1285_v33  ;;  %v1335_v33 = vld [vmem:[#allocation2 + $0x3d0] sm:$0xff] }
 0x293   :  { %1433 = vmatprep.subr.bf16.mxu0 %v1288_v40  ;;  %v1338_v40 = vld [vmem:[#allocation2 + $0x3e8] sm:$0xff] }
 0x296   :  { %1434 = vmatpush1.bf16.msra.mxu0 %v1287_v38  ;;  %v1340_v38 = vld [vmem:[#allocation2 + $0x3f8] sm:$0xff] }
 0x297   :  { %1435 = vmatprep.subr.bf16.mxu0 %v1290_v41  ;;  %v1339_v41 = vld [vmem:[#allocation2 + $0x3f0] sm:$0xff] }
 0x29a   :  { %1436 = vmatpush1.bf16.msra.mxu0 %v1289_v43 }
 0x29b   :  { %1437 = vmatprep.subr.bf16.mxu0 %v1292_v34 }
 0x29e   :  { %1438 = vmatpush1.bf16.msra.mxu0 %v1291_v39 }
 0x29f   :  { %1439 = vmatprep.subr.bf16.mxu0 %v1294_v44 }
 0x2a2   :  { %1440 = vmatpush1.bf16.msra.mxu0 %v1293_v47 }
 0x2a3   :  { %1441 = vmatprep.subr.bf16.mxu0 %v1296_v48 }
 0x2a6   :  { %1442 = vmatpush1.bf16.msra.mxu0 %v1295_v49 }
 0x2a7   :  { %1443 = vmatprep.subr.bf16.mxu0 %v1298_v35 }
 0x2aa   :  { %1444 = vmatpush1.bf16.msra.mxu0 %v1297_v51 }
 0x2ab   :  { %1445 = vmatprep.subr.bf16.mxu0 %v1300_v42 }
 0x2ae   :  { %1446 = vmatpush1.bf16.msra.mxu0 %v1299_v52 }
 0x2af   :  { %1447 = vmatprep.subr.bf16.mxu0 %v1302_v53 }
 0x2b2   :  { %1448 = vmatpush1.bf16.msra.mxu0 %v1301_v54 }
 0x2b3   :  { %1449 = vmatprep.subr.bf16.mxu0 %v1304_v56 }
 0x2b6   :  { %1450 = vmatpush1.bf16.msra.mxu0 %v1303_v61 }
 0x2b7   :  { %1451 = vmatprep.subr.bf16.mxu0 %v1306_v0 }
 0x2ba   :  { %1452 = vmatpush1.bf16.msra.mxu0 %v1305_v62 }
 0x2bb   :  { %1453 = vmatprep.subr.bf16.mxu0 %v1308_v63 }
 0x2be   :  { %1454 = vmatpush1.bf16.msra.mxu0 %v1307_v4 }
 0x2bf   :  { %1464 = vmatprep.subr.bf16.mxu0 %v1310_v5 }
 0x2c1   :  { %1456 = vmatmul.mubr.bf16.vlgmr.msra.gmra.mrb[4].mxu0 %v4520_v16 }
 0x2c2   :  { %1465 = vmatpush1.bf16.msra.mxu0 %v1309_v8  ;;  %1496 = vmatprep.mubr.bf16.mxu0 %v4526_v19 }
 0x2c3   :  { %1466 = vmatprep.subr.bf16.mxu0 %v1312_v9 }
 0x2c6   :  { %1467 = vmatpush1.bf16.msra.mxu0 %v1311_v12 }
 0x2c7   :  { %1468 = vmatprep.subr.bf16.mxu0 %v1314_v58 }
 0x2ca   :  { %1469 = vmatpush1.bf16.msra.mxu0 %v1313_v3 }
 0x2cb   :  { %1470 = vmatprep.subr.bf16.mxu0 %v1316_v32 }
 0x2ce   :  { %1471 = vmatpush1.bf16.msra.mxu0 %v1315_v20 }
 0x2cf   :  { %1472 = vmatprep.subr.bf16.mxu0 %v1318_v21 }
 0x2d2   :  { %1473 = vmatpush1.bf16.msra.mxu0 %v1317_v24 }
 0x2d3   :  { %1474 = vmatprep.subr.bf16.mxu0 %v1320_v25 }
 0x2d6   :  { %1475 = vmatpush1.bf16.msra.mxu0 %v1319_v26 }
 0x2d7   :  { %1476 = vmatprep.subr.bf16.mxu0 %v1322_v27 }
 0x2da   :  { %1477 = vmatpush1.bf16.msra.mxu0 %v1321_v28 }
 0x2db   :  { %1478 = vmatprep.subr.bf16.mxu0 %v1324_v29 }
 0x2de   :  { %1479 = vmatpush1.bf16.msra.mxu0 %v1323_v45 }
 0x2df   :  { %1480 = vmatprep.subr.bf16.mxu0 %v1326_v50 }
 0x2e2   :  { %1481 = vmatpush1.bf16.msra.mxu0 %v1325_v10 }
 0x2e3   :  { %1482 = vmatprep.subr.bf16.mxu0 %v1328_v15 }
 0x2e6   :  { %1483 = vmatpush1.bf16.msra.mxu0 %v1327_v6 }
 0x2e7   :  { %1484 = vmatprep.subr.bf16.mxu0 %v1330_v22 }
 0x2ea   :  { %1485 = vmatpush1.bf16.msra.mxu0 %v1329_v46 }
 0x2eb   :  { %1486 = vmatprep.subr.bf16.mxu0 %v1332_v23 }
 0x2ee   :  { %1487 = vmatpush1.bf16.msra.mxu0 %v1331_v11 }
 0x2ef   :  { %1488 = vmatprep.subr.bf16.mxu0 %v1334_v14 }
 0x2f2   :  { %1489 = vmatpush1.bf16.msra.mxu0 %v1333_v30 }
 0x2f3   :  { %1490 = vmatprep.subr.bf16.mxu0 %v1336_v31 }
 0x2f6   :  { %1491 = vmatpush1.bf16.msra.mxu0 %v1335_v33 }
 0x2f7   :  { %1492 = vmatprep.subr.bf16.mxu0 %v1338_v40 }
 0x2fa   :  { %1493 = vmatpush1.bf16.msra.mxu0 %v1337_v36 }
 0x2fb   :  { %1494 = vmatprep.subr.bf16.mxu0 %v1340_v38 }
 0x2fe   :  { %1495 = vmatpush1.bf16.msra.mxu0 %v1339_v41 }
 0x301   :  { %1497 = vmatmul.mubr.bf16.vlgmr.msra.gmra.mrb[4].mxu0 %v4524_v18 }
 0x359   :  { %v1375_v43 = vpop.f32.mrb[12].mxu1 }
 0x35a   :  { %v1377_v34 = vpop.f32.mrb[13].mxu1 }
 0x35b   :  { %v1379_v39 = vpop.f32.mrb[14].mxu1 }
 0x35c   :  { %v1380_v44 = vpop.f32.mrb[15].mxu1 }
 0x3d4   :  { %v1498_v47 = vpop.f32.mrb[4].mxu0 }
 0x3d5   :  { %v3732_v48 = vadd.f32 %v1498_v47, %v1375_v43  ;;  %v1500_v49 = vpop.f32.mrb[5].mxu0 }
 0x3d6   :  { %v3733_v35 = vadd.f32 %v1500_v49, %v1377_v34  ;;  %v1502_v51 = vpop.f32.mrb[6].mxu0 }
 0x3d7   :  { %v1505_v42 = vrot.slane %v3732_v48, 4  ;;  %v1519_v52 = vmul.f32 %v3732_v48, %v3732_v48  ;;  %v1503_v53 = vpop.f32.mrb[7].mxu0 }
 0x3d8   :  { %v1511_v54 = vrot.slane %v3733_v35, 4  ;;  %v1520_v56 = vmul.f32 %v3733_v35, %v3733_v35 }
 0x3d9   :  { %v1506_v61 = vadd.f32 %v3732_v48, %v1505_v42  ;;  %v1521_v0 = vrot.slane %v1519_v52, 4 }
 0x3da   :  { %v1512_v62 = vadd.f32 %v3733_v35, %v1511_v54  ;;  %v1527_v63 = vrot.slane %v1520_v56, 4 }
 0x3db   :  { %v1507_v4 = vrot.slane %v1506_v61, 2  ;;  %v1522_v5 = vadd.f32 %v1521_v0, %v1519_v52 }
 0x3dc   :  { %v1513_v8 = vrot.slane %v1512_v62, 2  ;;  %v1528_v9 = vadd.f32 %v1527_v63, %v1520_v56 }
 0x3dd   :  { %v1508_v12 = vadd.f32 %v1507_v4, %v1506_v61  ;;  %v1523_v58 = vrot.slane %v1522_v5, 2 }
 0x3de   :  { %v1514_v3 = vadd.f32 %v1513_v8, %v1512_v62  ;;  %v1529_v32 = vrot.slane %v1528_v9, 2 }
 0x3df   :  { %v1509_v20 = vrot.slane %v1508_v12, 1  ;;  %v1524_v21 = vadd.f32 %v1523_v58, %v1522_v5 }
 0x3e0   :  { %v1515_v24 = vrot.slane %v1514_v3, 1  ;;  %v1530_v25 = vadd.f32 %v1529_v32, %v1528_v9 }
 0x3e1   :  { %v1510_v26 = vadd.f32 %v1509_v20, %v1508_v12  ;;  %v1525_v27 = vrot.slane %v1524_v21, 1 }
 0x3e2   :  { %v1516_v28 = vadd.f32 %v1515_v24, %v1514_v3  ;;  %v1531_v29 = vrot.slane %v1530_v25, 1 }
 0x3e3   :  { %v1517_v45 = vmul.f32 0.125, %v1510_v26  ;;  %v1526_v50 = vadd.f32 %v1525_v27, %v1524_v21 }
 0x3e4   :  { %v1518_v10 = vmul.f32 0.125, %v1516_v28  ;;  %v1532_v15 = vadd.f32 %v1531_v29, %v1530_v25 }
 0x3e5   :  { %v1533_v6 = vmul.f32 0.125, %v1526_v50  ;;  %v1535_v22 = vmul.f32 %v1517_v45, %v1517_v45 }
 0x3e6   :  { %v1534_v46 = vmul.f32 0.125, %v1532_v15  ;;  %v1536_v23 = vmul.f32 %v1518_v10, %v1518_v10 }
 0x3e7   :  { %v1537_v11 = vsub.f32 %v1533_v6, %v1535_v22 }
 0x3e8   :  { %v1538_v14 = vsub.f32 %v1534_v46, %v1536_v23 }
 0x3e9   :  { %v1539_v30 = vmax.f32 %v1537_v11, 0.0 }
 0x3ea   :  { %v1540_v31 = vmax.f32 %v1538_v14, 0.0 }
 0x3eb   :  { %v1541_v33 = vadd.f32 1e-05, %v1539_v30 }
 0x3ec   :  { %v1542_v40 = vadd.f32 1e-05, %v1540_v31 }
 0x3ed   :  { %3836 = vrsqrt.f32 %v1541_v33 }
 0x3ee   :  { %3838 = vrsqrt.f32 %v1542_v40 }
 0x3f7   :  { %v3837_v36 = vpop.eup %3836 }
 0x3f8   :  { %v3839_v38 = vpop.eup %3838 }
 0x3f9   :  { %v1547_v41 = vcombine.low %v3837_v36, %v3839_v38 }
 0x3fb   :  { %v1554_v43 = vrot.slane %v1547_v41, %v4455_v37 }
 0x3fd   :  { %v1561_v34 = vrot.slane %v1554_v43, %v4455_v37 }
 0x3ff   :  { %v1563_v39 = vmul.f32 %v1561_v34, %v4363_v1 }
 0x401   :  { %v1568_v44 = vrot.slane %v1563_v39, %v4477_v55  ;;  %v1572_v47 = vrot.slane %v1563_v39, %v4480_v57 }
 0x403   :  { %v1575_v49 = vmul.f32 %v1568_v44, %v1517_v45  ;;  %v1576_v51 = vmul.f32 %v1572_v47, %v1518_v10  ;;  %v1596_v42 = vmul.f32 %v3732_v48, %v1568_v44  ;;  %v1597_v52 = vmul.f32 %v3733_v35, %v1572_v47 }
 0x405   :  { %v1579_v53 = vcombine.low %v1575_v49, %v1576_v51 }
 0x407   :  { %v1586_v54 = vrot.slane %v1579_v53, %v4455_v37 }
 0x409   :  { %v1593_v56 = vrot.slane %v1586_v54, %v4455_v37 }
 0x40b   :  { %v1595_v61 = vsub.f32 %v4365_v2, %v1593_v56 }
 0x40d   :  { %v1602_v0 = vrot.slane %v1595_v61, %v4477_v55  ;;  %v1606_v62 = vrot.slane %v1595_v61, %v4480_v57 }
 0x40f   :  { %v4565_v63 = vadd.f32 %v1602_v0, %v1596_v42  ;;  %v4567_v4 = vadd.f32 %v1606_v62, %v1597_v52 }
 0x411   :  { %v1611_v5 = vmax.f32 %v4565_v63, 0.0  ;;  %v1612_v48 = vmax.f32 %v4567_v4, 0.0 }
 0x412   :  { %4104 = dma.done.wait [#allocation5 + $0x1], 16384 }
 0x413   :  { %4105 = vsyncadd [#allocation5 + $0x1], 4294950912  ;;  %1819 = vmatprep.mubr.bf16.mxu1 %v4514_v13  ;;  %1640 = sst [smem:[#allocation29]] %s4129_s15  ;;  %s1624_s18 = scalar_lea.hbm %s4723_s4, 32768 }
 0x414   :  { %1642 = sst [smem:[#allocation29 + $0x1]] %s4129_s15  ;;  %s4141_s16 = smov [#allocation28]  }
 0x415   :  { %1644 = sst [smem:[#allocation29 + $0x2]] %s4130_s17 }
 0x416   :  { %1646 = sst [smem:[#allocation29 + $0x3]] %s4118_s8 }
 0x417   :  { %1648 = sst [smem:[#allocation29 + $0x4]] %s4131_s19 }
 0x418   :  { %1650 = sst [smem:[#allocation29 + $0x5]] %s4130_s17 }
 0x419   :  { %1652 = sst [smem:[#allocation29 + $0x6]] %s4131_s19 }
 0x41a   :  { %1654 = sst [smem:[#allocation29 + $0x7]] %s4118_s8 }
 0x41b   :  { %1656 = sst [smem:[#allocation29 + $0x8]] %s4119_s28 }
 0x41c   :  { %1658 = dma.general %s1624_s18, 16384, %s160_s14, %s4132_s1, %s4141_s16, [#allocation29], %s4339_s5, 0  }
 0x41d   :  { %v1660_v35 = vld [vmem:[#allocation2 + $0x408] sm:$0xff]  ;;  %v1659_v8 = vld [vmem:[#allocation2 + $0x400] sm:$0xff]  ;;  %v1662_v9 = vld [vmem:[#allocation2 + $0x418] sm:$0xff] }
 0x41e   :  { %1787 = vmatprep.subr.bf16.mxu1 %v1660_v35  ;;  %v1661_v12 = vld [vmem:[#allocation2 + $0x410] sm:$0xff]  ;;  %v1664_v58 = vld [vmem:[#allocation2 + $0x428] sm:$0xff]  ;;  %v1663_v3 = vld [vmem:[#allocation2 + $0x420] sm:$0xff] }
 0x41f   :  { %1788 = vmatpush1.bf16.msra.mxu1 %v1659_v8  ;;  %v1666_v32 = vld [vmem:[#allocation2 + $0x438] sm:$0xff]  ;;  %v1665_v20 = vld [vmem:[#allocation2 + $0x430] sm:$0xff]  ;;  %v1668_v21 = vld [vmem:[#allocation2 + $0x448] sm:$0xff] }
 0x420   :  { %1789 = vmatprep.subr.bf16.mxu1 %v1662_v9  ;;  %v1667_v24 = vld [vmem:[#allocation2 + $0x440] sm:$0xff]  ;;  %v1670_v25 = vld [vmem:[#allocation2 + $0x458] sm:$0xff]  ;;  %v1669_v26 = vld [vmem:[#allocation2 + $0x450] sm:$0xff] }
 0x421   :  { %v1672_v27 = vld [vmem:[#allocation2 + $0x468] sm:$0xff]  ;;  %v1671_v28 = vld [vmem:[#allocation2 + $0x460] sm:$0xff]  ;;  %v1674_v29 = vld [vmem:[#allocation2 + $0x478] sm:$0xff] }
 0x422   :  { %v1673_v45 = vld [vmem:[#allocation2 + $0x470] sm:$0xff]  ;;  %v1676_v50 = vld [vmem:[#allocation2 + $0x488] sm:$0xff]  ;;  %v1675_v10 = vld [vmem:[#allocation2 + $0x480] sm:$0xff] }
 0x423   :  { %1790 = vmatpush1.bf16.msra.mxu1 %v1661_v12  ;;  %v1678_v15 = vld [vmem:[#allocation2 + $0x498] sm:$0xff]  ;;  %v1677_v6 = vld [vmem:[#allocation2 + $0x490] sm:$0xff]  ;;  %v1680_v22 = vld [vmem:[#allocation2 + $0x4a8] sm:$0xff] }
 0x424   :  { %1791 = vmatprep.subr.bf16.mxu1 %v1664_v58  ;;  %v1679_v46 = vld [vmem:[#allocation2 + $0x4a0] sm:$0xff]  ;;  %v1682_v23 = vld [vmem:[#allocation2 + $0x4b8] sm:$0xff]  ;;  %v1681_v11 = vld [vmem:[#allocation2 + $0x4b0] sm:$0xff] }
 0x425   :  { %v1684_v14 = vld [vmem:[#allocation2 + $0x4c8] sm:$0xff]  ;;  %v1683_v30 = vld [vmem:[#allocation2 + $0x4c0] sm:$0xff]  ;;  %v1686_v31 = vld [vmem:[#allocation2 + $0x4d8] sm:$0xff] }
 0x426   :  { %v1685_v33 = vld [vmem:[#allocation2 + $0x4d0] sm:$0xff]  ;;  %v1688_v40 = vld [vmem:[#allocation2 + $0x4e8] sm:$0xff]  ;;  %v1687_v36 = vld [vmem:[#allocation2 + $0x4e0] sm:$0xff] }
 0x427   :  { %1792 = vmatpush1.bf16.msra.mxu1 %v1663_v3  ;;  %v1690_v38 = vld [vmem:[#allocation2 + $0x4f8] sm:$0xff]  ;;  %v1689_v41 = vld [vmem:[#allocation2 + $0x4f0] sm:$0xff]  ;;  %v1692_v43 = vld [vmem:[#allocation2 + $0x508] sm:$0xff] }
 0x428   :  { %1793 = vmatprep.subr.bf16.mxu1 %v1666_v32  ;;  %v1691_v34 = vld [vmem:[#allocation2 + $0x500] sm:$0xff]  ;;  %v1694_v39 = vld [vmem:[#allocation2 + $0x518] sm:$0xff]  ;;  %v1693_v44 = vld [vmem:[#allocation2 + $0x510] sm:$0xff] }
 0x429   :  { %v1696_v47 = vld [vmem:[#allocation2 + $0x528] sm:$0xff]  ;;  %v1695_v49 = vld [vmem:[#allocation2 + $0x520] sm:$0xff]  ;;  %v1698_v51 = vld [vmem:[#allocation2 + $0x538] sm:$0xff] }
 0x42a   :  { %v1697_v42 = vld [vmem:[#allocation2 + $0x530] sm:$0xff]  ;;  %v1700_v52 = vld [vmem:[#allocation2 + $0x548] sm:$0xff]  ;;  %v1699_v53 = vld [vmem:[#allocation2 + $0x540] sm:$0xff] }
 0x42b   :  { %1794 = vmatpush1.bf16.msra.mxu1 %v1665_v20  ;;  %v1702_v54 = vld [vmem:[#allocation2 + $0x558] sm:$0xff]  ;;  %v1701_v56 = vld [vmem:[#allocation2 + $0x550] sm:$0xff]  ;;  %v1704_v61 = vld [vmem:[#allocation2 + $0x568] sm:$0xff] }
 0x42c   :  { %1795 = vmatprep.subr.bf16.mxu1 %v1668_v21  ;;  %v1703_v0 = vld [vmem:[#allocation2 + $0x560] sm:$0xff]  ;;  %v1706_v62 = vld [vmem:[#allocation2 + $0x578] sm:$0xff]  ;;  %v1705_v35 = vld [vmem:[#allocation2 + $0x570] sm:$0xff] }
 0x42d   :  { %v1708_v8 = vld [vmem:[#allocation2 + $0x588] sm:$0xff]  ;;  %v1707_v9 = vld [vmem:[#allocation2 + $0x580] sm:$0xff]  ;;  %v1710_v12 = vld [vmem:[#allocation2 + $0x598] sm:$0xff] }
 0x42e   :  { %v1709_v58 = vld [vmem:[#allocation2 + $0x590] sm:$0xff]  ;;  %v1712_v3 = vld [vmem:[#allocation2 + $0x5a8] sm:$0xff]  ;;  %v1711_v32 = vld [vmem:[#allocation2 + $0x5a0] sm:$0xff] }
 0x42f   :  { %1796 = vmatpush1.bf16.msra.mxu1 %v1667_v24  ;;  %v1714_v20 = vld [vmem:[#allocation2 + $0x5b8] sm:$0xff]  ;;  %v1713_v21 = vld [vmem:[#allocation2 + $0x5b0] sm:$0xff]  ;;  %v1716_v24 = vld [vmem:[#allocation2 + $0x5c8] sm:$0xff] }
 0x430   :  { %1797 = vmatprep.subr.bf16.mxu1 %v1670_v25  ;;  %v1715_v25 = vld [vmem:[#allocation2 + $0x5c0] sm:$0xff] }
 0x433   :  { %1798 = vmatpush1.bf16.msra.mxu1 %v1669_v26  ;;  %v1718_v26 = vld [vmem:[#allocation2 + $0x5d8] sm:$0xff] }
 0x434   :  { %1799 = vmatprep.subr.bf16.mxu1 %v1672_v27  ;;  %v1717_v27 = vld [vmem:[#allocation2 + $0x5d0] sm:$0xff] }
 0x437   :  { %1800 = vmatpush1.bf16.msra.mxu1 %v1671_v28  ;;  %v1720_v28 = vld [vmem:[#allocation2 + $0x5e8] sm:$0xff] }
 0x438   :  { %1801 = vmatprep.subr.bf16.mxu1 %v1674_v29  ;;  %v1719_v29 = vld [vmem:[#allocation2 + $0x5e0] sm:$0xff] }
 0x43b   :  { %1802 = vmatpush1.bf16.msra.mxu1 %v1673_v45  ;;  %v1722_v45 = vld [vmem:[#allocation2 + $0x5f8] sm:$0xff] }
 0x43c   :  { %1803 = vmatprep.subr.bf16.mxu1 %v1676_v50  ;;  %v1721_v50 = vld [vmem:[#allocation2 + $0x5f0] sm:$0xff] }
 0x43f   :  { %1804 = vmatpush1.bf16.msra.mxu1 %v1675_v10  ;;  %v1724_v10 = vld [vmem:[#allocation2 + $0x608] sm:$0xff] }
 0x440   :  { %1805 = vmatprep.subr.bf16.mxu1 %v1678_v15  ;;  %v1723_v15 = vld [vmem:[#allocation2 + $0x600] sm:$0xff] }
 0x443   :  { %1806 = vmatpush1.bf16.msra.mxu1 %v1677_v6  ;;  %v1726_v6 = vld [vmem:[#allocation2 + $0x618] sm:$0xff] }
 0x444   :  { %1807 = vmatprep.subr.bf16.mxu1 %v1680_v22  ;;  %v1725_v22 = vld [vmem:[#allocation2 + $0x610] sm:$0xff] }
 0x447   :  { %1808 = vmatpush1.bf16.msra.mxu1 %v1679_v46  ;;  %v1728_v46 = vld [vmem:[#allocation2 + $0x628] sm:$0xff] }
 0x448   :  { %1809 = vmatprep.subr.bf16.mxu1 %v1682_v23  ;;  %v1727_v23 = vld [vmem:[#allocation2 + $0x620] sm:$0xff] }
 0x44b   :  { %1810 = vmatpush1.bf16.msra.mxu1 %v1681_v11  ;;  %v1730_v11 = vld [vmem:[#allocation2 + $0x638] sm:$0xff] }
 0x44c   :  { %1811 = vmatprep.subr.bf16.mxu1 %v1684_v14  ;;  %v1729_v14 = vld [vmem:[#allocation2 + $0x630] sm:$0xff] }
 0x44f   :  { %1812 = vmatpush1.bf16.msra.mxu1 %v1683_v30  ;;  %v1732_v30 = vld [vmem:[#allocation2 + $0x648] sm:$0xff] }
 0x450   :  { %1813 = vmatprep.subr.bf16.mxu1 %v1686_v31  ;;  %v1731_v31 = vld [vmem:[#allocation2 + $0x640] sm:$0xff] }
 0x453   :  { %1814 = vmatpush1.bf16.msra.mxu1 %v1685_v33  ;;  %v1734_v33 = vld [vmem:[#allocation2 + $0x658] sm:$0xff] }
 0x454   :  { %1815 = vmatprep.subr.bf16.mxu1 %v1688_v40  ;;  %v1733_v40 = vld [vmem:[#allocation2 + $0x650] sm:$0xff] }
 0x457   :  { %1816 = vmatpush1.bf16.msra.mxu1 %v1687_v36  ;;  %v1736_v36 = vld [vmem:[#allocation2 + $0x668] sm:$0xff] }
 0x458   :  { %1817 = vmatprep.subr.bf16.mxu1 %v1690_v38  ;;  %v1735_v38 = vld [vmem:[#allocation2 + $0x660] sm:$0xff] }
 0x45b   :  { %1818 = vmatpush1.bf16.msra.mxu1 %v1689_v41  ;;  %v1738_v41 = vld [vmem:[#allocation2 + $0x678] sm:$0xff] }
 0x45c   :  { %1828 = vmatprep.subr.bf16.mxu1 %v1692_v43  ;;  %v1737_v43 = vld [vmem:[#allocation2 + $0x670] sm:$0xff] }
 0x45e   :  { %1820 = vmatmul.mubr.bf16.vlgmr.msra.gmra.mrb[16].mxu1 %v4512_v7 }
 0x45f   :  { %1829 = vmatpush1.bf16.msra.mxu1 %v1691_v34  ;;  %1860 = vmatprep.mubr.bf16.mxu1 %v4518_v60  ;;  %v1740_v34 = vld [vmem:[#allocation2 + $0x688] sm:$0xff] }
 0x460   :  { %1830 = vmatprep.subr.bf16.mxu1 %v1694_v39  ;;  %v1739_v39 = vld [vmem:[#allocation2 + $0x680] sm:$0xff] }
 0x463   :  { %1831 = vmatpush1.bf16.msra.mxu1 %v1693_v44  ;;  %v1742_v44 = vld [vmem:[#allocation2 + $0x698] sm:$0xff] }
 0x464   :  { %1832 = vmatprep.subr.bf16.mxu1 %v1696_v47  ;;  %v1741_v47 = vld [vmem:[#allocation2 + $0x690] sm:$0xff] }
 0x467   :  { %1833 = vmatpush1.bf16.msra.mxu1 %v1695_v49  ;;  %v1744_v49 = vld [vmem:[#allocation2 + $0x6a8] sm:$0xff] }
 0x468   :  { %1834 = vmatprep.subr.bf16.mxu1 %v1698_v51  ;;  %v1743_v51 = vld [vmem:[#allocation2 + $0x6a0] sm:$0xff] }
 0x46b   :  { %1835 = vmatpush1.bf16.msra.mxu1 %v1697_v42  ;;  %v1746_v42 = vld [vmem:[#allocation2 + $0x6b8] sm:$0xff] }
 0x46c   :  { %1836 = vmatprep.subr.bf16.mxu1 %v1700_v52  ;;  %v1745_v52 = vld [vmem:[#allocation2 + $0x6b0] sm:$0xff] }
 0x46f   :  { %1837 = vmatpush1.bf16.msra.mxu1 %v1699_v53  ;;  %v1748_v53 = vld [vmem:[#allocation2 + $0x6c8] sm:$0xff] }
 0x470   :  { %1838 = vmatprep.subr.bf16.mxu1 %v1702_v54  ;;  %v1747_v54 = vld [vmem:[#allocation2 + $0x6c0] sm:$0xff] }
 0x473   :  { %1839 = vmatpush1.bf16.msra.mxu1 %v1701_v56  ;;  %v1750_v56 = vld [vmem:[#allocation2 + $0x6d8] sm:$0xff] }
 0x474   :  { %1840 = vmatprep.subr.bf16.mxu1 %v1704_v61  ;;  %v1749_v61 = vld [vmem:[#allocation2 + $0x6d0] sm:$0xff] }
 0x477   :  { %1841 = vmatpush1.bf16.msra.mxu1 %v1703_v0  ;;  %v1752_v0 = vld [vmem:[#allocation2 + $0x6e8] sm:$0xff] }
 0x478   :  { %1842 = vmatprep.subr.bf16.mxu1 %v1706_v62  ;;  %v1751_v62 = vld [vmem:[#allocation2 + $0x6e0] sm:$0xff] }
 0x47b   :  { %1843 = vmatpush1.bf16.msra.mxu1 %v1705_v35  ;;  %v1754_v35 = vld [vmem:[#allocation2 + $0x6f8] sm:$0xff] }
 0x47c   :  { %1844 = vmatprep.subr.bf16.mxu1 %v1708_v8  ;;  %v1753_v8 = vld [vmem:[#allocation2 + $0x6f0] sm:$0xff] }
 0x47f   :  { %1845 = vmatpush1.bf16.msra.mxu1 %v1707_v9  ;;  %v1756_v9 = vld [vmem:[#allocation2 + $0x708] sm:$0xff] }
 0x480   :  { %1846 = vmatprep.subr.bf16.mxu1 %v1710_v12  ;;  %v1755_v12 = vld [vmem:[#allocation2 + $0x700] sm:$0xff] }
 0x483   :  { %1847 = vmatpush1.bf16.msra.mxu1 %v1709_v58  ;;  %v1758_v58 = vld [vmem:[#allocation2 + $0x718] sm:$0xff] }
 0x484   :  { %1848 = vmatprep.subr.bf16.mxu1 %v1712_v3  ;;  %v1757_v3 = vld [vmem:[#allocation2 + $0x710] sm:$0xff] }
 0x487   :  { %1849 = vmatpush1.bf16.msra.mxu1 %v1711_v32  ;;  %v1760_v32 = vld [vmem:[#allocation2 + $0x728] sm:$0xff] }
 0x488   :  { %1850 = vmatprep.subr.bf16.mxu1 %v1714_v20  ;;  %v1759_v20 = vld [vmem:[#allocation2 + $0x720] sm:$0xff] }
 0x48b   :  { %1851 = vmatpush1.bf16.msra.mxu1 %v1713_v21  ;;  %v1762_v21 = vld [vmem:[#allocation2 + $0x738] sm:$0xff] }
 0x48c   :  { %1852 = vmatprep.subr.bf16.mxu1 %v1716_v24  ;;  %v1761_v24 = vld [vmem:[#allocation2 + $0x730] sm:$0xff] }
 0x48f   :  { %1853 = vmatpush1.bf16.msra.mxu1 %v1715_v25  ;;  %v1764_v25 = vld [vmem:[#allocation2 + $0x748] sm:$0xff] }
 0x490   :  { %1854 = vmatprep.subr.bf16.mxu1 %v1718_v26  ;;  %v1763_v26 = vld [vmem:[#allocation2 + $0x740] sm:$0xff] }
 0x493   :  { %1855 = vmatpush1.bf16.msra.mxu1 %v1717_v27  ;;  %v1766_v27 = vld [vmem:[#allocation2 + $0x758] sm:$0xff] }
 0x494   :  { %1856 = vmatprep.subr.bf16.mxu1 %v1720_v28  ;;  %v1765_v28 = vld [vmem:[#allocation2 + $0x750] sm:$0xff] }
 0x497   :  { %1857 = vmatpush1.bf16.msra.mxu1 %v1719_v29  ;;  %v1768_v29 = vld [vmem:[#allocation2 + $0x768] sm:$0xff] }
 0x498   :  { %1858 = vmatprep.subr.bf16.mxu1 %v1722_v45  ;;  %v1767_v45 = vld [vmem:[#allocation2 + $0x760] sm:$0xff] }
 0x49b   :  { %1859 = vmatpush1.bf16.msra.mxu1 %v1721_v50  ;;  %v1770_v50 = vld [vmem:[#allocation2 + $0x778] sm:$0xff] }
 0x49c   :  { %1869 = vmatprep.subr.bf16.mxu1 %v1724_v10  ;;  %v1769_v10 = vld [vmem:[#allocation2 + $0x770] sm:$0xff] }
 0x49e   :  { %1861 = vmatmul.mubr.bf16.vlgmr.msra.gmra.mrb[16].mxu1 %v4516_v59 }
 0x49f   :  { %1870 = vmatpush1.bf16.msra.mxu1 %v1723_v15  ;;  %1901 = vmatprep.mubr.bf16.mxu1 %v4522_v17  ;;  %v1772_v15 = vld [vmem:[#allocation2 + $0x788] sm:$0xff] }
 0x4a0   :  { %1871 = vmatprep.subr.bf16.mxu1 %v1726_v6  ;;  %v1771_v6 = vld [vmem:[#allocation2 + $0x780] sm:$0xff] }
 0x4a3   :  { %1872 = vmatpush1.bf16.msra.mxu1 %v1725_v22  ;;  %v1774_v22 = vld [vmem:[#allocation2 + $0x798] sm:$0xff] }
 0x4a4   :  { %1873 = vmatprep.subr.bf16.mxu1 %v1728_v46  ;;  %v1773_v46 = vld [vmem:[#allocation2 + $0x790] sm:$0xff] }
 0x4a7   :  { %1874 = vmatpush1.bf16.msra.mxu1 %v1727_v23  ;;  %v1776_v23 = vld [vmem:[#allocation2 + $0x7a8] sm:$0xff] }
 0x4a8   :  { %1875 = vmatprep.subr.bf16.mxu1 %v1730_v11  ;;  %v1775_v11 = vld [vmem:[#allocation2 + $0x7a0] sm:$0xff] }
 0x4ab   :  { %1876 = vmatpush1.bf16.msra.mxu1 %v1729_v14  ;;  %v1778_v14 = vld [vmem:[#allocation2 + $0x7b8] sm:$0xff] }
 0x4ac   :  { %1877 = vmatprep.subr.bf16.mxu1 %v1732_v30  ;;  %v1777_v30 = vld [vmem:[#allocation2 + $0x7b0] sm:$0xff] }
 0x4af   :  { %1878 = vmatpush1.bf16.msra.mxu1 %v1731_v31  ;;  %v1780_v31 = vld [vmem:[#allocation2 + $0x7c8] sm:$0xff] }
 0x4b0   :  { %1879 = vmatprep.subr.bf16.mxu1 %v1734_v33  ;;  %v1779_v33 = vld [vmem:[#allocation2 + $0x7c0] sm:$0xff] }
 0x4b3   :  { %1880 = vmatpush1.bf16.msra.mxu1 %v1733_v40  ;;  %v1782_v40 = vld [vmem:[#allocation2 + $0x7d8] sm:$0xff] }
 0x4b4   :  { %1881 = vmatprep.subr.bf16.mxu1 %v1736_v36  ;;  %v1781_v36 = vld [vmem:[#allocation2 + $0x7d0] sm:$0xff] }
 0x4b7   :  { %1882 = vmatpush1.bf16.msra.mxu1 %v1735_v38  ;;  %v1784_v38 = vld [vmem:[#allocation2 + $0x7e8] sm:$0xff] }
 0x4b8   :  { %1883 = vmatprep.subr.bf16.mxu1 %v1738_v41  ;;  %v1783_v41 = vld [vmem:[#allocation2 + $0x7e0] sm:$0xff] }
 0x4bb   :  { %1884 = vmatpush1.bf16.msra.mxu1 %v1737_v43  ;;  %v1786_v43 = vld [vmem:[#allocation2 + $0x7f8] sm:$0xff] }
 0x4bc   :  { %1885 = vmatprep.subr.bf16.mxu1 %v1740_v34  ;;  %v1785_v34 = vld [vmem:[#allocation2 + $0x7f0] sm:$0xff] }
 0x4bf   :  { %1886 = vmatpush1.bf16.msra.mxu1 %v1739_v39 }
 0x4c0   :  { %1887 = vmatprep.subr.bf16.mxu1 %v1742_v44 }
 0x4c3   :  { %1888 = vmatpush1.bf16.msra.mxu1 %v1741_v47 }
 0x4c4   :  { %1889 = vmatprep.subr.bf16.mxu1 %v1744_v49 }
 0x4c7   :  { %1890 = vmatpush1.bf16.msra.mxu1 %v1743_v51 }
 0x4c8   :  { %1891 = vmatprep.subr.bf16.mxu1 %v1746_v42 }
 0x4cb   :  { %1892 = vmatpush1.bf16.msra.mxu1 %v1745_v52 }
 0x4cc   :  { %1893 = vmatprep.subr.bf16.mxu1 %v1748_v53 }
 0x4cf   :  { %1894 = vmatpush1.bf16.msra.mxu1 %v1747_v54 }
 0x4d0   :  { %1895 = vmatprep.subr.bf16.mxu1 %v1750_v56 }
 0x4d3   :  { %1896 = vmatpush1.bf16.msra.mxu1 %v1749_v61 }
 0x4d4   :  { %1897 = vmatprep.subr.bf16.mxu1 %v1752_v0 }
 0x4d7   :  { %1898 = vmatpush1.bf16.msra.mxu1 %v1751_v62 }
 0x4d8   :  { %1899 = vmatprep.subr.bf16.mxu1 %v1754_v35 }
 0x4db   :  { %1900 = vmatpush1.bf16.msra.mxu1 %v1753_v8 }
 0x4dc   :  { %1910 = vmatprep.subr.bf16.mxu1 %v1756_v9 }
 0x4de   :  { %1902 = vmatmul.mubr.bf16.vlgmr.msra.gmra.mrb[16].mxu1 %v4520_v16 }
 0x4df   :  { %1911 = vmatpush1.bf16.msra.mxu1 %v1755_v12  ;;  %1942 = vmatprep.mubr.bf16.mxu1 %v4526_v19 }
 0x4e0   :  { %1912 = vmatprep.subr.bf16.mxu1 %v1758_v58 }
 0x4e3   :  { %1913 = vmatpush1.bf16.msra.mxu1 %v1757_v3 }
 0x4e4   :  { %1914 = vmatprep.subr.bf16.mxu1 %v1760_v32 }
 0x4e7   :  { %1915 = vmatpush1.bf16.msra.mxu1 %v1759_v20 }
 0x4e8   :  { %1916 = vmatprep.subr.bf16.mxu1 %v1762_v21 }
 0x4eb   :  { %1917 = vmatpush1.bf16.msra.mxu1 %v1761_v24 }
 0x4ec   :  { %1918 = vmatprep.subr.bf16.mxu1 %v1764_v25 }
 0x4ef   :  { %1919 = vmatpush1.bf16.msra.mxu1 %v1763_v26 }
 0x4f0   :  { %1920 = vmatprep.subr.bf16.mxu1 %v1766_v27 }
 0x4f3   :  { %1921 = vmatpush1.bf16.msra.mxu1 %v1765_v28 }
 0x4f4   :  { %1922 = vmatprep.subr.bf16.mxu1 %v1768_v29 }
 0x4f7   :  { %1923 = vmatpush1.bf16.msra.mxu1 %v1767_v45 }
 0x4f8   :  { %1924 = vmatprep.subr.bf16.mxu1 %v1770_v50 }
 0x4fb   :  { %1925 = vmatpush1.bf16.msra.mxu1 %v1769_v10 }
 0x4fc   :  { %1926 = vmatprep.subr.bf16.mxu1 %v1772_v15 }
 0x4ff   :  { %1927 = vmatpush1.bf16.msra.mxu1 %v1771_v6 }
 0x500   :  { %1928 = vmatprep.subr.bf16.mxu1 %v1774_v22 }
 0x503   :  { %1929 = vmatpush1.bf16.msra.mxu1 %v1773_v46 }
 0x504   :  { %1930 = vmatprep.subr.bf16.mxu1 %v1776_v23 }
 0x507   :  { %1931 = vmatpush1.bf16.msra.mxu1 %v1775_v11 }
 0x508   :  { %1932 = vmatprep.subr.bf16.mxu1 %v1778_v14 }
 0x50b   :  { %1933 = vmatpush1.bf16.msra.mxu1 %v1777_v30 }
 0x50c   :  { %1934 = vmatprep.subr.bf16.mxu1 %v1780_v31 }
 0x50f   :  { %1935 = vmatpush1.bf16.msra.mxu1 %v1779_v33 }
 0x510   :  { %1936 = vmatprep.subr.bf16.mxu1 %v1782_v40 }
 0x513   :  { %1937 = vmatpush1.bf16.msra.mxu1 %v1781_v36 }
 0x514   :  { %1938 = vmatprep.subr.bf16.mxu1 %v1784_v38 }
 0x517   :  { %1939 = vmatpush1.bf16.msra.mxu1 %v1783_v41 }
 0x518   :  { %1940 = vmatprep.subr.bf16.mxu1 %v1786_v43  ;;  %v1992_v43 = vrot.slane %v4363_v1, 2 }
 0x51b   :  { %1941 = vmatpush1.bf16.msra.mxu1 %v1785_v34 }
 0x51e   :  { %1943 = vmatmul.mubr.bf16.vlgmr.msra.gmra.mrb[16].mxu1 %v4524_v18 }
 0x5f1   :  { %v1944_v39 = vpop.f32.mrb[16].mxu1 }
 0x5f2   :  { %v1951_v44 = vrot.slane %v1944_v39, 4  ;;  %v1965_v47 = vmul.f32 %v1944_v39, %v1944_v39  ;;  %v1946_v49 = vpop.f32.mrb[17].mxu1 }
 0x5f3   :  { %v1957_v51 = vrot.slane %v1946_v49, 4  ;;  %v1966_v42 = vmul.f32 %v1946_v49, %v1946_v49  ;;  %v1948_v52 = vpop.f32.mrb[18].mxu1 }
 0x5f4   :  { %v1952_v53 = vadd.f32 %v1951_v44, %v1944_v39  ;;  %v1967_v54 = vrot.slane %v1965_v47, 4  ;;  %v1949_v56 = vpop.f32.mrb[19].mxu1 }
 0x5f5   :  { %v1958_v61 = vadd.f32 %v1957_v51, %v1946_v49  ;;  %v1973_v0 = vrot.slane %v1966_v42, 4 }
 0x5f6   :  { %v1953_v62 = vrot.slane %v1952_v53, 2  ;;  %v1968_v35 = vadd.f32 %v1967_v54, %v1965_v47 }
 0x5f7   :  { %v1959_v8 = vrot.slane %v1958_v61, 2  ;;  %v1974_v9 = vadd.f32 %v1973_v0, %v1966_v42  ;;  %v2027_v0 = vrot.slane %v4365_v2, 2 }
 0x5f8   :  { %v1954_v12 = vadd.f32 %v1953_v62, %v1952_v53  ;;  %v1969_v58 = vrot.slane %v1968_v35, 2 }
 0x5f9   :  { %v1960_v3 = vadd.f32 %v1959_v8, %v1958_v61  ;;  %v1975_v32 = vrot.slane %v1974_v9, 2 }
 0x5fa   :  { %v1955_v20 = vrot.slane %v1954_v12, 1  ;;  %v1970_v21 = vadd.f32 %v1969_v58, %v1968_v35 }
 0x5fb   :  { %v1961_v24 = vrot.slane %v1960_v3, 1  ;;  %v1976_v25 = vadd.f32 %v1975_v32, %v1974_v9 }
 0x5fc   :  { %v1956_v26 = vadd.f32 %v1955_v20, %v1954_v12  ;;  %v1971_v27 = vrot.slane %v1970_v21, 1 }
 0x5fd   :  { %v1962_v28 = vadd.f32 %v1961_v24, %v1960_v3  ;;  %v1977_v29 = vrot.slane %v1976_v25, 1 }
 0x5fe   :  { %v1963_v45 = vmul.f32 0.125, %v1956_v26  ;;  %v1972_v50 = vadd.f32 %v1971_v27, %v1970_v21 }
 0x5ff   :  { %v1964_v10 = vmul.f32 0.125, %v1962_v28  ;;  %v1978_v15 = vadd.f32 %v1977_v29, %v1976_v25 }
 0x600   :  { %v1979_v6 = vmul.f32 0.125, %v1972_v50  ;;  %v1981_v22 = vmul.f32 %v1963_v45, %v1963_v45 }
 0x601   :  { %v1980_v46 = vmul.f32 0.125, %v1978_v15  ;;  %v1982_v23 = vmul.f32 %v1964_v10, %v1964_v10 }
 0x602   :  { %v1983_v11 = vsub.f32 %v1979_v6, %v1981_v22 }
 0x603   :  { %v1984_v14 = vsub.f32 %v1980_v46, %v1982_v23 }
 0x604   :  { %v1985_v30 = vmax.f32 %v1983_v11, 0.0 }
 0x605   :  { %v1986_v31 = vmax.f32 %v1984_v14, 0.0 }
 0x606   :  { %v1987_v33 = vadd.f32 1e-05, %v1985_v30 }
 0x607   :  { %v1988_v40 = vadd.f32 1e-05, %v1986_v31 }
 0x608   :  { %3840 = vrsqrt.f32 %v1987_v33 }
 0x609   :  { %3842 = vrsqrt.f32 %v1988_v40 }
 0x612   :  { %v3841_v36 = vpop.eup %3840 }
 0x613   :  { %v3843_v38 = vpop.eup %3842 }
 0x614   :  { %v1996_v41 = vcombine.low %v3841_v36, %v3843_v38 }
 0x616   :  { %v2003_v34 = vrot.slane %v1996_v41, %v4455_v37 }
 0x618   :  { %v2010_v44 = vrot.slane %v2003_v34, %v4455_v37 }
 0x61a   :  { %v2012_v47 = vmul.f32 %v2010_v44, %v1992_v43 }
 0x61c   :  { %v2017_v51 = vrot.slane %v2012_v47, %v4477_v55  ;;  %v2021_v42 = vrot.slane %v2012_v47, %v4480_v57 }
 0x61e   :  { %v2024_v52 = vmul.f32 %v2017_v51, %v1963_v45  ;;  %v2025_v53 = vmul.f32 %v2021_v42, %v1964_v10  ;;  %v2048_v54 = vmul.f32 %v2017_v51, %v1944_v39  ;;  %v2049_v56 = vmul.f32 %v2021_v42, %v1946_v49 }
 0x620   :  { %v2031_v61 = vcombine.low %v2024_v52, %v2025_v53 }
 0x622   :  { %v2038_v62 = vrot.slane %v2031_v61, %v4455_v37 }
 0x624   :  { %v2045_v35 = vrot.slane %v2038_v62, %v4455_v37 }
 0x626   :  { %v2047_v8 = vsub.f32 %v2027_v0, %v2045_v35 }
 0x628   :  { %v2054_v9 = vrot.slane %v2047_v8, %v4477_v55  ;;  %v2058_v12 = vrot.slane %v2047_v8, %v4480_v57 }
 0x62a   :  { %v4605_v58 = vadd.f32 %v2054_v9, %v2048_v54  ;;  %v4607_v3 = vadd.f32 %v2058_v12, %v2049_v56 }
 0x62c   :  { %v2063_v32 = vmax.f32 %v4605_v58, 0.0  ;;  %v2064_v39 = vmax.f32 %v4607_v3, 0.0 }
 0x62d   :  { %4106 = dma.done.wait [#allocation5], 16384 }
 0x62e   :  { %4107 = vsyncadd [#allocation5], 4294950912  ;;  %2271 = vmatprep.mubr.bf16.mxu0 %v4514_v13  ;;  %2092 = sst [smem:[#allocation31]] %s4129_s15  ;;  %s2076_s24 = scalar_lea.hbm %s4723_s4, 49152 }
 0x62f   :  { %2094 = sst [smem:[#allocation31 + $0x1]] %s4129_s15  ;;  %s4142_s6 = smov [#allocation30]  }
 0x630   :  { %2096 = sst [smem:[#allocation31 + $0x2]] %s4130_s17 }
 0x631   :  { %2098 = sst [smem:[#allocation31 + $0x3]] %s4118_s8 }
 0x632   :  { %2100 = sst [smem:[#allocation31 + $0x4]] %s4131_s19 }
 0x633   :  { %2102 = sst [smem:[#allocation31 + $0x5]] %s4130_s17 }
 0x634   :  { %2104 = sst [smem:[#allocation31 + $0x6]] %s4131_s19 }
 0x635   :  { %2106 = sst [smem:[#allocation31 + $0x7]] %s4118_s8 }
 0x636   :  { %2108 = sst [smem:[#allocation31 + $0x8]] %s4119_s28 }
 0x637   :  { %2110 = dma.general %s2076_s24, 16384, %s1191_s26, %s4139_s9, %s4142_s6, [#allocation31], %s4339_s5, 0  }
 0x638   :  { %v2112_v49 = vld [vmem:[#allocation2 + $0x8] sm:$0xff]  ;;  %v2111_v20 = vld [vmem:[#allocation2] sm:$0xff]  ;;  %v2114_v21 = vld [vmem:[#allocation2 + $0x18] sm:$0xff] }
 0x639   :  { %2239 = vmatprep.subr.bf16.mxu0 %v2112_v49  ;;  %v2113_v24 = vld [vmem:[#allocation2 + $0x10] sm:$0xff]  ;;  %v2116_v25 = vld [vmem:[#allocation2 + $0x28] sm:$0xff]  ;;  %v2115_v26 = vld [vmem:[#allocation2 + $0x20] sm:$0xff] }
 0x63a   :  { %2240 = vmatpush1.bf16.msra.mxu0 %v2111_v20  ;;  %v2118_v27 = vld [vmem:[#allocation2 + $0x38] sm:$0xff]  ;;  %v2117_v28 = vld [vmem:[#allocation2 + $0x30] sm:$0xff]  ;;  %v2120_v29 = vld [vmem:[#allocation2 + $0x48] sm:$0xff] }
 0x63b   :  { %2241 = vmatprep.subr.bf16.mxu0 %v2114_v21  ;;  %v2119_v45 = vld [vmem:[#allocation2 + $0x40] sm:$0xff]  ;;  %v2122_v50 = vld [vmem:[#allocation2 + $0x58] sm:$0xff]  ;;  %v2121_v10 = vld [vmem:[#allocation2 + $0x50] sm:$0xff] }
 0x63c   :  { %v2124_v15 = vld [vmem:[#allocation2 + $0x68] sm:$0xff]  ;;  %v2123_v6 = vld [vmem:[#allocation2 + $0x60] sm:$0xff]  ;;  %v2126_v22 = vld [vmem:[#allocation2 + $0x78] sm:$0xff] }
 0x63d   :  { %v2125_v46 = vld [vmem:[#allocation2 + $0x70] sm:$0xff]  ;;  %v2128_v23 = vld [vmem:[#allocation2 + $0x88] sm:$0xff]  ;;  %v2127_v11 = vld [vmem:[#allocation2 + $0x80] sm:$0xff] }
 0x63e   :  { %2242 = vmatpush1.bf16.msra.mxu0 %v2113_v24  ;;  %v2130_v14 = vld [vmem:[#allocation2 + $0x98] sm:$0xff]  ;;  %v2129_v30 = vld [vmem:[#allocation2 + $0x90] sm:$0xff]  ;;  %v2132_v31 = vld [vmem:[#allocation2 + $0xa8] sm:$0xff] }
 0x63f   :  { %2243 = vmatprep.subr.bf16.mxu0 %v2116_v25  ;;  %v2131_v33 = vld [vmem:[#allocation2 + $0xa0] sm:$0xff]  ;;  %v2134_v40 = vld [vmem:[#allocation2 + $0xb8] sm:$0xff]  ;;  %v2133_v36 = vld [vmem:[#allocation2 + $0xb0] sm:$0xff] }
 0x640   :  { %v2136_v38 = vld [vmem:[#allocation2 + $0xc8] sm:$0xff]  ;;  %v2135_v41 = vld [vmem:[#allocation2 + $0xc0] sm:$0xff]  ;;  %v2138_v43 = vld [vmem:[#allocation2 + $0xd8] sm:$0xff] }
 0x641   :  { %v2137_v34 = vld [vmem:[#allocation2 + $0xd0] sm:$0xff]  ;;  %v2140_v44 = vld [vmem:[#allocation2 + $0xe8] sm:$0xff]  ;;  %v2139_v47 = vld [vmem:[#allocation2 + $0xe0] sm:$0xff] }
 0x642   :  { %2244 = vmatpush1.bf16.msra.mxu0 %v2115_v26  ;;  %v2142_v51 = vld [vmem:[#allocation2 + $0xf8] sm:$0xff]  ;;  %v2141_v42 = vld [vmem:[#allocation2 + $0xf0] sm:$0xff]  ;;  %v2144_v52 = vld [vmem:[#allocation2 + $0x108] sm:$0xff] }
 0x643   :  { %2245 = vmatprep.subr.bf16.mxu0 %v2118_v27  ;;  %v2143_v53 = vld [vmem:[#allocation2 + $0x100] sm:$0xff]  ;;  %v2146_v54 = vld [vmem:[#allocation2 + $0x118] sm:$0xff]  ;;  %v2145_v56 = vld [vmem:[#allocation2 + $0x110] sm:$0xff] }
 0x644   :  { %v2148_v61 = vld [vmem:[#allocation2 + $0x128] sm:$0xff]  ;;  %v2147_v0 = vld [vmem:[#allocation2 + $0x120] sm:$0xff]  ;;  %v2150_v62 = vld [vmem:[#allocation2 + $0x138] sm:$0xff] }
 0x645   :  { %v2149_v35 = vld [vmem:[#allocation2 + $0x130] sm:$0xff]  ;;  %v2152_v8 = vld [vmem:[#allocation2 + $0x148] sm:$0xff]  ;;  %v2151_v9 = vld [vmem:[#allocation2 + $0x140] sm:$0xff] }
 0x646   :  { %2246 = vmatpush1.bf16.msra.mxu0 %v2117_v28  ;;  %v2154_v12 = vld [vmem:[#allocation2 + $0x158] sm:$0xff]  ;;  %v2153_v49 = vld [vmem:[#allocation2 + $0x150] sm:$0xff]  ;;  %v2156_v20 = vld [vmem:[#allocation2 + $0x168] sm:$0xff] }
 0x647   :  { %2247 = vmatprep.subr.bf16.mxu0 %v2120_v29  ;;  %v2155_v21 = vld [vmem:[#allocation2 + $0x160] sm:$0xff]  ;;  %v2158_v24 = vld [vmem:[#allocation2 + $0x178] sm:$0xff]  ;;  %v2157_v25 = vld [vmem:[#allocation2 + $0x170] sm:$0xff] }
 0x648   :  { %v2160_v26 = vld [vmem:[#allocation2 + $0x188] sm:$0xff]  ;;  %v2159_v27 = vld [vmem:[#allocation2 + $0x180] sm:$0xff]  ;;  %v2162_v28 = vld [vmem:[#allocation2 + $0x198] sm:$0xff] }
 0x649   :  { %v2161_v29 = vld [vmem:[#allocation2 + $0x190] sm:$0xff] }
 0x64a   :  { %2248 = vmatpush1.bf16.msra.mxu0 %v2119_v45  ;;  %v2164_v45 = vld [vmem:[#allocation2 + $0x1a8] sm:$0xff] }
 0x64b   :  { %2249 = vmatprep.subr.bf16.mxu0 %v2122_v50  ;;  %v2163_v50 = vld [vmem:[#allocation2 + $0x1a0] sm:$0xff] }
 0x64e   :  { %2250 = vmatpush1.bf16.msra.mxu0 %v2121_v10  ;;  %v2166_v10 = vld [vmem:[#allocation2 + $0x1b8] sm:$0xff] }
 0x64f   :  { %2251 = vmatprep.subr.bf16.mxu0 %v2124_v15  ;;  %v2165_v15 = vld [vmem:[#allocation2 + $0x1b0] sm:$0xff] }
 0x652   :  { %2252 = vmatpush1.bf16.msra.mxu0 %v2123_v6  ;;  %v2168_v6 = vld [vmem:[#allocation2 + $0x1c8] sm:$0xff] }
 0x653   :  { %2253 = vmatprep.subr.bf16.mxu0 %v2126_v22  ;;  %v2167_v22 = vld [vmem:[#allocation2 + $0x1c0] sm:$0xff] }
 0x656   :  { %2254 = vmatpush1.bf16.msra.mxu0 %v2125_v46  ;;  %v2170_v46 = vld [vmem:[#allocation2 + $0x1d8] sm:$0xff] }
 0x657   :  { %2255 = vmatprep.subr.bf16.mxu0 %v2128_v23  ;;  %v2169_v23 = vld [vmem:[#allocation2 + $0x1d0] sm:$0xff] }
 0x65a   :  { %2256 = vmatpush1.bf16.msra.mxu0 %v2127_v11  ;;  %v2172_v11 = vld [vmem:[#allocation2 + $0x1e8] sm:$0xff] }
 0x65b   :  { %2257 = vmatprep.subr.bf16.mxu0 %v2130_v14  ;;  %v2171_v14 = vld [vmem:[#allocation2 + $0x1e0] sm:$0xff] }
 0x65e   :  { %2258 = vmatpush1.bf16.msra.mxu0 %v2129_v30  ;;  %v2174_v30 = vld [vmem:[#allocation2 + $0x1f8] sm:$0xff] }
 0x65f   :  { %2259 = vmatprep.subr.bf16.mxu0 %v2132_v31  ;;  %v2173_v31 = vld [vmem:[#allocation2 + $0x1f0] sm:$0xff] }
 0x662   :  { %2260 = vmatpush1.bf16.msra.mxu0 %v2131_v33  ;;  %v2176_v33 = vld [vmem:[#allocation2 + $0x208] sm:$0xff] }
 0x663   :  { %2261 = vmatprep.subr.bf16.mxu0 %v2134_v40  ;;  %v2175_v40 = vld [vmem:[#allocation2 + $0x200] sm:$0xff] }
 0x666   :  { %2262 = vmatpush1.bf16.msra.mxu0 %v2133_v36  ;;  %v2178_v36 = vld [vmem:[#allocation2 + $0x218] sm:$0xff] }
 0x667   :  { %2263 = vmatprep.subr.bf16.mxu0 %v2136_v38  ;;  %v2177_v38 = vld [vmem:[#allocation2 + $0x210] sm:$0xff] }
 0x66a   :  { %2264 = vmatpush1.bf16.msra.mxu0 %v2135_v41  ;;  %v2180_v41 = vld [vmem:[#allocation2 + $0x228] sm:$0xff] }
 0x66b   :  { %2265 = vmatprep.subr.bf16.mxu0 %v2138_v43  ;;  %v2179_v43 = vld [vmem:[#allocation2 + $0x220] sm:$0xff] }
 0x66e   :  { %2266 = vmatpush1.bf16.msra.mxu0 %v2137_v34  ;;  %v2182_v34 = vld [vmem:[#allocation2 + $0x238] sm:$0xff] }
 0x66f   :  { %2267 = vmatprep.subr.bf16.mxu0 %v2140_v44  ;;  %v2181_v44 = vld [vmem:[#allocation2 + $0x230] sm:$0xff] }
 0x672   :  { %2268 = vmatpush1.bf16.msra.mxu0 %v2139_v47  ;;  %v2184_v47 = vld [vmem:[#allocation2 + $0x248] sm:$0xff] }
 0x673   :  { %2269 = vmatprep.subr.bf16.mxu0 %v2142_v51  ;;  %v2183_v51 = vld [vmem:[#allocation2 + $0x240] sm:$0xff] }
 0x676   :  { %2270 = vmatpush1.bf16.msra.mxu0 %v2141_v42  ;;  %v2186_v42 = vld [vmem:[#allocation2 + $0x258] sm:$0xff] }
 0x677   :  { %2280 = vmatprep.subr.bf16.mxu0 %v2144_v52  ;;  %v2185_v52 = vld [vmem:[#allocation2 + $0x250] sm:$0xff] }
 0x679   :  { %2272 = vmatmul.mubr.bf16.vlgmr.msra.gmra.mrb[8].mxu0 %v4512_v7 }
 0x67a   :  { %2281 = vmatpush1.bf16.msra.mxu0 %v2143_v53  ;;  %2312 = vmatprep.mubr.bf16.mxu0 %v4518_v60  ;;  %v2188_v53 = vld [vmem:[#allocation2 + $0x268] sm:$0xff] }
 0x67b   :  { %2282 = vmatprep.subr.bf16.mxu0 %v2146_v54  ;;  %v2187_v54 = vld [vmem:[#allocation2 + $0x260] sm:$0xff] }
 0x67e   :  { %2283 = vmatpush1.bf16.msra.mxu0 %v2145_v56  ;;  %v2190_v56 = vld [vmem:[#allocation2 + $0x278] sm:$0xff] }
 0x67f   :  { %2284 = vmatprep.subr.bf16.mxu0 %v2148_v61  ;;  %v2189_v61 = vld [vmem:[#allocation2 + $0x270] sm:$0xff] }
 0x682   :  { %2285 = vmatpush1.bf16.msra.mxu0 %v2147_v0  ;;  %v2192_v0 = vld [vmem:[#allocation2 + $0x288] sm:$0xff] }
 0x683   :  { %2286 = vmatprep.subr.bf16.mxu0 %v2150_v62  ;;  %v2191_v62 = vld [vmem:[#allocation2 + $0x280] sm:$0xff] }
 0x686   :  { %2287 = vmatpush1.bf16.msra.mxu0 %v2149_v35  ;;  %v2194_v35 = vld [vmem:[#allocation2 + $0x298] sm:$0xff] }
 0x687   :  { %2288 = vmatprep.subr.bf16.mxu0 %v2152_v8  ;;  %v2193_v8 = vld [vmem:[#allocation2 + $0x290] sm:$0xff] }
 0x68a   :  { %2289 = vmatpush1.bf16.msra.mxu0 %v2151_v9  ;;  %v2196_v9 = vld [vmem:[#allocation2 + $0x2a8] sm:$0xff] }
 0x68b   :  { %2290 = vmatprep.subr.bf16.mxu0 %v2154_v12  ;;  %v2195_v12 = vld [vmem:[#allocation2 + $0x2a0] sm:$0xff] }
 0x68e   :  { %2291 = vmatpush1.bf16.msra.mxu0 %v2153_v49  ;;  %v2198_v49 = vld [vmem:[#allocation2 + $0x2b8] sm:$0xff] }
 0x68f   :  { %2292 = vmatprep.subr.bf16.mxu0 %v2156_v20  ;;  %v2197_v20 = vld [vmem:[#allocation2 + $0x2b0] sm:$0xff] }
 0x692   :  { %2293 = vmatpush1.bf16.msra.mxu0 %v2155_v21  ;;  %v2200_v21 = vld [vmem:[#allocation2 + $0x2c8] sm:$0xff] }
 0x693   :  { %2294 = vmatprep.subr.bf16.mxu0 %v2158_v24  ;;  %v2199_v24 = vld [vmem:[#allocation2 + $0x2c0] sm:$0xff] }
 0x696   :  { %2295 = vmatpush1.bf16.msra.mxu0 %v2157_v25  ;;  %v2202_v25 = vld [vmem:[#allocation2 + $0x2d8] sm:$0xff] }
 0x697   :  { %2296 = vmatprep.subr.bf16.mxu0 %v2160_v26  ;;  %v2201_v26 = vld [vmem:[#allocation2 + $0x2d0] sm:$0xff] }
 0x69a   :  { %2297 = vmatpush1.bf16.msra.mxu0 %v2159_v27  ;;  %v2204_v27 = vld [vmem:[#allocation2 + $0x2e8] sm:$0xff] }
 0x69b   :  { %2298 = vmatprep.subr.bf16.mxu0 %v2162_v28  ;;  %v2203_v28 = vld [vmem:[#allocation2 + $0x2e0] sm:$0xff] }
 0x69e   :  { %2299 = vmatpush1.bf16.msra.mxu0 %v2161_v29  ;;  %v2206_v29 = vld [vmem:[#allocation2 + $0x2f8] sm:$0xff] }
 0x69f   :  { %2300 = vmatprep.subr.bf16.mxu0 %v2164_v45  ;;  %v2205_v45 = vld [vmem:[#allocation2 + $0x2f0] sm:$0xff] }
 0x6a2   :  { %2301 = vmatpush1.bf16.msra.mxu0 %v2163_v50  ;;  %v2208_v50 = vld [vmem:[#allocation2 + $0x308] sm:$0xff] }
 0x6a3   :  { %2302 = vmatprep.subr.bf16.mxu0 %v2166_v10  ;;  %v2207_v10 = vld [vmem:[#allocation2 + $0x300] sm:$0xff] }
 0x6a6   :  { %2303 = vmatpush1.bf16.msra.mxu0 %v2165_v15  ;;  %v2210_v15 = vld [vmem:[#allocation2 + $0x318] sm:$0xff] }
 0x6a7   :  { %2304 = vmatprep.subr.bf16.mxu0 %v2168_v6  ;;  %v2209_v6 = vld [vmem:[#allocation2 + $0x310] sm:$0xff] }
 0x6aa   :  { %2305 = vmatpush1.bf16.msra.mxu0 %v2167_v22  ;;  %v2212_v22 = vld [vmem:[#allocation2 + $0x328] sm:$0xff] }
 0x6ab   :  { %2306 = vmatprep.subr.bf16.mxu0 %v2170_v46  ;;  %v2211_v46 = vld [vmem:[#allocation2 + $0x320] sm:$0xff] }
 0x6ae   :  { %2307 = vmatpush1.bf16.msra.mxu0 %v2169_v23  ;;  %v2214_v23 = vld [vmem:[#allocation2 + $0x338] sm:$0xff] }
 0x6af   :  { %2308 = vmatprep.subr.bf16.mxu0 %v2172_v11  ;;  %v2213_v11 = vld [vmem:[#allocation2 + $0x330] sm:$0xff] }
 0x6b2   :  { %2309 = vmatpush1.bf16.msra.mxu0 %v2171_v14  ;;  %v2216_v14 = vld [vmem:[#allocation2 + $0x348] sm:$0xff] }
 0x6b3   :  { %2310 = vmatprep.subr.bf16.mxu0 %v2174_v30  ;;  %v2215_v30 = vld [vmem:[#allocation2 + $0x340] sm:$0xff] }
 0x6b6   :  { %2311 = vmatpush1.bf16.msra.mxu0 %v2173_v31  ;;  %v2218_v31 = vld [vmem:[#allocation2 + $0x358] sm:$0xff] }
 0x6b7   :  { %2321 = vmatprep.subr.bf16.mxu0 %v2176_v33  ;;  %v2217_v33 = vld [vmem:[#allocation2 + $0x350] sm:$0xff] }
 0x6b9   :  { %2313 = vmatmul.mubr.bf16.vlgmr.msra.gmra.mrb[8].mxu0 %v4516_v59 }
 0x6ba   :  { %2322 = vmatpush1.bf16.msra.mxu0 %v2175_v40  ;;  %2353 = vmatprep.mubr.bf16.mxu0 %v4522_v17  ;;  %v2220_v40 = vld [vmem:[#allocation2 + $0x368] sm:$0xff] }
 0x6bb   :  { %2323 = vmatprep.subr.bf16.mxu0 %v2178_v36  ;;  %v2219_v36 = vld [vmem:[#allocation2 + $0x360] sm:$0xff] }
 0x6be   :  { %2324 = vmatpush1.bf16.msra.mxu0 %v2177_v38  ;;  %v2222_v38 = vld [vmem:[#allocation2 + $0x378] sm:$0xff] }
 0x6bf   :  { %2325 = vmatprep.subr.bf16.mxu0 %v2180_v41  ;;  %v2221_v41 = vld [vmem:[#allocation2 + $0x370] sm:$0xff] }
 0x6c2   :  { %2326 = vmatpush1.bf16.msra.mxu0 %v2179_v43  ;;  %v2224_v43 = vld [vmem:[#allocation2 + $0x388] sm:$0xff] }
 0x6c3   :  { %2327 = vmatprep.subr.bf16.mxu0 %v2182_v34  ;;  %v2223_v34 = vld [vmem:[#allocation2 + $0x380] sm:$0xff] }
 0x6c6   :  { %2328 = vmatpush1.bf16.msra.mxu0 %v2181_v44  ;;  %v2226_v44 = vld [vmem:[#allocation2 + $0x398] sm:$0xff] }
 0x6c7   :  { %2329 = vmatprep.subr.bf16.mxu0 %v2184_v47  ;;  %v2225_v47 = vld [vmem:[#allocation2 + $0x390] sm:$0xff] }
 0x6ca   :  { %2330 = vmatpush1.bf16.msra.mxu0 %v2183_v51  ;;  %v2228_v51 = vld [vmem:[#allocation2 + $0x3a8] sm:$0xff] }
 0x6cb   :  { %2331 = vmatprep.subr.bf16.mxu0 %v2186_v42  ;;  %v2227_v42 = vld [vmem:[#allocation2 + $0x3a0] sm:$0xff] }
 0x6ce   :  { %2332 = vmatpush1.bf16.msra.mxu0 %v2185_v52  ;;  %v2230_v52 = vld [vmem:[#allocation2 + $0x3b8] sm:$0xff] }
 0x6cf   :  { %2333 = vmatprep.subr.bf16.mxu0 %v2188_v53  ;;  %v2229_v53 = vld [vmem:[#allocation2 + $0x3b0] sm:$0xff] }
 0x6d2   :  { %2334 = vmatpush1.bf16.msra.mxu0 %v2187_v54  ;;  %v2232_v54 = vld [vmem:[#allocation2 + $0x3c8] sm:$0xff] }
 0x6d3   :  { %2335 = vmatprep.subr.bf16.mxu0 %v2190_v56  ;;  %v2231_v56 = vld [vmem:[#allocation2 + $0x3c0] sm:$0xff] }
 0x6d6   :  { %2336 = vmatpush1.bf16.msra.mxu0 %v2189_v61  ;;  %v2234_v61 = vld [vmem:[#allocation2 + $0x3d8] sm:$0xff] }
 0x6d7   :  { %2337 = vmatprep.subr.bf16.mxu0 %v2192_v0  ;;  %v2233_v0 = vld [vmem:[#allocation2 + $0x3d0] sm:$0xff] }
 0x6da   :  { %2338 = vmatpush1.bf16.msra.mxu0 %v2191_v62  ;;  %v2236_v62 = vld [vmem:[#allocation2 + $0x3e8] sm:$0xff] }
 0x6db   :  { %2339 = vmatprep.subr.bf16.mxu0 %v2194_v35  ;;  %v2235_v35 = vld [vmem:[#allocation2 + $0x3e0] sm:$0xff] }
 0x6de   :  { %2340 = vmatpush1.bf16.msra.mxu0 %v2193_v8  ;;  %v2238_v8 = vld [vmem:[#allocation2 + $0x3f8] sm:$0xff] }
 0x6df   :  { %2341 = vmatprep.subr.bf16.mxu0 %v2196_v9  ;;  %v2237_v9 = vld [vmem:[#allocation2 + $0x3f0] sm:$0xff] }
 0x6e2   :  { %2342 = vmatpush1.bf16.msra.mxu0 %v2195_v12 }
 0x6e3   :  { %2343 = vmatprep.subr.bf16.mxu0 %v2198_v49 }
 0x6e6   :  { %2344 = vmatpush1.bf16.msra.mxu0 %v2197_v20 }
 0x6e7   :  { %2345 = vmatprep.subr.bf16.mxu0 %v2200_v21 }
 0x6ea   :  { %2346 = vmatpush1.bf16.msra.mxu0 %v2199_v24 }
 0x6eb   :  { %2347 = vmatprep.subr.bf16.mxu0 %v2202_v25 }
 0x6ee   :  { %2348 = vmatpush1.bf16.msra.mxu0 %v2201_v26 }
 0x6ef   :  { %2349 = vmatprep.subr.bf16.mxu0 %v2204_v27 }
 0x6f2   :  { %2350 = vmatpush1.bf16.msra.mxu0 %v2203_v28 }
 0x6f3   :  { %2351 = vmatprep.subr.bf16.mxu0 %v2206_v29 }
 0x6f6   :  { %2352 = vmatpush1.bf16.msra.mxu0 %v2205_v45 }
 0x6f7   :  { %2362 = vmatprep.subr.bf16.mxu0 %v2208_v50 }
 0x6f9   :  { %2354 = vmatmul.mubr.bf16.vlgmr.msra.gmra.mrb[8].mxu0 %v4520_v16 }
 0x6fa   :  { %2363 = vmatpush1.bf16.msra.mxu0 %v2207_v10  ;;  %2394 = vmatprep.mubr.bf16.mxu0 %v4526_v19 }
 0x6fb   :  { %2364 = vmatprep.subr.bf16.mxu0 %v2210_v15 }
 0x6fe   :  { %2365 = vmatpush1.bf16.msra.mxu0 %v2209_v6 }
 0x6ff   :  { %2366 = vmatprep.subr.bf16.mxu0 %v2212_v22 }
 0x702   :  { %2367 = vmatpush1.bf16.msra.mxu0 %v2211_v46 }
 0x703   :  { %2368 = vmatprep.subr.bf16.mxu0 %v2214_v23 }
 0x706   :  { %2369 = vmatpush1.bf16.msra.mxu0 %v2213_v11 }
 0x707   :  { %2370 = vmatprep.subr.bf16.mxu0 %v2216_v14 }
 0x70a   :  { %2371 = vmatpush1.bf16.msra.mxu0 %v2215_v30 }
 0x70b   :  { %2372 = vmatprep.subr.bf16.mxu0 %v2218_v31 }
 0x70e   :  { %2373 = vmatpush1.bf16.msra.mxu0 %v2217_v33 }
 0x70f   :  { %2374 = vmatprep.subr.bf16.mxu0 %v2220_v40 }
 0x712   :  { %2375 = vmatpush1.bf16.msra.mxu0 %v2219_v36 }
 0x713   :  { %2376 = vmatprep.subr.bf16.mxu0 %v2222_v38 }
 0x716   :  { %2377 = vmatpush1.bf16.msra.mxu0 %v2221_v41 }
 0x717   :  { %2378 = vmatprep.subr.bf16.mxu0 %v2224_v43 }
 0x71a   :  { %2379 = vmatpush1.bf16.msra.mxu0 %v2223_v34 }
 0x71b   :  { %2380 = vmatprep.subr.bf16.mxu0 %v2226_v44 }
 0x71e   :  { %2381 = vmatpush1.bf16.msra.mxu0 %v2225_v47 }
 0x71f   :  { %2382 = vmatprep.subr.bf16.mxu0 %v2228_v51 }
 0x722   :  { %2383 = vmatpush1.bf16.msra.mxu0 %v2227_v42 }
 0x723   :  { %2384 = vmatprep.subr.bf16.mxu0 %v2230_v52 }
 0x726   :  { %2385 = vmatpush1.bf16.msra.mxu0 %v2229_v53 }
 0x727   :  { %2386 = vmatprep.subr.bf16.mxu0 %v2232_v54 }
 0x72a   :  { %2387 = vmatpush1.bf16.msra.mxu0 %v2231_v56 }
 0x72b   :  { %2388 = vmatprep.subr.bf16.mxu0 %v2234_v61 }
 0x72e   :  { %2389 = vmatpush1.bf16.msra.mxu0 %v2233_v0 }
 0x72f   :  { %2390 = vmatprep.subr.bf16.mxu0 %v2236_v62 }
 0x732   :  { %2391 = vmatpush1.bf16.msra.mxu0 %v2235_v35 }
 0x733   :  { %2392 = vmatprep.subr.bf16.mxu0 %v2238_v8 }
 0x736   :  { %2393 = vmatpush1.bf16.msra.mxu0 %v2237_v9 }
 0x739   :  { %2395 = vmatmul.mubr.bf16.vlgmr.msra.gmra.mrb[8].mxu0 %v4524_v18 }
 0x80c   :  { %v2396_v12 = vpop.f32.mrb[8].mxu0 }
 0x80d   :  { %v2403_v49 = vrot.slane %v2396_v12, 4  ;;  %v2417_v20 = vmul.f32 %v2396_v12, %v2396_v12  ;;  %v2398_v21 = vpop.f32.mrb[9].mxu0 }
 0x80e   :  { %v2409_v24 = vrot.slane %v2398_v21, 4  ;;  %v2418_v25 = vmul.f32 %v2398_v21, %v2398_v21  ;;  %v2400_v26 = vpop.f32.mrb[10].mxu0 }
 0x80f   :  { %v2404_v27 = vadd.f32 %v2403_v49, %v2396_v12  ;;  %v2419_v28 = vrot.slane %v2417_v20, 4  ;;  %v2401_v29 = vpop.f32.mrb[11].mxu0 }
 0x810   :  { %v2410_v45 = vadd.f32 %v2409_v24, %v2398_v21  ;;  %v2425_v50 = vrot.slane %v2418_v25, 4  ;;  %v2443_v24 = vrot.slane %v4363_v1, 4 }
 0x811   :  { %v2405_v10 = vrot.slane %v2404_v27, 2  ;;  %v2420_v15 = vadd.f32 %v2419_v28, %v2417_v20 }
 0x812   :  { %v2411_v6 = vrot.slane %v2410_v45, 2  ;;  %v2426_v22 = vadd.f32 %v2425_v50, %v2418_v25 }
 0x813   :  { %v2406_v46 = vadd.f32 %v2405_v10, %v2404_v27  ;;  %v2421_v23 = vrot.slane %v2420_v15, 2 }
 0x814   :  { %v2412_v11 = vadd.f32 %v2411_v6, %v2410_v45  ;;  %v2427_v14 = vrot.slane %v2426_v22, 2 }
 0x815   :  { %v2407_v30 = vrot.slane %v2406_v46, 1  ;;  %v2422_v31 = vadd.f32 %v2421_v23, %v2420_v15 }
 0x816   :  { %v2413_v33 = vrot.slane %v2412_v11, 1  ;;  %v2428_v40 = vadd.f32 %v2427_v14, %v2426_v22  ;;  %v2477_v22 = vrot.slane %v4365_v2, 4 }
 0x817   :  { %v2408_v36 = vadd.f32 %v2407_v30, %v2406_v46  ;;  %v2423_v38 = vrot.slane %v2422_v31, 1 }
 0x818   :  { %v2414_v41 = vadd.f32 %v2413_v33, %v2412_v11  ;;  %v2429_v43 = vrot.slane %v2428_v40, 1 }
 0x819   :  { %v2415_v34 = vmul.f32 0.125, %v2408_v36  ;;  %v2424_v44 = vadd.f32 %v2423_v38, %v2422_v31 }
 0x81a   :  { %v2416_v47 = vmul.f32 0.125, %v2414_v41  ;;  %v2430_v51 = vadd.f32 %v2429_v43, %v2428_v40 }
 0x81b   :  { %v2431_v42 = vmul.f32 0.125, %v2424_v44  ;;  %v2433_v52 = vmul.f32 %v2415_v34, %v2415_v34 }
 0x81c   :  { %v2432_v53 = vmul.f32 0.125, %v2430_v51  ;;  %v2434_v54 = vmul.f32 %v2416_v47, %v2416_v47 }
 0x81d   :  { %v2435_v56 = vsub.f32 %v2431_v42, %v2433_v52 }
 0x81e   :  { %v2436_v61 = vsub.f32 %v2432_v53, %v2434_v54 }
 0x81f   :  { %v2437_v0 = vmax.f32 %v2435_v56, 0.0 }
 0x820   :  { %v2438_v62 = vmax.f32 %v2436_v61, 0.0 }
 0x821   :  { %v2439_v35 = vadd.f32 1e-05, %v2437_v0 }
 0x822   :  { %v2440_v8 = vadd.f32 1e-05, %v2438_v62 }
 0x823   :  { %3844 = vrsqrt.f32 %v2439_v35 }
 0x824   :  { %3846 = vrsqrt.f32 %v2440_v8 }
 0x82d   :  { %v3845_v9 = vpop.eup %3844 }
 0x82e   :  { %v3847_v49 = vpop.eup %3846 }
 0x82f   :  { %v2447_v20 = vcombine.low %v3845_v9, %v3847_v49 }
 0x831   :  { %v2454_v25 = vrot.slane %v2447_v20, %v4455_v37 }
 0x833   :  { %v2461_v26 = vrot.slane %v2454_v25, %v4455_v37 }
 0x835   :  { %v2463_v27 = vmul.f32 %v2461_v26, %v2443_v24 }
 0x837   :  { %v2468_v28 = vrot.slane %v2463_v27, %v4477_v55  ;;  %v2472_v29 = vrot.slane %v2463_v27, %v4480_v57 }
 0x839   :  { %v2475_v45 = vmul.f32 %v2468_v28, %v2415_v34  ;;  %v2476_v50 = vmul.f32 %v2472_v29, %v2416_v47  ;;  %v2498_v10 = vmul.f32 %v2468_v28, %v2396_v12  ;;  %v2499_v15 = vmul.f32 %v2472_v29, %v2398_v21 }
 0x83b   :  { %v2481_v6 = vcombine.low %v2475_v45, %v2476_v50 }
 0x83d   :  { %v2488_v46 = vrot.slane %v2481_v6, %v4455_v37 }
 0x83f   :  { %v2495_v23 = vrot.slane %v2488_v46, %v4455_v37 }
 0x841   :  { %v2497_v11 = vsub.f32 %v2477_v22, %v2495_v23 }
 0x843   :  { %v2504_v14 = vrot.slane %v2497_v11, %v4477_v55  ;;  %v2508_v30 = vrot.slane %v2497_v11, %v4480_v57 }
 0x845   :  { %v4645_v31 = vadd.f32 %v2504_v14, %v2498_v10  ;;  %v4647_v33 = vadd.f32 %v2508_v30, %v2499_v15 }
 0x847   :  { %v2513_v40 = vmax.f32 %v4645_v31, 0.0  ;;  %v2514_v12 = vmax.f32 %v4647_v33, 0.0 }
 0x848   :  { %4108 = dma.done.wait [#allocation5 + $0x1], 16384 }
 0x849   :  { %4109 = vsyncadd [#allocation5 + $0x1], 4294950912  ;;  %2686 = vmatprep.mubr.bf16.mxu1 %v4514_v13  ;;  %v2527_v21 = vld [vmem:[#allocation2 + $0x408] sm:$0xff]  ;;  %v2526_v36 = vld [vmem:[#allocation2 + $0x400] sm:$0xff] }
 0x84a   :  { %v2529_v38 = vld [vmem:[#allocation2 + $0x418] sm:$0xff]  ;;  %2654 = vmatprep.subr.bf16.mxu1 %v2527_v21  ;;  %v2528_v41 = vld [vmem:[#allocation2 + $0x410] sm:$0xff]  ;;  %v2531_v43 = vld [vmem:[#allocation2 + $0x428] sm:$0xff] }
 0x84b   :  { %2655 = vmatpush1.bf16.msra.mxu1 %v2526_v36  ;;  %v2530_v34 = vld [vmem:[#allocation2 + $0x420] sm:$0xff]  ;;  %v2533_v44 = vld [vmem:[#allocation2 + $0x438] sm:$0xff]  ;;  %v2532_v47 = vld [vmem:[#allocation2 + $0x430] sm:$0xff] }
 0x84c   :  { %2656 = vmatprep.subr.bf16.mxu1 %v2529_v38  ;;  %v2535_v51 = vld [vmem:[#allocation2 + $0x448] sm:$0xff]  ;;  %v2534_v42 = vld [vmem:[#allocation2 + $0x440] sm:$0xff]  ;;  %v2537_v13 = vld [vmem:[#allocation2 + $0x458] sm:$0xff] }
 0x84d   :  { %v2536_v52 = vld [vmem:[#allocation2 + $0x450] sm:$0xff]  ;;  %v2539_v53 = vld [vmem:[#allocation2 + $0x468] sm:$0xff]  ;;  %v2538_v54 = vld [vmem:[#allocation2 + $0x460] sm:$0xff] }
 0x84e   :  { %v2541_v56 = vld [vmem:[#allocation2 + $0x478] sm:$0xff]  ;;  %v2540_v61 = vld [vmem:[#allocation2 + $0x470] sm:$0xff]  ;;  %v2543_v0 = vld [vmem:[#allocation2 + $0x488] sm:$0xff] }
 0x84f   :  { %2657 = vmatpush1.bf16.msra.mxu1 %v2528_v41  ;;  %v2542_v62 = vld [vmem:[#allocation2 + $0x480] sm:$0xff]  ;;  %v2545_v35 = vld [vmem:[#allocation2 + $0x498] sm:$0xff]  ;;  %v2544_v8 = vld [vmem:[#allocation2 + $0x490] sm:$0xff] }
 0x850   :  { %2658 = vmatprep.subr.bf16.mxu1 %v2531_v43  ;;  %v2547_v9 = vld [vmem:[#allocation2 + $0x4a8] sm:$0xff]  ;;  %v2546_v49 = vld [vmem:[#allocation2 + $0x4a0] sm:$0xff]  ;;  %v2549_v20 = vld [vmem:[#allocation2 + $0x4b8] sm:$0xff] }
 0x851   :  { %v2548_v24 = vld [vmem:[#allocation2 + $0x4b0] sm:$0xff]  ;;  %v2551_v25 = vld [vmem:[#allocation2 + $0x4c8] sm:$0xff]  ;;  %v2550_v26 = vld [vmem:[#allocation2 + $0x4c0] sm:$0xff] }
 0x852   :  { %v2553_v27 = vld [vmem:[#allocation2 + $0x4d8] sm:$0xff]  ;;  %v2552_v28 = vld [vmem:[#allocation2 + $0x4d0] sm:$0xff]  ;;  %v2555_v29 = vld [vmem:[#allocation2 + $0x4e8] sm:$0xff] }
 0x853   :  { %2659 = vmatpush1.bf16.msra.mxu1 %v2530_v34  ;;  %v2554_v45 = vld [vmem:[#allocation2 + $0x4e0] sm:$0xff]  ;;  %v2557_v50 = vld [vmem:[#allocation2 + $0x4f8] sm:$0xff]  ;;  %v2556_v10 = vld [vmem:[#allocation2 + $0x4f0] sm:$0xff] }
 0x854   :  { %2660 = vmatprep.subr.bf16.mxu1 %v2533_v44  ;;  %v2559_v15 = vld [vmem:[#allocation2 + $0x508] sm:$0xff]  ;;  %v2558_v6 = vld [vmem:[#allocation2 + $0x500] sm:$0xff]  ;;  %v2561_v22 = vld [vmem:[#allocation2 + $0x518] sm:$0xff] }
 0x855   :  { %v2560_v46 = vld [vmem:[#allocation2 + $0x510] sm:$0xff]  ;;  %v2563_v23 = vld [vmem:[#allocation2 + $0x528] sm:$0xff]  ;;  %v2562_v11 = vld [vmem:[#allocation2 + $0x520] sm:$0xff] }
 0x856   :  { %v2565_v14 = vld [vmem:[#allocation2 + $0x538] sm:$0xff]  ;;  %v2564_v30 = vld [vmem:[#allocation2 + $0x530] sm:$0xff]  ;;  %v2567_v21 = vld [vmem:[#allocation2 + $0x548] sm:$0xff] }
 0x857   :  { %2661 = vmatpush1.bf16.msra.mxu1 %v2532_v47  ;;  %v2566_v36 = vld [vmem:[#allocation2 + $0x540] sm:$0xff]  ;;  %v2569_v38 = vld [vmem:[#allocation2 + $0x558] sm:$0xff]  ;;  %v2571_v41 = vld [vmem:[#allocation2 + $0x568] sm:$0xff] }
 0x858   :  { %2662 = vmatprep.subr.bf16.mxu1 %v2535_v51  ;;  %v2573_v43 = vld [vmem:[#allocation2 + $0x578] sm:$0xff]  ;;  %v2572_v34 = vld [vmem:[#allocation2 + $0x570] sm:$0xff]  ;;  %v2575_v44 = vld [vmem:[#allocation2 + $0x588] sm:$0xff] }
 0x859   :  { %v2574_v47 = vld [vmem:[#allocation2 + $0x580] sm:$0xff]  ;;  %v2577_v51 = vld [vmem:[#allocation2 + $0x598] sm:$0xff] }
 0x85b   :  { %2663 = vmatpush1.bf16.msra.mxu1 %v2534_v42  ;;  %v2576_v42 = vld [vmem:[#allocation2 + $0x590] sm:$0xff] }
 0x85c   :  { %2664 = vmatprep.subr.bf16.mxu1 %v2537_v13  ;;  %v2579_v13 = vld [vmem:[#allocation2 + $0x5a8] sm:$0xff] }
 0x85f   :  { %2665 = vmatpush1.bf16.msra.mxu1 %v2536_v52  ;;  %v2578_v52 = vld [vmem:[#allocation2 + $0x5a0] sm:$0xff] }
 0x860   :  { %2666 = vmatprep.subr.bf16.mxu1 %v2539_v53  ;;  %v2581_v53 = vld [vmem:[#allocation2 + $0x5b8] sm:$0xff] }
 0x863   :  { %2667 = vmatpush1.bf16.msra.mxu1 %v2538_v54  ;;  %v2580_v54 = vld [vmem:[#allocation2 + $0x5b0] sm:$0xff] }
 0x864   :  { %2668 = vmatprep.subr.bf16.mxu1 %v2541_v56  ;;  %v2583_v56 = vld [vmem:[#allocation2 + $0x5c8] sm:$0xff] }
 0x867   :  { %2669 = vmatpush1.bf16.msra.mxu1 %v2540_v61  ;;  %v2582_v61 = vld [vmem:[#allocation2 + $0x5c0] sm:$0xff] }
 0x868   :  { %2670 = vmatprep.subr.bf16.mxu1 %v2543_v0  ;;  %v2585_v0 = vld [vmem:[#allocation2 + $0x5d8] sm:$0xff] }
 0x86b   :  { %2671 = vmatpush1.bf16.msra.mxu1 %v2542_v62  ;;  %v2584_v62 = vld [vmem:[#allocation2 + $0x5d0] sm:$0xff] }
 0x86c   :  { %2672 = vmatprep.subr.bf16.mxu1 %v2545_v35  ;;  %v2587_v35 = vld [vmem:[#allocation2 + $0x5e8] sm:$0xff] }
 0x86f   :  { %2673 = vmatpush1.bf16.msra.mxu1 %v2544_v8  ;;  %v2586_v8 = vld [vmem:[#allocation2 + $0x5e0] sm:$0xff] }
 0x870   :  { %2674 = vmatprep.subr.bf16.mxu1 %v2547_v9  ;;  %v2589_v9 = vld [vmem:[#allocation2 + $0x5f8] sm:$0xff] }
 0x873   :  { %2675 = vmatpush1.bf16.msra.mxu1 %v2546_v49  ;;  %v2588_v49 = vld [vmem:[#allocation2 + $0x5f0] sm:$0xff] }
 0x874   :  { %2676 = vmatprep.subr.bf16.mxu1 %v2549_v20  ;;  %v2591_v20 = vld [vmem:[#allocation2 + $0x608] sm:$0xff] }
 0x877   :  { %2677 = vmatpush1.bf16.msra.mxu1 %v2548_v24  ;;  %v2590_v24 = vld [vmem:[#allocation2 + $0x600] sm:$0xff] }
 0x878   :  { %2678 = vmatprep.subr.bf16.mxu1 %v2551_v25  ;;  %v2593_v25 = vld [vmem:[#allocation2 + $0x618] sm:$0xff] }
 0x87b   :  { %2679 = vmatpush1.bf16.msra.mxu1 %v2550_v26  ;;  %v2592_v26 = vld [vmem:[#allocation2 + $0x610] sm:$0xff] }
 0x87c   :  { %2680 = vmatprep.subr.bf16.mxu1 %v2553_v27  ;;  %v2595_v27 = vld [vmem:[#allocation2 + $0x628] sm:$0xff] }
 0x87f   :  { %2681 = vmatpush1.bf16.msra.mxu1 %v2552_v28  ;;  %v2594_v28 = vld [vmem:[#allocation2 + $0x620] sm:$0xff] }
 0x880   :  { %2682 = vmatprep.subr.bf16.mxu1 %v2555_v29  ;;  %v2597_v29 = vld [vmem:[#allocation2 + $0x638] sm:$0xff] }
 0x883   :  { %2683 = vmatpush1.bf16.msra.mxu1 %v2554_v45  ;;  %v2596_v45 = vld [vmem:[#allocation2 + $0x630] sm:$0xff] }
 0x884   :  { %2684 = vmatprep.subr.bf16.mxu1 %v2557_v50  ;;  %v2599_v50 = vld [vmem:[#allocation2 + $0x648] sm:$0xff] }
 0x887   :  { %2685 = vmatpush1.bf16.msra.mxu1 %v2556_v10  ;;  %v2598_v10 = vld [vmem:[#allocation2 + $0x640] sm:$0xff] }
 0x888   :  { %2695 = vmatprep.subr.bf16.mxu1 %v2559_v15  ;;  %v2601_v15 = vld [vmem:[#allocation2 + $0x658] sm:$0xff] }
 0x88a   :  { %2687 = vmatmul.mubr.bf16.vlgmr.msra.gmra.mrb[20].mxu1 %v4512_v7  ;;  %v2568_v7 = vld [vmem:[#allocation2 + $0x550] sm:$0xff] }
 0x88b   :  { %2696 = vmatpush1.bf16.msra.mxu1 %v2558_v6  ;;  %2727 = vmatprep.mubr.bf16.mxu1 %v4518_v60  ;;  %v2570_v60 = vld [vmem:[#allocation2 + $0x560] sm:$0xff]  ;;  %v2603_v6 = vld [vmem:[#allocation2 + $0x668] sm:$0xff] }
 0x88c   :  { %2697 = vmatprep.subr.bf16.mxu1 %v2561_v22  ;;  %v2605_v22 = vld [vmem:[#allocation2 + $0x678] sm:$0xff] }
 0x88f   :  { %2698 = vmatpush1.bf16.msra.mxu1 %v2560_v46  ;;  %v2604_v46 = vld [vmem:[#allocation2 + $0x670] sm:$0xff] }
 0x890   :  { %2699 = vmatprep.subr.bf16.mxu1 %v2563_v23  ;;  %v2607_v23 = vld [vmem:[#allocation2 + $0x688] sm:$0xff] }
 0x893   :  { %2700 = vmatpush1.bf16.msra.mxu1 %v2562_v11  ;;  %v2606_v11 = vld [vmem:[#allocation2 + $0x680] sm:$0xff] }
 0x894   :  { %2701 = vmatprep.subr.bf16.mxu1 %v2565_v14  ;;  %v2609_v14 = vld [vmem:[#allocation2 + $0x698] sm:$0xff] }
 0x897   :  { %2702 = vmatpush1.bf16.msra.mxu1 %v2564_v30  ;;  %v2608_v30 = vld [vmem:[#allocation2 + $0x690] sm:$0xff] }
 0x898   :  { %2703 = vmatprep.subr.bf16.mxu1 %v2567_v21  ;;  %v2611_v21 = vld [vmem:[#allocation2 + $0x6a8] sm:$0xff] }
 0x89b   :  { %2704 = vmatpush1.bf16.msra.mxu1 %v2566_v36  ;;  %v2610_v36 = vld [vmem:[#allocation2 + $0x6a0] sm:$0xff] }
 0x89c   :  { %2705 = vmatprep.subr.bf16.mxu1 %v2569_v38  ;;  %v2613_v38 = vld [vmem:[#allocation2 + $0x6b8] sm:$0xff] }
 0x89f   :  { %2706 = vmatpush1.bf16.msra.mxu1 %v2568_v7  ;;  %v2612_v7 = vld [vmem:[#allocation2 + $0x6b0] sm:$0xff] }
 0x8a0   :  { %2707 = vmatprep.subr.bf16.mxu1 %v2571_v41  ;;  %v2615_v41 = vld [vmem:[#allocation2 + $0x6c8] sm:$0xff] }
 0x8a3   :  { %2708 = vmatpush1.bf16.msra.mxu1 %v2570_v60  ;;  %v2614_v60 = vld [vmem:[#allocation2 + $0x6c0] sm:$0xff] }
 0x8a4   :  { %2709 = vmatprep.subr.bf16.mxu1 %v2573_v43  ;;  %v2617_v43 = vld [vmem:[#allocation2 + $0x6d8] sm:$0xff] }
 0x8a7   :  { %2710 = vmatpush1.bf16.msra.mxu1 %v2572_v34  ;;  %v2616_v34 = vld [vmem:[#allocation2 + $0x6d0] sm:$0xff] }
 0x8a8   :  { %2711 = vmatprep.subr.bf16.mxu1 %v2575_v44  ;;  %v2619_v44 = vld [vmem:[#allocation2 + $0x6e8] sm:$0xff] }
 0x8ab   :  { %2712 = vmatpush1.bf16.msra.mxu1 %v2574_v47  ;;  %v2618_v47 = vld [vmem:[#allocation2 + $0x6e0] sm:$0xff] }
 0x8ac   :  { %2713 = vmatprep.subr.bf16.mxu1 %v2577_v51  ;;  %v2621_v51 = vld [vmem:[#allocation2 + $0x6f8] sm:$0xff] }
 0x8af   :  { %2714 = vmatpush1.bf16.msra.mxu1 %v2576_v42  ;;  %v2620_v42 = vld [vmem:[#allocation2 + $0x6f0] sm:$0xff] }
 0x8b0   :  { %2715 = vmatprep.subr.bf16.mxu1 %v2579_v13  ;;  %v2623_v13 = vld [vmem:[#allocation2 + $0x708] sm:$0xff] }
 0x8b3   :  { %2716 = vmatpush1.bf16.msra.mxu1 %v2578_v52  ;;  %v2622_v52 = vld [vmem:[#allocation2 + $0x700] sm:$0xff] }
 0x8b4   :  { %2717 = vmatprep.subr.bf16.mxu1 %v2581_v53  ;;  %v2625_v53 = vld [vmem:[#allocation2 + $0x718] sm:$0xff] }
 0x8b7   :  { %2718 = vmatpush1.bf16.msra.mxu1 %v2580_v54  ;;  %v2624_v54 = vld [vmem:[#allocation2 + $0x710] sm:$0xff] }
 0x8b8   :  { %2719 = vmatprep.subr.bf16.mxu1 %v2583_v56  ;;  %v2627_v56 = vld [vmem:[#allocation2 + $0x728] sm:$0xff] }
 0x8bb   :  { %2720 = vmatpush1.bf16.msra.mxu1 %v2582_v61  ;;  %v2626_v61 = vld [vmem:[#allocation2 + $0x720] sm:$0xff] }
 0x8bc   :  { %2721 = vmatprep.subr.bf16.mxu1 %v2585_v0  ;;  %v2629_v0 = vld [vmem:[#allocation2 + $0x738] sm:$0xff] }
 0x8bf   :  { %2722 = vmatpush1.bf16.msra.mxu1 %v2584_v62  ;;  %v2628_v62 = vld [vmem:[#allocation2 + $0x730] sm:$0xff] }
 0x8c0   :  { %2723 = vmatprep.subr.bf16.mxu1 %v2587_v35  ;;  %v2631_v35 = vld [vmem:[#allocation2 + $0x748] sm:$0xff] }
 0x8c3   :  { %2724 = vmatpush1.bf16.msra.mxu1 %v2586_v8  ;;  %v2630_v8 = vld [vmem:[#allocation2 + $0x740] sm:$0xff] }
 0x8c4   :  { %2725 = vmatprep.subr.bf16.mxu1 %v2589_v9  ;;  %v2633_v9 = vld [vmem:[#allocation2 + $0x758] sm:$0xff] }
 0x8c7   :  { %2726 = vmatpush1.bf16.msra.mxu1 %v2588_v49  ;;  %v2635_v49 = vld [vmem:[#allocation2 + $0x768] sm:$0xff] }
 0x8c8   :  { %2736 = vmatprep.subr.bf16.mxu1 %v2591_v20  ;;  %v2637_v20 = vld [vmem:[#allocation2 + $0x778] sm:$0xff] }
 0x8ca   :  { %2728 = vmatmul.mubr.bf16.vlgmr.msra.gmra.mrb[20].mxu1 %v4516_v59  ;;  %v2600_v59 = vld [vmem:[#allocation2 + $0x650] sm:$0xff] }
 0x8cb   :  { %2737 = vmatpush1.bf16.msra.mxu1 %v2590_v24  ;;  %2768 = vmatprep.mubr.bf16.mxu1 %v4522_v17  ;;  %v2602_v17 = vld [vmem:[#allocation2 + $0x660] sm:$0xff]  ;;  %v2636_v24 = vld [vmem:[#allocation2 + $0x770] sm:$0xff] }
 0x8cc   :  { %2738 = vmatprep.subr.bf16.mxu1 %v2593_v25  ;;  %v2639_v25 = vld [vmem:[#allocation2 + $0x788] sm:$0xff] }
 0x8cf   :  { %2739 = vmatpush1.bf16.msra.mxu1 %v2592_v26  ;;  %v2638_v26 = vld [vmem:[#allocation2 + $0x780] sm:$0xff] }
 0x8d0   :  { %2740 = vmatprep.subr.bf16.mxu1 %v2595_v27  ;;  %v2641_v27 = vld [vmem:[#allocation2 + $0x798] sm:$0xff] }
 0x8d3   :  { %2741 = vmatpush1.bf16.msra.mxu1 %v2594_v28  ;;  %v2640_v28 = vld [vmem:[#allocation2 + $0x790] sm:$0xff] }
 0x8d4   :  { %2742 = vmatprep.subr.bf16.mxu1 %v2597_v29  ;;  %v2643_v29 = vld [vmem:[#allocation2 + $0x7a8] sm:$0xff] }
 0x8d7   :  { %2743 = vmatpush1.bf16.msra.mxu1 %v2596_v45  ;;  %v2642_v45 = vld [vmem:[#allocation2 + $0x7a0] sm:$0xff] }
 0x8d8   :  { %2744 = vmatprep.subr.bf16.mxu1 %v2599_v50  ;;  %v2645_v50 = vld [vmem:[#allocation2 + $0x7b8] sm:$0xff] }
 0x8db   :  { %2745 = vmatpush1.bf16.msra.mxu1 %v2598_v10  ;;  %v2644_v10 = vld [vmem:[#allocation2 + $0x7b0] sm:$0xff] }
 0x8dc   :  { %2746 = vmatprep.subr.bf16.mxu1 %v2601_v15  ;;  %v2647_v15 = vld [vmem:[#allocation2 + $0x7c8] sm:$0xff] }
 0x8df   :  { %2747 = vmatpush1.bf16.msra.mxu1 %v2600_v59  ;;  %v2646_v59 = vld [vmem:[#allocation2 + $0x7c0] sm:$0xff] }
 0x8e0   :  { %2748 = vmatprep.subr.bf16.mxu1 %v2603_v6  ;;  %v2649_v6 = vld [vmem:[#allocation2 + $0x7d8] sm:$0xff] }
 0x8e3   :  { %2749 = vmatpush1.bf16.msra.mxu1 %v2602_v17  ;;  %v2648_v17 = vld [vmem:[#allocation2 + $0x7d0] sm:$0xff] }
 0x8e4   :  { %2750 = vmatprep.subr.bf16.mxu1 %v2605_v22  ;;  %v2651_v22 = vld [vmem:[#allocation2 + $0x7e8] sm:$0xff] }
 0x8e7   :  { %2751 = vmatpush1.bf16.msra.mxu1 %v2604_v46  ;;  %v2650_v46 = vld [vmem:[#allocation2 + $0x7e0] sm:$0xff] }
 0x8e8   :  { %2752 = vmatprep.subr.bf16.mxu1 %v2607_v23  ;;  %v2653_v23 = vld [vmem:[#allocation2 + $0x7f8] sm:$0xff] }
 0x8eb   :  { %2753 = vmatpush1.bf16.msra.mxu1 %v2606_v11  ;;  %v2652_v11 = vld [vmem:[#allocation2 + $0x7f0] sm:$0xff] }
 0x8ec   :  { %2754 = vmatprep.subr.bf16.mxu1 %v2609_v14 }
 0x8ef   :  { %2755 = vmatpush1.bf16.msra.mxu1 %v2608_v30 }
 0x8f0   :  { %2756 = vmatprep.subr.bf16.mxu1 %v2611_v21 }
 0x8f3   :  { %2757 = vmatpush1.bf16.msra.mxu1 %v2610_v36 }
 0x8f4   :  { %2758 = vmatprep.subr.bf16.mxu1 %v2613_v38 }
 0x8f7   :  { %2759 = vmatpush1.bf16.msra.mxu1 %v2612_v7 }
 0x8f8   :  { %2760 = vmatprep.subr.bf16.mxu1 %v2615_v41 }
 0x8fb   :  { %2761 = vmatpush1.bf16.msra.mxu1 %v2614_v60 }
 0x8fc   :  { %2762 = vmatprep.subr.bf16.mxu1 %v2617_v43 }
 0x8ff   :  { %2763 = vmatpush1.bf16.msra.mxu1 %v2616_v34 }
 0x900   :  { %2764 = vmatprep.subr.bf16.mxu1 %v2619_v44 }
 0x903   :  { %2765 = vmatpush1.bf16.msra.mxu1 %v2618_v47 }
 0x904   :  { %2766 = vmatprep.subr.bf16.mxu1 %v2621_v51 }
 0x907   :  { %2767 = vmatpush1.bf16.msra.mxu1 %v2620_v42 }
 0x908   :  { %2777 = vmatprep.subr.bf16.mxu1 %v2623_v13 }
 0x90a   :  { %2769 = vmatmul.mubr.bf16.vlgmr.msra.gmra.mrb[20].mxu1 %v4520_v16  ;;  %v2632_v16 = vld [vmem:[#allocation2 + $0x750] sm:$0xff] }
 0x90b   :  { %2778 = vmatpush1.bf16.msra.mxu1 %v2622_v52  ;;  %2809 = vmatprep.mubr.bf16.mxu1 %v4526_v19  ;;  %v2634_v19 = vld [vmem:[#allocation2 + $0x760] sm:$0xff] }
 0x90c   :  { %2779 = vmatprep.subr.bf16.mxu1 %v2625_v53 }
 0x90f   :  { %2780 = vmatpush1.bf16.msra.mxu1 %v2624_v54 }
 0x910   :  { %2781 = vmatprep.subr.bf16.mxu1 %v2627_v56 }
 0x913   :  { %2782 = vmatpush1.bf16.msra.mxu1 %v2626_v61 }
 0x914   :  { %2783 = vmatprep.subr.bf16.mxu1 %v2629_v0 }
 0x917   :  { %2784 = vmatpush1.bf16.msra.mxu1 %v2628_v62 }
 0x918   :  { %2785 = vmatprep.subr.bf16.mxu1 %v2631_v35 }
 0x91b   :  { %2786 = vmatpush1.bf16.msra.mxu1 %v2630_v8 }
 0x91c   :  { %2787 = vmatprep.subr.bf16.mxu1 %v2633_v9 }
 0x91f   :  { %2788 = vmatpush1.bf16.msra.mxu1 %v2632_v16 }
 0x920   :  { %2789 = vmatprep.subr.bf16.mxu1 %v2635_v49 }
 0x923   :  { %2790 = vmatpush1.bf16.msra.mxu1 %v2634_v19 }
 0x924   :  { %2791 = vmatprep.subr.bf16.mxu1 %v2637_v20 }
 0x927   :  { %2792 = vmatpush1.bf16.msra.mxu1 %v2636_v24 }
 0x928   :  { %2793 = vmatprep.subr.bf16.mxu1 %v2639_v25 }
 0x92b   :  { %2794 = vmatpush1.bf16.msra.mxu1 %v2638_v26 }
 0x92c   :  { %2795 = vmatprep.subr.bf16.mxu1 %v2641_v27 }
 0x92f   :  { %2796 = vmatpush1.bf16.msra.mxu1 %v2640_v28 }
 0x930   :  { %2797 = vmatprep.subr.bf16.mxu1 %v2643_v29 }
 0x933   :  { %2798 = vmatpush1.bf16.msra.mxu1 %v2642_v45 }
 0x934   :  { %2799 = vmatprep.subr.bf16.mxu1 %v2645_v50 }
 0x937   :  { %2800 = vmatpush1.bf16.msra.mxu1 %v2644_v10 }
 0x938   :  { %2801 = vmatprep.subr.bf16.mxu1 %v2647_v15 }
 0x93b   :  { %2802 = vmatpush1.bf16.msra.mxu1 %v2646_v59 }
 0x93c   :  { %2803 = vmatprep.subr.bf16.mxu1 %v2649_v6 }
 0x93f   :  { %2804 = vmatpush1.bf16.msra.mxu1 %v2648_v17 }
 0x940   :  { %2805 = vmatprep.subr.bf16.mxu1 %v2651_v22 }
 0x943   :  { %2806 = vmatpush1.bf16.msra.mxu1 %v2650_v46 }
 0x944   :  { %2807 = vmatprep.subr.bf16.mxu1 %v2653_v23  ;;  %v2858_v23 = vrot.slane %v4363_v1, 6 }
 0x947   :  { %2808 = vmatpush1.bf16.msra.mxu1 %v2652_v11 }
 0x94a   :  { %2810 = vmatmul.mubr.bf16.vlgmr.msra.gmra.mrb[20].mxu1 %v4524_v18 }
 0xa1d   :  { %v2811_v14 = vpop.f32.mrb[20].mxu1 }
 0xa1e   :  { %v2818_v30 = vrot.slane %v2811_v14, 4  ;;  %v2832_v21 = vmul.f32 %v2811_v14, %v2811_v14  ;;  %v2813_v36 = vpop.f32.mrb[21].mxu1 }
 0xa1f   :  { %v2824_v38 = vrot.slane %v2813_v36, 4  ;;  %v2833_v7 = vmul.f32 %v2813_v36, %v2813_v36  ;;  %v2815_v41 = vpop.f32.mrb[22].mxu1 }
 0xa20   :  { %v2819_v60 = vadd.f32 %v2818_v30, %v2811_v14  ;;  %v2834_v43 = vrot.slane %v2832_v21, 4  ;;  %v2816_v34 = vpop.f32.mrb[23].mxu1 }
 0xa21   :  { %v2825_v44 = vadd.f32 %v2824_v38, %v2813_v36  ;;  %v2840_v47 = vrot.slane %v2833_v7, 4 }
 0xa22   :  { %v2820_v51 = vrot.slane %v2819_v60, 2  ;;  %v2835_v42 = vadd.f32 %v2834_v43, %v2832_v21 }
 0xa23   :  { %v2826_v13 = vrot.slane %v2825_v44, 2  ;;  %v2841_v52 = vadd.f32 %v2840_v47, %v2833_v7  ;;  %v2892_v47 = vrot.slane %v4365_v2, 6 }
 0xa24   :  { %v2821_v53 = vadd.f32 %v2820_v51, %v2819_v60  ;;  %v2836_v54 = vrot.slane %v2835_v42, 2 }
 0xa25   :  { %v2827_v56 = vadd.f32 %v2826_v13, %v2825_v44  ;;  %v2842_v18 = vrot.slane %v2841_v52, 2 }
 0xa26   :  { %v2822_v61 = vrot.slane %v2821_v53, 1  ;;  %v2837_v0 = vadd.f32 %v2836_v54, %v2835_v42 }
 0xa27   :  { %v2828_v62 = vrot.slane %v2827_v56, 1  ;;  %v2843_v35 = vadd.f32 %v2842_v18, %v2841_v52 }
 0xa28   :  { %v2823_v8 = vadd.f32 %v2822_v61, %v2821_v53  ;;  %v2838_v9 = vrot.slane %v2837_v0, 1 }
 0xa29   :  { %v2829_v16 = vadd.f32 %v2828_v62, %v2827_v56  ;;  %v2844_v49 = vrot.slane %v2843_v35, 1 }
 0xa2a   :  { %v2830_v19 = vmul.f32 0.125, %v2823_v8  ;;  %v2839_v20 = vadd.f32 %v2838_v9, %v2837_v0 }
 0xa2b   :  { %v2831_v24 = vmul.f32 0.125, %v2829_v16  ;;  %v2845_v25 = vadd.f32 %v2844_v49, %v2843_v35 }
 0xa2c   :  { %v2846_v26 = vmul.f32 0.125, %v2839_v20  ;;  %v2848_v27 = vmul.f32 %v2830_v19, %v2830_v19 }
 0xa2d   :  { %v2847_v28 = vmul.f32 0.125, %v2845_v25  ;;  %v2849_v29 = vmul.f32 %v2831_v24, %v2831_v24 }
 0xa2e   :  { %v2850_v45 = vsub.f32 %v2846_v26, %v2848_v27 }
 0xa2f   :  { %v2851_v50 = vsub.f32 %v2847_v28, %v2849_v29 }
 0xa30   :  { %v2852_v10 = vmax.f32 %v2850_v45, 0.0 }
 0xa31   :  { %v2853_v15 = vmax.f32 %v2851_v50, 0.0 }
 0xa32   :  { %v2854_v59 = vadd.f32 1e-05, %v2852_v10 }
 0xa33   :  { %v2855_v6 = vadd.f32 1e-05, %v2853_v15 }
 0xa34   :  { %3848 = vrsqrt.f32 %v2854_v59 }
 0xa35   :  { %3850 = vrsqrt.f32 %v2855_v6 }
 0xa3e   :  { %v3849_v17 = vpop.eup %3848 }
 0xa3f   :  { %v3851_v22 = vpop.eup %3850 }
 0xa40   :  { %v2862_v46 = vcombine.low %v3849_v17, %v3851_v22 }
 0xa42   :  { %v2869_v11 = vrot.slane %v2862_v46, %v4455_v37 }
 0xa44   :  { %v2876_v30 = vrot.slane %v2869_v11, %v4455_v37 }
 0xa46   :  { %v2878_v21 = vmul.f32 %v2876_v30, %v2858_v23 }
 0xa48   :  { %v2883_v38 = vrot.slane %v2878_v21, %v4477_v55  ;;  %v2887_v7 = vrot.slane %v2878_v21, %v4480_v57 }
 0xa4a   :  { %v2890_v41 = vmul.f32 %v2883_v38, %v2830_v19  ;;  %v2891_v60 = vmul.f32 %v2887_v7, %v2831_v24  ;;  %v2913_v43 = vmul.f32 %v2883_v38, %v2811_v14  ;;  %v2914_v34 = vmul.f32 %v2887_v7, %v2813_v36 }
 0xa4c   :  { %v2896_v44 = vcombine.low %v2890_v41, %v2891_v60 }
 0xa4e   :  { %v2903_v51 = vrot.slane %v2896_v44, %v4455_v37 }
 0xa50   :  { %v2910_v1 = vrot.slane %v2903_v51, %v4455_v37 }
 0xa52   :  { %v2912_v42 = vsub.f32 %v2892_v47, %v2910_v1 }
 0xa54   :  { %v2919_v13 = vrot.slane %v2912_v42, %v4477_v55  ;;  %v2923_v52 = vrot.slane %v2912_v42, %v4480_v57 }
 0xa56   :  { %v4669_v53 = vadd.f32 %v2919_v13, %v2913_v43  ;;  %v4671_v54 = vadd.f32 %v2923_v52, %v2914_v34 }
 0xa58   :  { %v2928_v56 = vmax.f32 %v4669_v53, 0.0  ;;  %v2929_v14 = vmax.f32 %v4671_v54, 0.0 }
 0xa59   :  { %4110 = dma.done.wait [#allocation5 + $0x2], 16384 }
 0xa5a   :  { %4111 = vsyncadd [#allocation5 + $0x2], 4294950912  ;;  %v3703_v2 = vpack.c.bf16 %v1612_v48, %v1612_v48  ;;  %v2946_v36 = vld [vmem:[#allocation3 + $0x8] sm:$0xff]  ;;  %v2945_v18 = vld [vmem:[#allocation3] sm:$0xff]  ;;  %v3702_v38 = vpack.c.bf16 %v1611_v5, %v1611_v5  ;;  %v3705_v7 = vpack.c.bf16 %v2064_v39, %v2064_v39  ;;  %s4143_s4 = smov [#allocation21]  }
 0xa5b   :  { %v2948_v61 = vld [vmem:[#allocation3 + $0x18] sm:$0xff]  ;;  %3101 = vmatprep.subr.bf16.mxu0 %v2946_v36  ;;  %v2947_v0 = vld [vmem:[#allocation3 + $0x10] sm:$0xff]  ;;  %v2950_v62 = vld [vmem:[#allocation3 + $0x28] sm:$0xff]  ;;  %s3559_s8 = sshll.u32 %s4143_s4, 4  ;;  %s3560_s8 = int_to_ptr.vmem [resolvable:$true] %s3559_s8 }
 0xa5c   :  { %3133 = vmatprep.mubr.bf16.mxu0 %v3703_v2  ;;  %3102 = vmatpush1.bf16.msra.mxu0 %v2945_v18  ;;  %v2949_v35 = vld [vmem:[#allocation3 + $0x20] sm:$0xff]  ;;  %v2952_v8 = vld [vmem:[#allocation3 + $0x38] sm:$0xff]  ;;  %v2951_v9 = vld [vmem:[#allocation3 + $0x30] sm:$0xff]  ;;  %s4070_s28 = scalar_lea.vmem %s3560_s8, 128  ;;  %p4075_p3 = scmp.lt.s32.totalorder %s3560_s8, %s3560_s8 }
 0xa5d   :  { %3103 = vmatprep.subr.bf16.mxu0 %v2948_v61  ;;  %v2954_v16 = vld [vmem:[#allocation3 + $0x48] sm:$0xff]  ;;  %v2953_v4 = vld [vmem:[#allocation3 + $0x40] sm:$0xff]  ;;  %v2956_v48 = vld [vmem:[#allocation3 + $0x58] sm:$0xff]  ;;  %p4071_p2 = scmp.ne.s32.totalorder %s3560_s8, %s4070_s28  ;;  %p4076_p4 = scmp.lt.s32.totalorder %s4070_s28, %s4070_s28 }
 0xa5e   :  { %v2955_v49 = vld [vmem:[#allocation3 + $0x50] sm:$0xff]  ;;  %v2958_v19 = vld [vmem:[#allocation3 + $0x68] sm:$0xff]  ;;  %v2957_v20 = vld [vmem:[#allocation3 + $0x60] sm:$0xff] }
 0xa5f   :  { %v2960_v24 = vld [vmem:[#allocation3 + $0x78] sm:$0xff]  ;;  %v2959_v25 = vld [vmem:[#allocation3 + $0x70] sm:$0xff]  ;;  %v2962_v26 = vld [vmem:[#allocation3 + $0x88] sm:$0xff]  ;;  %p4077_p5 = por %p4076_p4, %p4075_p3 }
 0xa60   :  { %3104 = vmatpush1.bf16.msra.mxu0 %v2947_v0  ;;  %v2961_v27 = vld [vmem:[#allocation3 + $0x80] sm:$0xff]  ;;  %v2964_v28 = vld [vmem:[#allocation3 + $0x98] sm:$0xff]  ;;  %v2963_v29 = vld [vmem:[#allocation3 + $0x90] sm:$0xff] }
 0xa61   :  { %3105 = vmatprep.subr.bf16.mxu0 %v2950_v62  ;;  %v2966_v45 = vld [vmem:[#allocation3 + $0xa8] sm:$0xff]  ;;  %v2965_v50 = vld [vmem:[#allocation3 + $0xa0] sm:$0xff]  ;;  %v2968_v10 = vld [vmem:[#allocation3 + $0xb8] sm:$0xff]  ;;  %p4078_p6 = pnand %p4077_p5, %p4071_p2 }
 0xa62   :  { %v2967_v15 = vld [vmem:[#allocation3 + $0xb0] sm:$0xff]  ;;  %v2970_v59 = vld [vmem:[#allocation3 + $0xc8] sm:$0xff]  ;;  %v2969_v6 = vld [vmem:[#allocation3 + $0xc0] sm:$0xff] }
 0xa63   :  { %v2972_v17 = vld [vmem:[#allocation3 + $0xd8] sm:$0xff]  ;;  %v2971_v22 = vld [vmem:[#allocation3 + $0xd0] sm:$0xff]  ;;  %v2974_v46 = vld [vmem:[#allocation3 + $0xe8] sm:$0xff] }
 0xa64   :  { %3106 = vmatpush1.bf16.msra.mxu0 %v2949_v35  ;;  %v2973_v23 = vld [vmem:[#allocation3 + $0xe0] sm:$0xff]  ;;  %v2976_v11 = vld [vmem:[#allocation3 + $0xf8] sm:$0xff]  ;;  %v2975_v30 = vld [vmem:[#allocation3 + $0xf0] sm:$0xff] }
 0xa65   :  { %3107 = vmatprep.subr.bf16.mxu0 %v2952_v8  ;;  %v2978_v21 = vld [vmem:[#allocation3 + $0x108] sm:$0xff]  ;;  %v2977_v41 = vld [vmem:[#allocation3 + $0x100] sm:$0xff]  ;;  %v2980_v60 = vld [vmem:[#allocation3 + $0x118] sm:$0xff] }
 0xa66   :  { %v2979_v43 = vld [vmem:[#allocation3 + $0x110] sm:$0xff]  ;;  %v2982_v34 = vld [vmem:[#allocation3 + $0x128] sm:$0xff]  ;;  %v2981_v44 = vld [vmem:[#allocation3 + $0x120] sm:$0xff] }
 0xa67   :  { %v2984_v63 = vld [vmem:[#allocation3 + $0x138] sm:$0xff]  ;;  %v2983_v5 = vld [vmem:[#allocation3 + $0x130] sm:$0xff]  ;;  %v2986_v47 = vld [vmem:[#allocation3 + $0x148] sm:$0xff] }
 0xa68   :  { %3108 = vmatpush1.bf16.msra.mxu0 %v2951_v9  ;;  %v2985_v3 = vld [vmem:[#allocation3 + $0x140] sm:$0xff]  ;;  %v2988_v39 = vld [vmem:[#allocation3 + $0x158] sm:$0xff]  ;;  %v2987_v51 = vld [vmem:[#allocation3 + $0x150] sm:$0xff] }
 0xa69   :  { %3109 = vmatprep.subr.bf16.mxu0 %v2954_v16  ;;  %v2990_v1 = vld [vmem:[#allocation3 + $0x168] sm:$0xff]  ;;  %v2989_v42 = vld [vmem:[#allocation3 + $0x160] sm:$0xff]  ;;  %v2992_v13 = vld [vmem:[#allocation3 + $0x178] sm:$0xff] }
 0xa6a   :  { %v2991_v52 = vld [vmem:[#allocation3 + $0x170] sm:$0xff]  ;;  %v2994_v2 = vld [vmem:[#allocation3 + $0x188] sm:$0xff]  ;;  %v2993_v36 = vld [vmem:[#allocation3 + $0x180] sm:$0xff] }
 0xa6b   :  { %v2996_v18 = vld [vmem:[#allocation3 + $0x198] sm:$0xff]  ;;  %v2995_v61 = vld [vmem:[#allocation3 + $0x190] sm:$0xff]  ;;  %v2998_v0 = vld [vmem:[#allocation3 + $0x1a8] sm:$0xff] }
 0xa6c   :  { %3110 = vmatpush1.bf16.msra.mxu0 %v2953_v4  ;;  %v2997_v62 = vld [vmem:[#allocation3 + $0x1a0] sm:$0xff]  ;;  %v3000_v35 = vld [vmem:[#allocation3 + $0x1b8] sm:$0xff]  ;;  %v2999_v8 = vld [vmem:[#allocation3 + $0x1b0] sm:$0xff] }
 0xa6d   :  { %3111 = vmatprep.subr.bf16.mxu0 %v2956_v48  ;;  %v3002_v9 = vld [vmem:[#allocation3 + $0x1c8] sm:$0xff]  ;;  %v3001_v16 = vld [vmem:[#allocation3 + $0x1c0] sm:$0xff]  ;;  %v3004_v4 = vld [vmem:[#allocation3 + $0x1d8] sm:$0xff] }
 0xa6e   :  { %v3003_v48 = vld [vmem:[#allocation3 + $0x1d0] sm:$0xff]  ;;  %v3016_v58 = vld [vmem:[#allocation3 + $0x238] sm:$0xff]  ;;  %v3017_v33 = vld [vmem:[#allocation3 + $0x240] sm:$0xff] }
 0xa6f   :  { %v3048_v31 = vld [vmem:[#allocation3 + $0x338] sm:$0xff]  ;;  %v3049_v54 = vld [vmem:[#allocation3 + $0x340] sm:$0xff] }
 0xa70   :  { %3112 = vmatpush1.bf16.msra.mxu0 %v2955_v49  ;;  %v3006_v49 = vld [vmem:[#allocation3 + $0x1e8] sm:$0xff] }
 0xa71   :  { %3113 = vmatprep.subr.bf16.mxu0 %v2958_v19  ;;  %v3005_v19 = vld [vmem:[#allocation3 + $0x1e0] sm:$0xff] }
 0xa72   :  { %v3860_v53 = vld [vmem:[#allocation18 + $0x60] sm:$0xff]  }
 0xa74   :  { %3114 = vmatpush1.bf16.msra.mxu0 %v2957_v20  ;;  %v3008_v20 = vld [vmem:[#allocation3 + $0x1f8] sm:$0xff] }
 0xa75   :  { %3115 = vmatprep.subr.bf16.mxu0 %v2960_v24  ;;  %v3007_v24 = vld [vmem:[#allocation3 + $0x1f0] sm:$0xff] }
 0xa78   :  { %3116 = vmatpush1.bf16.msra.mxu0 %v2959_v25  ;;  %v3010_v25 = vld [vmem:[#allocation3 + $0x208] sm:$0xff] }
 0xa79   :  { %3117 = vmatprep.subr.bf16.mxu0 %v2962_v26  ;;  %v3704_v26 = vpack.c.bf16 %v2063_v32, %v2063_v32  ;;  %v3015_v32 = vld [vmem:[#allocation3 + $0x230] sm:$0xff] }
 0xa7c   :  { %3118 = vmatpush1.bf16.msra.mxu0 %v2961_v27  ;;  %v3707_v27 = vpack.c.bf16 %v2514_v12, %v2514_v12  ;;  %v3020_v12 = vld [vmem:[#allocation3 + $0x258] sm:$0xff] }
 0xa7d   :  { %3119 = vmatprep.subr.bf16.mxu0 %v2964_v28  ;;  %v3009_v28 = vld [vmem:[#allocation3 + $0x200] sm:$0xff] }
 0xa80   :  { %3120 = vmatpush1.bf16.msra.mxu0 %v2963_v29  ;;  %v3012_v29 = vld [vmem:[#allocation3 + $0x218] sm:$0xff] }
 0xa81   :  { %3121 = vmatprep.subr.bf16.mxu0 %v2966_v45  ;;  %v3011_v45 = vld [vmem:[#allocation3 + $0x210] sm:$0xff] }
 0xa84   :  { %3122 = vmatpush1.bf16.msra.mxu0 %v2965_v50  ;;  %v3014_v50 = vld [vmem:[#allocation3 + $0x228] sm:$0xff] }
 0xa85   :  { %3123 = vmatprep.subr.bf16.mxu0 %v2968_v10  ;;  %v3013_v10 = vld [vmem:[#allocation3 + $0x220] sm:$0xff] }
 0xa88   :  { %3124 = vmatpush1.bf16.msra.mxu0 %v2967_v15  ;;  %v3018_v15 = vld [vmem:[#allocation3 + $0x248] sm:$0xff] }
 0xa89   :  { %3125 = vmatprep.subr.bf16.mxu0 %v2970_v59  ;;  %v3019_v59 = vld [vmem:[#allocation3 + $0x250] sm:$0xff] }
 0xa8c   :  { %3126 = vmatpush1.bf16.msra.mxu0 %v2969_v6  ;;  %v3022_v6 = vld [vmem:[#allocation3 + $0x268] sm:$0xff] }
 0xa8d   :  { %3127 = vmatprep.subr.bf16.mxu0 %v2972_v17  ;;  %v3021_v17 = vld [vmem:[#allocation3 + $0x260] sm:$0xff] }
 0xa90   :  { %3128 = vmatpush1.bf16.msra.mxu0 %v2971_v22  ;;  %v3024_v22 = vld [vmem:[#allocation3 + $0x278] sm:$0xff] }
 0xa91   :  { %3129 = vmatprep.subr.bf16.mxu0 %v2974_v46  ;;  %v3023_v46 = vld [vmem:[#allocation3 + $0x270] sm:$0xff] }
 0xa94   :  { %3130 = vmatpush1.bf16.msra.mxu0 %v2973_v23  ;;  %v3026_v23 = vld [vmem:[#allocation3 + $0x288] sm:$0xff] }
 0xa95   :  { %3131 = vmatprep.subr.bf16.mxu0 %v2976_v11  ;;  %v3025_v11 = vld [vmem:[#allocation3 + $0x280] sm:$0xff] }
 0xa98   :  { %3132 = vmatpush1.bf16.msra.mxu0 %v2975_v30  ;;  %v3028_v30 = vld [vmem:[#allocation3 + $0x298] sm:$0xff] }
 0xa99   :  { %3142 = vmatprep.subr.bf16.mxu0 %v2978_v21  ;;  %v3027_v21 = vld [vmem:[#allocation3 + $0x290] sm:$0xff] }
 0xa9b   :  { %3134 = vmatmul.mubr.bf16.vlgmr.msra.gmra.mrb[12].mxu0 %v3702_v38  ;;  %v3030_v38 = vld [vmem:[#allocation3 + $0x2a8] sm:$0xff] }
 0xa9c   :  { %3143 = vmatpush1.bf16.msra.mxu0 %v2977_v41  ;;  %3174 = vmatprep.mubr.bf16.mxu0 %v3705_v7  ;;  %v3029_v7 = vld [vmem:[#allocation3 + $0x2a0] sm:$0xff]  ;;  %v3032_v41 = vld [vmem:[#allocation3 + $0x2b8] sm:$0xff] }
 0xa9d   :  { %3144 = vmatprep.subr.bf16.mxu0 %v2980_v60  ;;  %v3031_v60 = vld [vmem:[#allocation3 + $0x2b0] sm:$0xff] }
 0xaa0   :  { %3145 = vmatpush1.bf16.msra.mxu0 %v2979_v43  ;;  %v3034_v43 = vld [vmem:[#allocation3 + $0x2c8] sm:$0xff] }
 0xaa1   :  { %3146 = vmatprep.subr.bf16.mxu0 %v2982_v34  ;;  %v3033_v34 = vld [vmem:[#allocation3 + $0x2c0] sm:$0xff] }
 0xaa4   :  { %3147 = vmatpush1.bf16.msra.mxu0 %v2981_v44  ;;  %v3036_v44 = vld [vmem:[#allocation3 + $0x2d8] sm:$0xff] }
 0xaa5   :  { %3148 = vmatprep.subr.bf16.mxu0 %v2984_v63  ;;  %v3035_v63 = vld [vmem:[#allocation3 + $0x2d0] sm:$0xff] }
 0xaa8   :  { %3149 = vmatpush1.bf16.msra.mxu0 %v2983_v5  ;;  %v3038_v5 = vld [vmem:[#allocation3 + $0x2e8] sm:$0xff] }
 0xaa9   :  { %3150 = vmatprep.subr.bf16.mxu0 %v2986_v47  ;;  %v3037_v47 = vld [vmem:[#allocation3 + $0x2e0] sm:$0xff] }
 0xaac   :  { %3151 = vmatpush1.bf16.msra.mxu0 %v2985_v3  ;;  %v3040_v3 = vld [vmem:[#allocation3 + $0x2f8] sm:$0xff] }
 0xaad   :  { %3152 = vmatprep.subr.bf16.mxu0 %v2988_v39  ;;  %v3039_v39 = vld [vmem:[#allocation3 + $0x2f0] sm:$0xff] }
 0xab0   :  { %3153 = vmatpush1.bf16.msra.mxu0 %v2987_v51  ;;  %v3042_v51 = vld [vmem:[#allocation3 + $0x308] sm:$0xff] }
 0xab1   :  { %3154 = vmatprep.subr.bf16.mxu0 %v2990_v1  ;;  %v3706_v1 = vpack.c.bf16 %v2513_v40, %v2513_v40  ;;  %v3047_v40 = vld [vmem:[#allocation3 + $0x330] sm:$0xff] }
 0xab4   :  { %3155 = vmatpush1.bf16.msra.mxu0 %v2989_v42  ;;  %v3709_v42 = vpack.c.bf16 %v2929_v14, %v2929_v14  ;;  %v3052_v14 = vld [vmem:[#allocation3 + $0x358] sm:$0xff] }
 0xab5   :  { %3156 = vmatprep.subr.bf16.mxu0 %v2992_v13  ;;  %v3041_v13 = vld [vmem:[#allocation3 + $0x300] sm:$0xff] }
 0xab8   :  { %3157 = vmatpush1.bf16.msra.mxu0 %v2991_v52  ;;  %v3044_v52 = vld [vmem:[#allocation3 + $0x318] sm:$0xff] }
 0xab9   :  { %3158 = vmatprep.subr.bf16.mxu0 %v2994_v2  ;;  %v3043_v2 = vld [vmem:[#allocation3 + $0x310] sm:$0xff] }
 0xabc   :  { %3159 = vmatpush1.bf16.msra.mxu0 %v2993_v36  ;;  %v3046_v36 = vld [vmem:[#allocation3 + $0x328] sm:$0xff] }
 0xabd   :  { %3160 = vmatprep.subr.bf16.mxu0 %v2996_v18  ;;  %v3045_v18 = vld [vmem:[#allocation3 + $0x320] sm:$0xff] }
 0xac0   :  { %3161 = vmatpush1.bf16.msra.mxu0 %v2995_v61  ;;  %v3050_v61 = vld [vmem:[#allocation3 + $0x348] sm:$0xff] }
 0xac1   :  { %3162 = vmatprep.subr.bf16.mxu0 %v2998_v0  ;;  %v3051_v0 = vld [vmem:[#allocation3 + $0x350] sm:$0xff] }
 0xac4   :  { %3163 = vmatpush1.bf16.msra.mxu0 %v2997_v62  ;;  %v3054_v62 = vld [vmem:[#allocation3 + $0x368] sm:$0xff] }
 0xac5   :  { %3164 = vmatprep.subr.bf16.mxu0 %v3000_v35  ;;  %v3053_v35 = vld [vmem:[#allocation3 + $0x360] sm:$0xff] }
 0xac8   :  { %3165 = vmatpush1.bf16.msra.mxu0 %v2999_v8  ;;  %v3056_v8 = vld [vmem:[#allocation3 + $0x378] sm:$0xff] }
 0xac9   :  { %3166 = vmatprep.subr.bf16.mxu0 %v3002_v9  ;;  %v3055_v9 = vld [vmem:[#allocation3 + $0x370] sm:$0xff] }
 0xacc   :  { %3167 = vmatpush1.bf16.msra.mxu0 %v3001_v16  ;;  %v3058_v16 = vld [vmem:[#allocation3 + $0x388] sm:$0xff] }
 0xacd   :  { %3168 = vmatprep.subr.bf16.mxu0 %v3004_v4  ;;  %v3057_v4 = vld [vmem:[#allocation3 + $0x380] sm:$0xff] }
 0xad0   :  { %3169 = vmatpush1.bf16.msra.mxu0 %v3003_v48  ;;  %v3060_v48 = vld [vmem:[#allocation3 + $0x398] sm:$0xff] }
 0xad1   :  { %3170 = vmatprep.subr.bf16.mxu0 %v3006_v49  ;;  %v3059_v49 = vld [vmem:[#allocation3 + $0x390] sm:$0xff] }
 0xad4   :  { %3171 = vmatpush1.bf16.msra.mxu0 %v3005_v19  ;;  %v3062_v19 = vld [vmem:[#allocation3 + $0x3a8] sm:$0xff] }
 0xad5   :  { %3172 = vmatprep.subr.bf16.mxu0 %v3008_v20  ;;  %v3061_v20 = vld [vmem:[#allocation3 + $0x3a0] sm:$0xff] }
 0xad8   :  { %3173 = vmatpush1.bf16.msra.mxu0 %v3007_v24  ;;  %v3064_v24 = vld [vmem:[#allocation3 + $0x3b8] sm:$0xff] }
 0xad9   :  { %3183 = vmatprep.subr.bf16.mxu0 %v3010_v25  ;;  %v3063_v25 = vld [vmem:[#allocation3 + $0x3b0] sm:$0xff] }
 0xadb   :  { %3175 = vmatmul.mubr.bf16.vlgmr.msra.gmra.mrb[12].mxu0 %v3704_v26  ;;  %v3066_v26 = vld [vmem:[#allocation3 + $0x3c8] sm:$0xff] }
 0xadc   :  { %3184 = vmatpush1.bf16.msra.mxu0 %v3009_v28  ;;  %3215 = vmatprep.mubr.bf16.mxu0 %v3707_v27  ;;  %v3065_v27 = vld [vmem:[#allocation3 + $0x3c0] sm:$0xff]  ;;  %v3068_v28 = vld [vmem:[#allocation3 + $0x3d8] sm:$0xff] }
 0xadd   :  { %3185 = vmatprep.subr.bf16.mxu0 %v3012_v29  ;;  %v3067_v29 = vld [vmem:[#allocation3 + $0x3d0] sm:$0xff] }
 0xae0   :  { %3186 = vmatpush1.bf16.msra.mxu0 %v3011_v45  ;;  %v3070_v45 = vld [vmem:[#allocation3 + $0x3e8] sm:$0xff] }
 0xae1   :  { %3187 = vmatprep.subr.bf16.mxu0 %v3014_v50  ;;  %v3069_v50 = vld [vmem:[#allocation3 + $0x3e0] sm:$0xff] }
 0xae4   :  { %3188 = vmatpush1.bf16.msra.mxu0 %v3013_v10  ;;  %v3072_v10 = vld [vmem:[#allocation3 + $0x3f8] sm:$0xff] }
 0xae5   :  { %3189 = vmatprep.subr.bf16.mxu0 %v3016_v58  ;;  %v3071_v58 = vld [vmem:[#allocation3 + $0x3f0] sm:$0xff] }
 0xae8   :  { %3190 = vmatpush1.bf16.msra.mxu0 %v3015_v32  ;;  %v3708_v32 = vpack.c.bf16 %v2928_v56, %v2928_v56  ;;  %v3861_v56 = vld [vmem:[#allocation18 + $0x20] sm:$0xff]  }
 0xae9   :  { %3191 = vmatprep.subr.bf16.mxu0 %v3018_v15  ;;  %v3852_v15 = vld [vmem:[#allocation18 + $0x40] sm:$0xff]  }
 0xaea   :  { %3710 = vmatprep.subr.bf16.mxu1 %v3852_v15 }
 0xaec   :  { %3192 = vmatpush1.bf16.msra.mxu0 %v3017_v33  ;;  %v3853_v33 = vld [vmem:[#allocation18] sm:$0xff]  }
 0xaed   :  { %3193 = vmatprep.subr.bf16.mxu0 %v3020_v12  ;;  %v3854_v12 = vld [vmem:[#allocation18 + $0x48] sm:$0xff]   ;;  %3711 = vmatpush3.bf16.msra.mxu1 %v3853_v33  ;;  %v3265_v33 = vld [vmem:[#allocation15] sm:$0x3] }
 0xaee   :  { %3712 = vmatprep.subr.bf16.mxu1 %v3854_v12 }
 0xaf0   :  { %3194 = vmatpush1.bf16.msra.mxu0 %v3019_v59  ;;  %v3855_v59 = vld [vmem:[#allocation18 + $0x8] sm:$0xff]  }
 0xaf1   :  { %3195 = vmatprep.subr.bf16.mxu0 %v3022_v6  ;;  %v3856_v6 = vld [vmem:[#allocation18 + $0x50] sm:$0xff]   ;;  %3713 = vmatpush3.bf16.msra.mxu1 %v3855_v59 }
 0xaf2   :  { %3714 = vmatprep.subr.bf16.mxu1 %v3856_v6 }
 0xaf4   :  { %3196 = vmatpush1.bf16.msra.mxu0 %v3021_v17  ;;  %v3857_v17 = vld [vmem:[#allocation18 + $0x10] sm:$0xff]  }
 0xaf5   :  { %3197 = vmatprep.subr.bf16.mxu0 %v3024_v22  ;;  %v3858_v22 = vld [vmem:[#allocation18 + $0x58] sm:$0xff]   ;;  %3715 = vmatpush3.bf16.msra.mxu1 %v3857_v17 }
 0xaf6   :  { %3716 = vmatprep.subr.bf16.mxu1 %v3858_v22 }
 0xaf8   :  { %3198 = vmatpush1.bf16.msra.mxu0 %v3023_v46  ;;  %v3859_v46 = vld [vmem:[#allocation18 + $0x18] sm:$0xff]  }
 0xaf9   :  { %3199 = vmatprep.subr.bf16.mxu0 %v3026_v23  ;;  %3717 = vmatpush3.bf16.msra.mxu1 %v3859_v46  ;;  %v3862_v23 = vld [vmem:[#allocation18 + $0x68] sm:$0xff]  }
 0xafa   :  { %3718 = vmatprep.subr.bf16.mxu1 %v3860_v53 }
 0xafc   :  { %3200 = vmatpush1.bf16.msra.mxu0 %v3025_v11  ;;  %v3863_v11 = vld [vmem:[#allocation18 + $0x28] sm:$0xff]  }
 0xafd   :  { %3201 = vmatprep.subr.bf16.mxu0 %v3028_v30  ;;  %3719 = vmatpush3.bf16.msra.mxu1 %v3861_v56  ;;  %v3864_v30 = vld [vmem:[#allocation18 + $0x70] sm:$0xff]  }
 0xafe   :  { %3720 = vmatprep.subr.bf16.mxu1 %v3862_v23 }
 0xb00   :  { %3202 = vmatpush1.bf16.msra.mxu0 %v3027_v21  ;;  %v3865_v21 = vld [vmem:[#allocation18 + $0x30] sm:$0xff]  }
 0xb01   :  { %3203 = vmatprep.subr.bf16.mxu0 %v3030_v38  ;;  %3721 = vmatpush3.bf16.msra.mxu1 %v3863_v11  ;;  %v3866_v38 = vld [vmem:[#allocation18 + $0x78] sm:$0xff]  }
 0xb02   :  { %3722 = vmatprep.subr.bf16.mxu1 %v3864_v30  ;;  %v3266_v30 = vld [vmem:[#allocation17] sm:$0x3] }
 0xb04   :  { %3204 = vmatpush1.bf16.msra.mxu0 %v3029_v7  ;;  %v3867_v7 = vld [vmem:[#allocation18 + $0x38] sm:$0xff]  }
 0xb05   :  { %3205 = vmatprep.subr.bf16.mxu0 %v3032_v41  ;;  %3723 = vmatpush3.bf16.msra.mxu1 %v3865_v21 }
 0xb06   :  { %3724 = vmatprep.subr.bf16.mxu1 %v3866_v38 }
 0xb08   :  { %3206 = vmatpush1.bf16.msra.mxu0 %v3031_v60 }
 0xb09   :  { %3207 = vmatprep.subr.bf16.mxu0 %v3034_v43  ;;  %3725 = vmatpush3.bf16.msra.mxu1 %v3867_v7 }
 0xb0c   :  { %3208 = vmatpush1.bf16.msra.mxu0 %v3033_v34 }
 0xb0d   :  { %3209 = vmatprep.subr.bf16.mxu0 %v3036_v44 }
 0xb10   :  { %3210 = vmatpush1.bf16.msra.mxu0 %v3035_v63 }
 0xb11   :  { %3211 = vmatprep.subr.bf16.mxu0 %v3038_v5 }
 0xb14   :  { %3212 = vmatpush1.bf16.msra.mxu0 %v3037_v47 }
 0xb15   :  { %3213 = vmatprep.subr.bf16.mxu0 %v3040_v3 }
 0xb18   :  { %3214 = vmatpush1.bf16.msra.mxu0 %v3039_v39 }
 0xb19   :  { %3224 = vmatprep.subr.bf16.mxu0 %v3042_v51 }
 0xb1b   :  { %3216 = vmatmul.mubr.bf16.vlgmr.msra.gmra.mrb[12].mxu0 %v3706_v1 }
 0xb1c   :  { %3225 = vmatpush1.bf16.msra.mxu0 %v3041_v13  ;;  %3256 = vmatprep.mubr.bf16.mxu0 %v3709_v42 }
 0xb1d   :  { %3226 = vmatprep.subr.bf16.mxu0 %v3044_v52 }
 0xb20   :  { %3227 = vmatpush1.bf16.msra.mxu0 %v3043_v2 }
 0xb21   :  { %3228 = vmatprep.subr.bf16.mxu0 %v3046_v36 }
 0xb24   :  { %3229 = vmatpush1.bf16.msra.mxu0 %v3045_v18 }
 0xb25   :  { %3230 = vmatprep.subr.bf16.mxu0 %v3048_v31 }
 0xb28   :  { %3231 = vmatpush1.bf16.msra.mxu0 %v3047_v40 }
 0xb29   :  { %3232 = vmatprep.subr.bf16.mxu0 %v3050_v61 }
 0xb2c   :  { %3233 = vmatpush1.bf16.msra.mxu0 %v3049_v54 }
 0xb2d   :  { %3234 = vmatprep.subr.bf16.mxu0 %v3052_v14 }
 0xb30   :  { %3235 = vmatpush1.bf16.msra.mxu0 %v3051_v0 }
 0xb31   :  { %3236 = vmatprep.subr.bf16.mxu0 %v3054_v62 }
 0xb34   :  { %3237 = vmatpush1.bf16.msra.mxu0 %v3053_v35 }
 0xb35   :  { %3238 = vmatprep.subr.bf16.mxu0 %v3056_v8 }
 0xb38   :  { %3239 = vmatpush1.bf16.msra.mxu0 %v3055_v9 }
 0xb39   :  { %3240 = vmatprep.subr.bf16.mxu0 %v3058_v16 }
 0xb3c   :  { %3241 = vmatpush1.bf16.msra.mxu0 %v3057_v4 }
 0xb3d   :  { %3242 = vmatprep.subr.bf16.mxu0 %v3060_v48 }
 0xb40   :  { %3243 = vmatpush1.bf16.msra.mxu0 %v3059_v49 }
 0xb41   :  { %3244 = vmatprep.subr.bf16.mxu0 %v3062_v19 }
 0xb44   :  { %3245 = vmatpush1.bf16.msra.mxu0 %v3061_v20 }
 0xb45   :  { %3246 = vmatprep.subr.bf16.mxu0 %v3064_v24 }
 0xb48   :  { %3247 = vmatpush1.bf16.msra.mxu0 %v3063_v25 }
 0xb49   :  { %3248 = vmatprep.subr.bf16.mxu0 %v3066_v26 }
 0xb4c   :  { %3249 = vmatpush1.bf16.msra.mxu0 %v3065_v27 }
 0xb4d   :  { %3250 = vmatprep.subr.bf16.mxu0 %v3068_v28 }
 0xb50   :  { %3251 = vmatpush1.bf16.msra.mxu0 %v3067_v29 }
 0xb51   :  { %3252 = vmatprep.subr.bf16.mxu0 %v3070_v45 }
 0xb54   :  { %3253 = vmatpush1.bf16.msra.mxu0 %v3069_v50 }
 0xb55   :  { %3254 = vmatprep.subr.bf16.mxu0 %v3072_v10 }
 0xb58   :  { %3255 = vmatpush1.bf16.msra.mxu0 %v3071_v58 }
 0xb5b   :  { %3257 = vmatmul.mubr.bf16.vlgmr.msra.gmra.mrb[12].mxu0 %v3708_v32 }
 0xc2e   :  { %v3258_v41 = vpop.f32.mrb[12].mxu0 }
 0xc2f   :  { %v3267_v60 = vrot.slane %v3258_v41, 4  ;;  %v3281_v43 = vmul.f32 %v3258_v41, %v3258_v41  ;;  %v3260_v34 = vpop.f32.mrb[13].mxu0 }
 0xc30   :  { %v3273_v44 = vrot.slane %v3260_v34, 4  ;;  %v3282_v63 = vmul.f32 %v3260_v34, %v3260_v34  ;;  %v3262_v5 = vpop.f32.mrb[14].mxu0 }
 0xc31   :  { %v3268_v47 = vadd.f32 %v3267_v60, %v3258_v41  ;;  %v3283_v3 = vrot.slane %v3281_v43, 4  ;;  %v3263_v39 = vpop.f32.mrb[15].mxu0 }
 0xc32   :  { %v3274_v51 = vadd.f32 %v3273_v44, %v3260_v34  ;;  %v3289_v1 = vrot.slane %v3282_v63, 4 }
 0xc33   :  { %v3269_v42 = vrot.slane %v3268_v47, 2  ;;  %v3284_v13 = vadd.f32 %v3283_v3, %v3281_v43 }
 0xc34   :  { %v3275_v52 = vrot.slane %v3274_v51, 2  ;;  %v3290_v2 = vadd.f32 %v3289_v1, %v3282_v63 }
 0xc35   :  { %v3270_v36 = vadd.f32 %v3269_v42, %v3268_v47  ;;  %v3285_v18 = vrot.slane %v3284_v13, 2 }
 0xc36   :  { %v3276_v31 = vadd.f32 %v3275_v52, %v3274_v51  ;;  %v3291_v40 = vrot.slane %v3290_v2, 2 }
 0xc37   :  { %v3271_v61 = vrot.slane %v3270_v36, 1  ;;  %v3286_v54 = vadd.f32 %v3285_v18, %v3284_v13 }
 0xc38   :  { %v3277_v14 = vrot.slane %v3276_v31, 1  ;;  %v3292_v0 = vadd.f32 %v3291_v40, %v3290_v2 }
 0xc39   :  { %v3272_v62 = vadd.f32 %v3271_v61, %v3270_v36  ;;  %v3287_v35 = vrot.slane %v3286_v54, 1 }
 0xc3a   :  { %v3293_v8 = vrot.slane %v3292_v0, 1  ;;  %v3278_v9 = vadd.f32 %v3277_v14, %v3276_v31 }
 0xc3b   :  { %v3279_v16 = vmul.f32 0.125, %v3272_v62  ;;  %v3288_v4 = vadd.f32 %v3287_v35, %v3286_v54 }
 0xc3c   :  { %v3294_v48 = vadd.f32 %v3293_v8, %v3292_v0  ;;  %v3280_v49 = vmul.f32 0.125, %v3278_v9 }
 0xc3d   :  { %v3295_v19 = vmul.f32 0.125, %v3288_v4  ;;  %v3297_v20 = vmul.f32 %v3279_v16, %v3279_v16 }
 0xc3e   :  { %v3296_v24 = vmul.f32 0.125, %v3294_v48  ;;  %v3298_v25 = vmul.f32 %v3280_v49, %v3280_v49 }
 0xc3f   :  { %v3299_v26 = vsub.f32 %v3295_v19, %v3297_v20 }
 0xc40   :  { %v3300_v27 = vsub.f32 %v3296_v24, %v3298_v25 }
 0xc41   :  { %v3301_v28 = vmax.f32 %v3299_v26, 0.0 }
 0xc42   :  { %v3302_v29 = vmax.f32 %v3300_v27, 0.0 }
 0xc43   :  { %v3303_v45 = vadd.f32 1e-05, %v3301_v28 }
 0xc44   :  { %v3304_v50 = vadd.f32 1e-05, %v3302_v29 }
 0xc45   :  { %3868 = vrsqrt.f32 %v3303_v45 }
 0xc46   :  { %3870 = vrsqrt.f32 %v3304_v50 }
 0xc4f   :  { %v3869_v10 = vpop.eup %3868 }
 0xc50   :  { %v3871_v58 = vpop.eup %3870 }
 0xc51   :  { %v3309_v32 = vcombine.low %v3869_v10, %v3871_v58 }
 0xc53   :  { %v3316_v15 = vrot.slane %v3309_v32, %v4455_v37 }
 0xc55   :  { %v3323_v12 = vrot.slane %v3316_v15, %v4455_v37 }
 0xc57   :  { %v3325_v59 = vmul.f32 %v3323_v12, %v3265_v33 }
 0xc59   :  { %v3330_v6 = vrot.slane %v3325_v59, %v4477_v55  ;;  %v3334_v17 = vrot.slane %v3325_v59, %v4480_v57 }
 0xc5b   :  { %v3337_v22 = vmul.f32 %v3330_v6, %v3279_v16  ;;  %v3338_v46 = vmul.f32 %v3334_v17, %v3280_v49  ;;  %v3359_v53 = vmul.f32 %v3334_v17, %v3260_v34  ;;  %v3358_v56 = vmul.f32 %v3330_v6, %v3258_v41  ;;  %v3678_v34 = vld [vmem:[#allocation20] ss:$0 sm:$0xff] }
 0xc5d   :  { %v3341_v23 = vcombine.low %v3337_v22, %v3338_v46 }
 0xc5f   :  { %v3348_v11 = vrot.slane %v3341_v23, %v4455_v37 }
 0xc61   :  { %v3355_v21 = vrot.slane %v3348_v11, %v4455_v37 }
 0xc63   :  { %v3357_v38 = vsub.f32 %v3266_v30, %v3355_v21 }
 0xc65   :  { %v3368_v7 = vrot.slane %v3357_v38, %v4480_v57  ;;  %v3364_v60 = vrot.slane %v3357_v38, %v4477_v55 }
 0xc67   :  { %v3372_v43 = vadd.f32 %v3368_v7, %v3359_v53  ;;  %v3371_v44 = vadd.f32 %v3364_v60, %v3358_v56 }
 0xc69   :  { %v3374_v63 = vmax.f32 %v3372_v43, 0.0  ;;  %v3373_v5 = vmax.f32 %v3371_v44, 0.0 }
 0xc6b   :  { %v3376_v47 = vpack.c.bf16 %v3374_v63, %v3374_v63  ;;  %v3375_v3 = vpack.c.bf16 %v3373_v5, %v3373_v5 }
 0xc6d   :  { %3544 = vmatprep.mubr.bf16.mxu1 %v3376_v47 }
 0xc6e   :  { %3545 = vmatmul.mubr.bf16.vlgmr.msra.gmra.mrb[24].mxu1 %v3375_v3 }
 0xd41   :  { %v3726_v41 = vpop.f32.mrb[24].mxu1 }
 0xd42   :  { %v3727_v39 = vpop.f32.mrb[25].mxu1 }
 0xd43   :  { %v3728_v51 = vadd.f32 %v3727_v39, %v3726_v41  ;;  %v3729_v37 = vpop.f32.mrb[26].mxu1 }
 0xd44   :  { %v3730_v1 = vpop.f32.mrb[27].mxu1 }
 0xd45   :  { %v3547_v42 = vadd.f32 %v3728_v51, %v3678_v34 }
 0xd47   :  { %3552 = vst [vmem:[#allocation21] sm:$0xff] %v3547_v42 }
 0xd48   :  { %4081 = shalt.err (!%p4078_p6)
}
 0xd49   :  { %s4082_s19 = scalar_lea.hbm %s4731_s12, 128 }
 0xd4a   :  { %p4083_p7 = scmp.ne.s32.totalorder %s4731_s12, %s4082_s19  ;;  %p4086_p8 = scmp.lt.u32.totalorder %s4082_s19, %s4731_s12 }
 0xd4c   :  { %p4088_p9 = pnand %p4086_p8, %p4083_p7 }
 0xd4e   :  { %4091 = shalt.err (!%p4088_p9)
}
 0xd4f   :  { %3562 = dma.vmem_to_hbm [thread:$0]  %s3560_s8, 128, %s4731_s12, [#allocation8]  }
 0xd50   :  { %4112 = dma.done.wait [#allocation8], 128  }
 0xd51   :  { %4113 = vsyncadd [#allocation8], 4294967168 }
 0xd52   :  { %3566 = vsyncpa [#allocation7], 1 }
 0xd53   :  { %3567 = vsyncpa [#allocation10], 1 }
 0xd54   :  { %3568 = vsyncpa [#allocation13], 1 }
 0xd55   :  { %3569 = vsyncpa [#allocation16], 1 }
 0xd56   :  { %3570 = vsyncpa [#allocation19], 1 }
 0xd57   :  { %3571 = vsyncpa [#allocation8], 1 }
 0xd58   :  { %3572 = vsyncmov [#allocation5] }
 0xd5b   :  { %s3573_s30 = vpop.sfrf %3572 }
 0xd5c   :  { %p3695_p10 = scmp.ne.s32.totalorder %s3573_s30, 0 }
 0xd5e   :  { %3577 = shalt.err (%p3695_p10)  }
 0xd5f   :  { %3579 = vsyncmov [#allocation5 + $0x1] }
 0xd62   :  { %s3580_s7 = vpop.sfrf %3579 }
 0xd63   :  { %p3696_p11 = scmp.ne.s32.totalorder %s3580_s7, 0 }
 0xd65   :  { %3584 = shalt.err (%p3696_p11)  }
 0xd66   :  { %3586 = vsyncmov [#allocation5 + $0x2] }
 0xd69   :  { %s3587_s25 = vpop.sfrf %3586 }
 0xd6a   :  { %p3697_p12 = scmp.ne.s32.totalorder %s3587_s25, 0 }
 0xd6c   :  { %3591 = shalt.err (%p3697_p12)  }

</bundles_post_ra>
